<compile_context>
chip_gen: v7x
topology: tpu7x:2x2x1
jax: 0.10.0
libtpu: 0.0.40
codegen_flags: <defaults>
</compile_context>

<pallas_src>
import functools

import numpy as np

import jax
import jax.numpy as jnp
from jax.experimental import pallas as pl
from jax.experimental.pallas import tpu as pltpu


# ----------------------------------------------------------------------------
# Host-side constant builders (tiny; computed once, reused every call)
# ----------------------------------------------------------------------------
def _tap_masks(H, W):
    """(9, H*W, 1) 0/1 validity mask per 3x3 tap on an HxW grid (pad=1)."""
    m = np.zeros((9, H * W, 1), np.float32)
    for t in range(9):
        di, dj = t // 3 - 1, t % 3 - 1
        for h in range(H):
            for w in range(W):
                if 0 <= h + di < H and 0 <= w + dj < W:
                    m[t, h * W + w, 0] = 1.0
    return m


def _downsample_select(H, W):
    """(H/2*W/2, H*W) 0/1 matrix picking pixels (2h, 2w) of a flattened HxW map."""
    Ho, Wo = H // 2, W // 2
    D = np.zeros((Ho * Wo, H * W), np.float32)
    for ho in range(Ho):
        for wo in range(Wo):
            D[ho * Wo + wo, (2 * ho) * W + (2 * wo)] = 1.0
    return D


def _upsample_nearest(Hc, Wc):
    """(4*Hc*Wc, Hc*Wc) 0/1 matrix: nearest-neighbour 2x upsample of a flat map."""
    Hf, Wf = 2 * Hc, 2 * Wc
    U = np.zeros((Hf * Wf, Hc * Wc), np.float32)
    for hf in range(Hf):
        for wf in range(Wf):
            U[hf * Wf + wf, (hf // 2) * Wc + (wf // 2)] = 1.0
    return U


def make_constants(H, W):
    H1, W1 = H // 2, W // 2
    H2, W2 = H1 // 2, W1 // 2
    H3, W3 = H2 // 2, W2 // 2
    bf = lambda a: jnp.asarray(a, jnp.bfloat16)   # 0/1 data: exact in bf16
    return {
        "m1": bf(_tap_masks(H1, W1)),            # masks on the H/2 grid
        "m2": bf(_tap_masks(H2, W2)),            # masks on the H/4 grid
        "m3": bf(_tap_masks(H3, W3)),            # masks on the H/8 grid
        "d2": bf(_downsample_select(H1, W1)),    # stride-2 select H/2 -> H/4
        "d3": bf(_downsample_select(H2, W2)),    # stride-2 select H/4 -> H/8
        "u0": bf(_upsample_nearest(H2, W2)),     # upsample H/4 -> H/2
        "u1": bf(_upsample_nearest(H3, W3)),     # upsample H/8 -> H/4
    }


# ----------------------------------------------------------------------------
# Parameters (deterministic) + one-time packing into matmul layout (bf16)
# ----------------------------------------------------------------------------
def make_params():
    key = jax.random.PRNGKey(42)

    def conv_w(k, kh, kw, cin, cout):
        k1, k2 = jax.random.split(k)
        w = jax.random.normal(k1, (kh, kw, cin, cout), jnp.float32) * 0.1
        b = jax.random.normal(k2, (cout,), jnp.float32) * 0.01
        return w, b

    keys = jax.random.split(key, 9)
    p = {}
    p["bb1"] = conv_w(keys[0], 3, 3, 4, 8)
    p["bb2"] = conv_w(keys[1], 3, 3, 8, 16)
    p["bb3"] = conv_w(keys[2], 3, 3, 16, 32)
    p["lat0"] = conv_w(keys[3], 1, 1, 8, 16)
    p["lat1"] = conv_w(keys[4], 1, 1, 16, 16)
    p["lat2"] = conv_w(keys[5], 1, 1, 32, 16)
    p["out0"] = conv_w(keys[6], 3, 3, 16, 16)
    p["out1"] = conv_w(keys[7], 3, 3, 16, 16)
    p["out2"] = conv_w(keys[8], 3, 3, 16, 16)
    return p


def pack_params(raw):
    """One-time hoisted reshape: (3,3,Cin,Cout) -> (9*Cin, Cout), bf16 weights.

    Row index (i*3+j)*Cin + ci matches the tap/channel order of the in-kernel
    im2col (taps concatenated on the lane axis, each Cin wide).
    """
    bf = lambda a: a.astype(jnp.bfloat16)
    p = {}
    for name, key in (("w1", "bb1"), ("w2", "bb2"), ("w3", "bb3")):
        w, b = raw[key]
        p[name] = bf(w.reshape(-1, w.shape[-1]))
        p["b" + name[1:]] = b.reshape(1, -1)                 # bias stays f32
    for i in range(3):
        wl, bl = raw[f"lat{i}"]
        p[f"wl{i}"] = bf(wl.reshape(wl.shape[2], wl.shape[3]))
        p[f"bl{i}"] = bl.reshape(1, -1)
        wo, bo = raw[f"out{i}"]
        p[f"wo{i}"] = bf(wo.reshape(-1, wo.shape[-1]))
        p[f"bo{i}"] = bo.reshape(1, -1)
    return p


# ----------------------------------------------------------------------------
# Tiny XLA glue: im2col for the FIRST conv only (its input is external)
# ----------------------------------------------------------------------------
def _im2col(x, k, stride, pad):
    N, H, W, C = x.shape
    xp = jnp.pad(x, ((0, 0), (pad, pad), (pad, pad), (0, 0)))
    Ho = (H + 2 * pad - k) // stride + 1
    Wo = (W + 2 * pad - k) // stride + 1
    patches = []
    for i in range(k):
        for j in range(k):
            patches.append(
                jax.lax.slice(
                    xp,
                    (0, i, j, 0),
                    (N, i + (Ho - 1) * stride + 1, j + (Wo - 1) * stride + 1, C),
                    (1, stride, stride, 1)))
    return jnp.concatenate(patches, axis=-1).reshape(N, Ho * Wo, k * k * C)


# ----------------------------------------------------------------------------
# In-kernel helpers
# ----------------------------------------------------------------------------
def _bf(x):
    return x.astype(jnp.bfloat16)


def _mm(a, b):
    """bf16 x bf16 MXU matmul with f32 accumulation."""
    return jnp.dot(_bf(a), _bf(b), preferred_element_type=jnp.float32)


def _shift_rows(x, r):
    """shifted[m] = x[m + r] for in-range m, zero elsewhere (static r)."""
    if r == 0:
        return x
    M, C = x.shape
    pad = jnp.zeros((abs(r), C), x.dtype)
    if r > 0:
        return jnp.concatenate([x[r:, :], pad], axis=0)
    return jnp.concatenate([pad, x[:M + r, :]], axis=0)


def _conv3x3_s1(x, masks_ref, w_ref, img_w):
    """3x3 stride-1 pad-1 conv on a flattened (H*W, Cin) map.

    9 static row-shifts (+ 0/1 boundary masks) build the im2col block
    (H*W, 9*Cin), then ONE MXU matmul against w_ref (9*Cin, Cout).
    """
    taps = []
    for t in range(9):
        di, dj = t // 3 - 1, t % 3 - 1
        taps.append(_shift_rows(x, di * img_w + dj) * masks_ref[t])
    cols = jnp.concatenate(taps, axis=-1)            # (M, 9*Cin)
    return _mm(cols, w_ref[...])                     # (M, Cout) f32


# ----------------------------------------------------------------------------
# The fused Pallas kernel: whole backbone + FPN, one launch, grid over batch
# ----------------------------------------------------------------------------
def _fused_fpn_kernel(
    cols1_ref, w1_ref, b1_ref,
    w2_ref, b2_ref, d2_ref, m1_ref,
    w3_ref, b3_ref, d3_ref, m2_ref,
    wl0_ref, bl0_ref, wl1_ref, bl1_ref, wl2_ref, bl2_ref,
    wo0_ref, bo0_ref, wo1_ref, bo1_ref, wo2_ref, bo2_ref,
    m3_ref, u0_ref, u1_ref,
    f0_ref, f1_ref, f2_ref,
    *, w1_img, w2_img, w3_img,
):
    # ---- backbone (conv + ReLU); stride-2 = stride-1 conv + 0/1 row select ----
    c1 = jnp.maximum(_mm(cols1_ref[0], w1_ref[...]) + b1_ref[...], 0.0)   # (M1, 8)

    y2 = _conv3x3_s1(c1, m1_ref, w2_ref, w1_img)                          # (M1, 16)
    c2 = jnp.maximum(_mm(d2_ref[...], y2) + b2_ref[...], 0.0)             # (M2, 16)

    y3 = _conv3x3_s1(c2, m2_ref, w3_ref, w2_img)                          # (M2, 32)
    c3 = jnp.maximum(_mm(d3_ref[...], y3) + b3_ref[...], 0.0)             # (M3, 32)

    # ---- FPN lateral 1x1 convs (no ReLU) ----
    lat0 = _mm(c1, wl0_ref[...]) + bl0_ref[...]                           # (M1, 16)
    lat1 = _mm(c2, wl1_ref[...]) + bl1_ref[...]                           # (M2, 16)
    lat2 = _mm(c3, wl2_ref[...]) + bl2_ref[...]                           # (M3, 16)

    # ---- top-down merge (nearest-2x upsample + add) + 3x3 output convs ----
    inner2 = lat2
    f2_ref[0] = _conv3x3_s1(inner2, m3_ref, wo2_ref, w3_img) + bo2_ref[...]

    inner1 = lat1 + _mm(u1_ref[...], inner2)
    f1_ref[0] = _conv3x3_s1(inner1, m2_ref, wo1_ref, w2_img) + bo1_ref[...]

    inner0 = lat0 + _mm(u0_ref[...], inner1)
    f0_ref[0] = _conv3x3_s1(inner0, m1_ref, wo0_ref, w1_img) + bo0_ref[...]


def backbone_fpn_forward(x_nchw, packed, consts):
    N, _, H, W = x_nchw.shape
    H1, W1 = H // 2, W // 2
    H2, W2 = H1 // 2, W1 // 2
    H3, W3 = H2 // 2, W2 // 2
    M1, M2, M3 = H1 * W1, H2 * W2, H3 * W3

    x = jnp.transpose(x_nchw, (0, 2, 3, 1)).astype(jnp.float32)     # NHWC
    cols1 = _im2col(x, k=3, stride=2, pad=1)                        # (N, M1, 9*Cin)

    inputs = (
        cols1,
        packed["w1"], packed["b1"],
        packed["w2"], packed["b2"], consts["d2"], consts["m1"],
        packed["w3"], packed["b3"], consts["d3"], consts["m2"],
        packed["wl0"], packed["bl0"], packed["wl1"], packed["bl1"],
        packed["wl2"], packed["bl2"],
        packed["wo0"], packed["bo0"], packed["wo1"], packed["bo1"],
        packed["wo2"], packed["bo2"],
        consts["m3"], consts["u0"], consts["u1"],
    )

    def batch_spec(a):                      # block only the leading batch axis
        nz = a.ndim - 1
        return pl.BlockSpec((1,) + a.shape[1:],
                            lambda n, _nz=nz: (n,) + (0,) * _nz)

    def const_spec(a):                      # constant block, DMA'd once
        z = (0,) * a.ndim
        return pl.BlockSpec(a.shape, lambda n, _z=z: _z)

    in_specs = [batch_spec(cols1)] + [const_spec(a) for a in inputs[1:]]

    out_ch = packed["wo0"].shape[-1]
    out_shape = (
        jax.ShapeDtypeStruct((N, M1, out_ch), jnp.float32),
        jax.ShapeDtypeStruct((N, M2, out_ch), jnp.float32),
        jax.ShapeDtypeStruct((N, M3, out_ch), jnp.float32),
    )
    out_specs = tuple(
        pl.BlockSpec((1,) + s.shape[1:], lambda n: (n, 0, 0)) for s in out_shape)

    kernel = functools.partial(_fused_fpn_kernel,
                               w1_img=W1, w2_img=W2, w3_img=W3)

    # NOTE: for non-toy resolutions the flattened spatial M axis should become
    # an extra (parallel) grid dimension with halo-aware tiles; at 16x16 input
    # everything fits comfortably in VMEM so a batch-only grid is optimal.
    f0, f1, f2 = pl.pallas_call(
        kernel,
        out_shape=out_shape,
        grid=(N,),
        in_specs=in_specs,
        out_specs=out_specs,
        compiler_params=pltpu.CompilerParams(
            dimension_semantics=("parallel",)),     # 2 TCs on v7x, no-op elsewhere
    )(*inputs)

    def to_nchw(f, Hs, Ws):
        return jnp.transpose(f.reshape(N, Hs, Ws, out_ch), (0, 3, 1, 2))

    return {
        "feat0": to_nchw(f0, H1, W1),
        "feat1": to_nchw(f1, H2, W2),
        "feat2": to_nchw(f2, H3, W3),
    }


# ----------------------------------------------------------------------------
# Pure-JAX (XLA) reference of the same module, for a numerical check
# ----------------------------------------------------------------------------
def reference_forward(x_nchw, raw):
    x = jnp.transpose(x_nchw, (0, 2, 3, 1)).astype(jnp.float32)

    def conv(h, w, b, stride, pad, relu=False):
        y = jax.lax.conv_general_dilated(
            h, w, (stride, stride), [(pad, pad), (pad, pad)],
            dimension_numbers=("NHWC", "HWIO", "NHWC"))
        y = y + b
        return jnp.maximum(y, 0.0) if relu else y

    c1 = conv(x, *raw["bb1"], 2, 1, True)
    c2 = conv(c1, *raw["bb2"], 2, 1, True)
    c3 = conv(c2, *raw["bb3"], 2, 1, True)
    lats = [conv(c1, *raw["lat0"], 1, 0),
            conv(c2, *raw["lat1"], 1, 0),
            conv(c3, *raw["lat2"], 1, 0)]
    outs = [raw["out0"], raw["out1"], raw["out2"]]

    last = lats[-1]
    results = [conv(last, *outs[-1], 1, 1)]
    for idx in range(len(lats) - 2, -1, -1):
        td = jnp.repeat(jnp.repeat(last, 2, axis=1), 2, axis=2)
        last = lats[idx] + td
        results.insert(0, conv(last, *outs[idx], 1, 1))
    return {f"feat{i}": jnp.transpose(r, (0, 3, 1, 2))
            for i, r in enumerate(results)}


if __name__ == "__main__":
    key = jax.random.PRNGKey(0)
    x = jax.random.normal(key, (2, 4, 16, 16), jnp.float32)   # NCHW, like PyTorch

    raw = make_params()
    packed = pack_params(raw)                  # hoisted once (bf16 matmul layout)
    consts = make_constants(H=16, W=16)        # masks / select / upsample, once

    fwd = jax.jit(backbone_fpn_forward)
    out = fwd(x, packed, consts)
    out = jax.tree_util.tree_map(jax.block_until_ready, out)

    # expected pyramid shapes (N, 16, H/2^k, W/2^k) for k = 1..3
    assert out["feat0"].shape == (2, 16, 8, 8)
    assert out["feat1"].shape == (2, 16, 4, 4)
    assert out["feat2"].shape == (2, 16, 2, 2)
    assert all(bool(jnp.all(jnp.isfinite(v))) for v in out.values())

    # loose tolerance: kernel uses bf16 weights / bf16 MXU passes, reference
    # uses XLA convs at default TPU matmul precision.
    ref = reference_forward(x, raw)
    for k in ("feat0", "feat1", "feat2"):
        np.testing.assert_allclose(np.asarray(out[k]), np.asarray(ref[k]),
                                   rtol=1e-1, atol=5e-2)

    print("KERNEL_OK")
</pallas_src>

<mosaic_0001>
module attributes {stable_mosaic.version = 11 : i64} {
  func.func @_fused_fpn_kernel(%arg0: i32, %arg1: memref<1x64x36xf32, #tpu.memory_space<vmem>>, %arg2: memref<36x8xbf16, #tpu.memory_space<vmem>>, %arg3: memref<1x8xf32, #tpu.memory_space<vmem>>, %arg4: memref<72x16xbf16, #tpu.memory_space<vmem>>, %arg5: memref<1x16xf32, #tpu.memory_space<vmem>>, %arg6: memref<16x64xbf16, #tpu.memory_space<vmem>>, %arg7: memref<9x64x1xbf16, #tpu.memory_space<vmem>>, %arg8: memref<144x32xbf16, #tpu.memory_space<vmem>>, %arg9: memref<1x32xf32, #tpu.memory_space<vmem>>, %arg10: memref<4x16xbf16, #tpu.memory_space<vmem>>, %arg11: memref<9x16x1xbf16, #tpu.memory_space<vmem>>, %arg12: memref<8x16xbf16, #tpu.memory_space<vmem>>, %arg13: memref<1x16xf32, #tpu.memory_space<vmem>>, %arg14: memref<16x16xbf16, #tpu.memory_space<vmem>>, %arg15: memref<1x16xf32, #tpu.memory_space<vmem>>, %arg16: memref<32x16xbf16, #tpu.memory_space<vmem>>, %arg17: memref<1x16xf32, #tpu.memory_space<vmem>>, %arg18: memref<144x16xbf16, #tpu.memory_space<vmem>>, %arg19: memref<1x16xf32, #tpu.memory_space<vmem>>, %arg20: memref<144x16xbf16, #tpu.memory_space<vmem>>, %arg21: memref<1x16xf32, #tpu.memory_space<vmem>>, %arg22: memref<144x16xbf16, #tpu.memory_space<vmem>>, %arg23: memref<1x16xf32, #tpu.memory_space<vmem>>, %arg24: memref<9x4x1xbf16, #tpu.memory_space<vmem>>, %arg25: memref<64x16xbf16, #tpu.memory_space<vmem>>, %arg26: memref<16x4xbf16, #tpu.memory_space<vmem>>, %arg27: memref<1x64x16xf32, #tpu.memory_space<vmem>>, %arg28: memref<1x16x16xf32, #tpu.memory_space<vmem>>, %arg29: memref<1x4x16xf32, #tpu.memory_space<vmem>>) attributes {dimension_semantics = [#tpu.dimension_semantics<parallel>], iteration_bounds = array<i64: 2>, scalar_prefetch = 0 : i64, scratch_operands = 0 : i64, tpu.core_type = #tpu.core_type<tc>, window_params = [{transform_indices = @transform_0, window_bounds = array<i64: 1, 64, 36>}, {pipeline_mode = #tpu.pipeline_mode<synchronous>, transform_indices = @transform_1, window_bounds = array<i64: 36, 8>}, {pipeline_mode = #tpu.pipeline_mode<synchronous>, transform_indices = @transform_2, window_bounds = array<i64: 1, 8>}, {pipeline_mode = #tpu.pipeline_mode<synchronous>, transform_indices = @transform_3, window_bounds = array<i64: 72, 16>}, {pipeline_mode = #tpu.pipeline_mode<synchronous>, transform_indices = @transform_4, window_bounds = array<i64: 1, 16>}, {pipeline_mode = #tpu.pipeline_mode<synchronous>, transform_indices = @transform_5, window_bounds = array<i64: 16, 64>}, {pipeline_mode = #tpu.pipeline_mode<synchronous>, transform_indices = @transform_6, window_bounds = array<i64: 9, 64, 1>}, {pipeline_mode = #tpu.pipeline_mode<synchronous>, transform_indices = @transform_7, window_bounds = array<i64: 144, 32>}, {pipeline_mode = #tpu.pipeline_mode<synchronous>, transform_indices = @transform_8, window_bounds = array<i64: 1, 32>}, {pipeline_mode = #tpu.pipeline_mode<synchronous>, transform_indices = @transform_9, window_bounds = array<i64: 4, 16>}, {pipeline_mode = #tpu.pipeline_mode<synchronous>, transform_indices = @transform_10, window_bounds = array<i64: 9, 16, 1>}, {pipeline_mode = #tpu.pipeline_mode<synchronous>, transform_indices = @transform_11, window_bounds = array<i64: 8, 16>}, {pipeline_mode = #tpu.pipeline_mode<synchronous>, transform_indices = @transform_12, window_bounds = array<i64: 1, 16>}, {pipeline_mode = #tpu.pipeline_mode<synchronous>, transform_indices = @transform_13, window_bounds = array<i64: 16, 16>}, {pipeline_mode = #tpu.pipeline_mode<synchronous>, transform_indices = @transform_14, window_bounds = array<i64: 1, 16>}, {pipeline_mode = #tpu.pipeline_mode<synchronous>, transform_indices = @transform_15, window_bounds = array<i64: 32, 16>}, {pipeline_mode = #tpu.pipeline_mode<synchronous>, transform_indices = @transform_16, window_bounds = array<i64: 1, 16>}, {pipeline_mode = #tpu.pipeline_mode<synchronous>, transform_indices = @transform_17, window_bounds = array<i64: 144, 16>}, {pipeline_mode = #tpu.pipeline_mode<synchronous>, transform_indices = @transform_18, window_bounds = array<i64: 1, 16>}, {pipeline_mode = #tpu.pipeline_mode<synchronous>, transform_indices = @transform_19, window_bounds = array<i64: 144, 16>}, {pipeline_mode = #tpu.pipeline_mode<synchronous>, transform_indices = @transform_20, window_bounds = array<i64: 1, 16>}, {pipeline_mode = #tpu.pipeline_mode<synchronous>, transform_indices = @transform_21, window_bounds = array<i64: 144, 16>}, {pipeline_mode = #tpu.pipeline_mode<synchronous>, transform_indices = @transform_22, window_bounds = array<i64: 1, 16>}, {pipeline_mode = #tpu.pipeline_mode<synchronous>, transform_indices = @transform_23, window_bounds = array<i64: 9, 4, 1>}, {pipeline_mode = #tpu.pipeline_mode<synchronous>, transform_indices = @transform_24, window_bounds = array<i64: 64, 16>}, {pipeline_mode = #tpu.pipeline_mode<synchronous>, transform_indices = @transform_25, window_bounds = array<i64: 16, 4>}, {transform_indices = @transform_26, window_bounds = array<i64: 1, 64, 16>}, {transform_indices = @transform_27, window_bounds = array<i64: 1, 16, 16>}, {transform_indices = @transform_28, window_bounds = array<i64: 1, 4, 16>}]} {
    %c0 = arith.constant 0 : index
    %c0_0 = arith.constant 0 : index
    %c0_1 = arith.constant 0 : index
    %0 = vector.load %arg1[%c0, %c0_0, %c0_1] : memref<1x64x36xf32, #tpu.memory_space<vmem>>, vector<1x64x36xf32>
    %1 = vector.shape_cast %0 : vector<1x64x36xf32> to vector<64x36xf32>
    %c0_2 = arith.constant 0 : index
    %c0_3 = arith.constant 0 : index
    %2 = vector.load %arg2[%c0_2, %c0_3] : memref<36x8xbf16, #tpu.memory_space<vmem>>, vector<36x8xbf16>
    %3 = arith.truncf %1 : vector<64x36xf32> to vector<64x36xbf16>
    %cst = arith.constant dense<0.000000e+00> : vector<64x8xf32>
    %4 = tpu.matmul %3, %2, %cst {dimension_numbers = #tpu.dot_dimension_numbers<[1], [0], [0], [1], [0, 0, 1, 1], [], []>} : vector<64x36xbf16>, vector<36x8xbf16>, vector<64x8xf32> -> vector<64x8xf32>
    %c0_4 = arith.constant 0 : index
    %c0_5 = arith.constant 0 : index
    %5 = vector.load %arg3[%c0_4, %c0_5] : memref<1x8xf32, #tpu.memory_space<vmem>>, vector<1x8xf32>
    %6 = vector.broadcast %5 : vector<1x8xf32> to vector<64x8xf32>
    %7 = arith.addf %4, %6 : vector<64x8xf32>
    %cst_6 = arith.constant 0.000000e+00 : f32
    %8 = vector.broadcast %cst_6 : f32 to vector<64x8xf32>
    %9 = arith.maximumf %7, %8 : vector<64x8xf32>
    %cst_7 = arith.constant 0.000000e+00 : f32
    %10 = vector.broadcast %cst_7 : f32 to vector<9x8xf32>
    %11 = vector.extract_strided_slice %9 {offsets = [0, 0], sizes = [55, 8], strides = [1, 1]} : vector<64x8xf32> to vector<55x8xf32>
    %12 = tpu.concatenate %10, %11 in 0 : vector<9x8xf32>, vector<55x8xf32> -> vector<64x8xf32>
    %c0_8 = arith.constant 0 : index
    %c0_9 = arith.constant 0 : index
    %c0_10 = arith.constant 0 : index
    %13 = vector.load %arg7[%c0_8, %c0_9, %c0_10] : memref<9x64x1xbf16, #tpu.memory_space<vmem>>, vector<1x64x1xbf16>
    %14 = vector.shape_cast %13 : vector<1x64x1xbf16> to vector<64x1xbf16>
    %15 = arith.extf %14 : vector<64x1xbf16> to vector<64x1xf32>
    %16 = vector.broadcast %15 : vector<64x1xf32> to vector<64x8xf32>
    %17 = arith.mulf %12, %16 : vector<64x8xf32>
    %cst_11 = arith.constant 0.000000e+00 : f32
    %18 = vector.broadcast %cst_11 : f32 to vector<8x8xf32>
    %19 = vector.extract_strided_slice %9 {offsets = [0, 0], sizes = [56, 8], strides = [1, 1]} : vector<64x8xf32> to vector<56x8xf32>
    %20 = tpu.concatenate %18, %19 in 0 : vector<8x8xf32>, vector<56x8xf32> -> vector<64x8xf32>
    %c1 = arith.constant 1 : index
    %c0_12 = arith.constant 0 : index
    %c0_13 = arith.constant 0 : index
    %21 = vector.load %arg7[%c1, %c0_12, %c0_13] : memref<9x64x1xbf16, #tpu.memory_space<vmem>>, vector<1x64x1xbf16>
    %22 = vector.shape_cast %21 : vector<1x64x1xbf16> to vector<64x1xbf16>
    %23 = arith.extf %22 : vector<64x1xbf16> to vector<64x1xf32>
    %24 = vector.broadcast %23 : vector<64x1xf32> to vector<64x8xf32>
    %25 = arith.mulf %20, %24 : vector<64x8xf32>
    %cst_14 = arith.constant 0.000000e+00 : f32
    %26 = vector.broadcast %cst_14 : f32 to vector<7x8xf32>
    %27 = vector.extract_strided_slice %9 {offsets = [0, 0], sizes = [57, 8], strides = [1, 1]} : vector<64x8xf32> to vector<57x8xf32>
    %28 = tpu.concatenate %26, %27 in 0 : vector<7x8xf32>, vector<57x8xf32> -> vector<64x8xf32>
    %c2 = arith.constant 2 : index
    %c0_15 = arith.constant 0 : index
    %c0_16 = arith.constant 0 : index
    %29 = vector.load %arg7[%c2, %c0_15, %c0_16] : memref<9x64x1xbf16, #tpu.memory_space<vmem>>, vector<1x64x1xbf16>
    %30 = vector.shape_cast %29 : vector<1x64x1xbf16> to vector<64x1xbf16>
    %31 = arith.extf %30 : vector<64x1xbf16> to vector<64x1xf32>
    %32 = vector.broadcast %31 : vector<64x1xf32> to vector<64x8xf32>
    %33 = arith.mulf %28, %32 : vector<64x8xf32>
    %cst_17 = arith.constant 0.000000e+00 : f32
    %34 = vector.broadcast %cst_17 : f32 to vector<1x8xf32>
    %35 = vector.extract_strided_slice %9 {offsets = [0, 0], sizes = [63, 8], strides = [1, 1]} : vector<64x8xf32> to vector<63x8xf32>
    %36 = tpu.concatenate %34, %35 in 0 : vector<1x8xf32>, vector<63x8xf32> -> vector<64x8xf32>
    %c3 = arith.constant 3 : index
    %c0_18 = arith.constant 0 : index
    %c0_19 = arith.constant 0 : index
    %37 = vector.load %arg7[%c3, %c0_18, %c0_19] : memref<9x64x1xbf16, #tpu.memory_space<vmem>>, vector<1x64x1xbf16>
    %38 = vector.shape_cast %37 : vector<1x64x1xbf16> to vector<64x1xbf16>
    %39 = arith.extf %38 : vector<64x1xbf16> to vector<64x1xf32>
    %40 = vector.broadcast %39 : vector<64x1xf32> to vector<64x8xf32>
    %41 = arith.mulf %36, %40 : vector<64x8xf32>
    %c4 = arith.constant 4 : index
    %c0_20 = arith.constant 0 : index
    %c0_21 = arith.constant 0 : index
    %42 = vector.load %arg7[%c4, %c0_20, %c0_21] : memref<9x64x1xbf16, #tpu.memory_space<vmem>>, vector<1x64x1xbf16>
    %43 = vector.shape_cast %42 : vector<1x64x1xbf16> to vector<64x1xbf16>
    %44 = arith.extf %43 : vector<64x1xbf16> to vector<64x1xf32>
    %45 = vector.broadcast %44 : vector<64x1xf32> to vector<64x8xf32>
    %46 = arith.mulf %9, %45 : vector<64x8xf32>
    %cst_22 = arith.constant 0.000000e+00 : f32
    %47 = vector.broadcast %cst_22 : f32 to vector<1x8xf32>
    %48 = vector.extract_strided_slice %9 {offsets = [1, 0], sizes = [63, 8], strides = [1, 1]} : vector<64x8xf32> to vector<63x8xf32>
    %49 = tpu.concatenate %48, %47 in 0 : vector<63x8xf32>, vector<1x8xf32> -> vector<64x8xf32>
    %c5 = arith.constant 5 : index
    %c0_23 = arith.constant 0 : index
    %c0_24 = arith.constant 0 : index
    %50 = vector.load %arg7[%c5, %c0_23, %c0_24] : memref<9x64x1xbf16, #tpu.memory_space<vmem>>, vector<1x64x1xbf16>
    %51 = vector.shape_cast %50 : vector<1x64x1xbf16> to vector<64x1xbf16>
    %52 = arith.extf %51 : vector<64x1xbf16> to vector<64x1xf32>
    %53 = vector.broadcast %52 : vector<64x1xf32> to vector<64x8xf32>
    %54 = arith.mulf %49, %53 : vector<64x8xf32>
    %cst_25 = arith.constant 0.000000e+00 : f32
    %55 = vector.broadcast %cst_25 : f32 to vector<7x8xf32>
    %56 = vector.extract_strided_slice %9 {offsets = [7, 0], sizes = [57, 8], strides = [1, 1]} : vector<64x8xf32> to vector<57x8xf32>
    %57 = tpu.concatenate %56, %55 in 0 : vector<57x8xf32>, vector<7x8xf32> -> vector<64x8xf32>
    %c6 = arith.constant 6 : index
    %c0_26 = arith.constant 0 : index
    %c0_27 = arith.constant 0 : index
    %58 = vector.load %arg7[%c6, %c0_26, %c0_27] : memref<9x64x1xbf16, #tpu.memory_space<vmem>>, vector<1x64x1xbf16>
    %59 = vector.shape_cast %58 : vector<1x64x1xbf16> to vector<64x1xbf16>
    %60 = arith.extf %59 : vector<64x1xbf16> to vector<64x1xf32>
    %61 = vector.broadcast %60 : vector<64x1xf32> to vector<64x8xf32>
    %62 = arith.mulf %57, %61 : vector<64x8xf32>
    %cst_28 = arith.constant 0.000000e+00 : f32
    %63 = vector.broadcast %cst_28 : f32 to vector<8x8xf32>
    %64 = vector.extract_strided_slice %9 {offsets = [8, 0], sizes = [56, 8], strides = [1, 1]} : vector<64x8xf32> to vector<56x8xf32>
    %65 = tpu.concatenate %64, %63 in 0 : vector<56x8xf32>, vector<8x8xf32> -> vector<64x8xf32>
    %c7 = arith.constant 7 : index
    %c0_29 = arith.constant 0 : index
    %c0_30 = arith.constant 0 : index
    %66 = vector.load %arg7[%c7, %c0_29, %c0_30] : memref<9x64x1xbf16, #tpu.memory_space<vmem>>, vector<1x64x1xbf16>
    %67 = vector.shape_cast %66 : vector<1x64x1xbf16> to vector<64x1xbf16>
    %68 = arith.extf %67 : vector<64x1xbf16> to vector<64x1xf32>
    %69 = vector.broadcast %68 : vector<64x1xf32> to vector<64x8xf32>
    %70 = arith.mulf %65, %69 : vector<64x8xf32>
    %cst_31 = arith.constant 0.000000e+00 : f32
    %71 = vector.broadcast %cst_31 : f32 to vector<9x8xf32>
    %72 = vector.extract_strided_slice %9 {offsets = [9, 0], sizes = [55, 8], strides = [1, 1]} : vector<64x8xf32> to vector<55x8xf32>
    %73 = tpu.concatenate %72, %71 in 0 : vector<55x8xf32>, vector<9x8xf32> -> vector<64x8xf32>
    %c8 = arith.constant 8 : index
    %c0_32 = arith.constant 0 : index
    %c0_33 = arith.constant 0 : index
    %74 = vector.load %arg7[%c8, %c0_32, %c0_33] : memref<9x64x1xbf16, #tpu.memory_space<vmem>>, vector<1x64x1xbf16>
    %75 = vector.shape_cast %74 : vector<1x64x1xbf16> to vector<64x1xbf16>
    %76 = arith.extf %75 : vector<64x1xbf16> to vector<64x1xf32>
    %77 = vector.broadcast %76 : vector<64x1xf32> to vector<64x8xf32>
    %78 = arith.mulf %73, %77 : vector<64x8xf32>
    %79 = tpu.concatenate %17, %25, %33, %41, %46, %54, %62, %70, %78 in 1 : vector<64x8xf32>, vector<64x8xf32>, vector<64x8xf32>, vector<64x8xf32>, vector<64x8xf32>, vector<64x8xf32>, vector<64x8xf32>, vector<64x8xf32>, vector<64x8xf32> -> vector<64x72xf32>
    %c0_34 = arith.constant 0 : index
    %c0_35 = arith.constant 0 : index
    %80 = vector.load %arg4[%c0_34, %c0_35] : memref<72x16xbf16, #tpu.memory_space<vmem>>, vector<72x16xbf16>
    %81 = arith.truncf %79 : vector<64x72xf32> to vector<64x72xbf16>
    %cst_36 = arith.constant dense<0.000000e+00> : vector<64x16xf32>
    %82 = tpu.matmul %81, %80, %cst_36 {dimension_numbers = #tpu.dot_dimension_numbers<[1], [0], [0], [1], [0, 0, 1, 1], [], []>} : vector<64x72xbf16>, vector<72x16xbf16>, vector<64x16xf32> -> vector<64x16xf32>
    %c0_37 = arith.constant 0 : index
    %c0_38 = arith.constant 0 : index
    %83 = vector.load %arg6[%c0_37, %c0_38] : memref<16x64xbf16, #tpu.memory_space<vmem>>, vector<16x64xbf16>
    %84 = arith.truncf %82 : vector<64x16xf32> to vector<64x16xbf16>
    %cst_39 = arith.constant dense<0.000000e+00> : vector<16x16xf32>
    %85 = tpu.matmul %83, %84, %cst_39 {dimension_numbers = #tpu.dot_dimension_numbers<[1], [0], [0], [1], [0, 0, 1, 1], [], []>} : vector<16x64xbf16>, vector<64x16xbf16>, vector<16x16xf32> -> vector<16x16xf32>
    %c0_40 = arith.constant 0 : index
    %c0_41 = arith.constant 0 : index
    %86 = vector.load %arg5[%c0_40, %c0_41] : memref<1x16xf32, #tpu.memory_space<vmem>>, vector<1x16xf32>
    %87 = vector.broadcast %86 : vector<1x16xf32> to vector<16x16xf32>
    %88 = arith.addf %85, %87 : vector<16x16xf32>
    %cst_42 = arith.constant 0.000000e+00 : f32
    %89 = vector.broadcast %cst_42 : f32 to vector<16x16xf32>
    %90 = arith.maximumf %88, %89 : vector<16x16xf32>
    %cst_43 = arith.constant 0.000000e+00 : f32
    %91 = vector.broadcast %cst_43 : f32 to vector<5x16xf32>
    %92 = vector.extract_strided_slice %90 {offsets = [0, 0], sizes = [11, 16], strides = [1, 1]} : vector<16x16xf32> to vector<11x16xf32>
    %93 = tpu.concatenate %91, %92 in 0 : vector<5x16xf32>, vector<11x16xf32> -> vector<16x16xf32>
    %c0_44 = arith.constant 0 : index
    %c0_45 = arith.constant 0 : index
    %c0_46 = arith.constant 0 : index
    %94 = vector.load %arg11[%c0_44, %c0_45, %c0_46] : memref<9x16x1xbf16, #tpu.memory_space<vmem>>, vector<1x16x1xbf16>
    %95 = vector.shape_cast %94 : vector<1x16x1xbf16> to vector<16x1xbf16>
    %96 = arith.extf %95 : vector<16x1xbf16> to vector<16x1xf32>
    %97 = vector.broadcast %96 : vector<16x1xf32> to vector<16x16xf32>
    %98 = arith.mulf %93, %97 : vector<16x16xf32>
    %cst_47 = arith.constant 0.000000e+00 : f32
    %99 = vector.broadcast %cst_47 : f32 to vector<4x16xf32>
    %100 = vector.extract_strided_slice %90 {offsets = [0, 0], sizes = [12, 16], strides = [1, 1]} : vector<16x16xf32> to vector<12x16xf32>
    %101 = tpu.concatenate %99, %100 in 0 : vector<4x16xf32>, vector<12x16xf32> -> vector<16x16xf32>
    %c1_48 = arith.constant 1 : index
    %c0_49 = arith.constant 0 : index
    %c0_50 = arith.constant 0 : index
    %102 = vector.load %arg11[%c1_48, %c0_49, %c0_50] : memref<9x16x1xbf16, #tpu.memory_space<vmem>>, vector<1x16x1xbf16>
    %103 = vector.shape_cast %102 : vector<1x16x1xbf16> to vector<16x1xbf16>
    %104 = arith.extf %103 : vector<16x1xbf16> to vector<16x1xf32>
    %105 = vector.broadcast %104 : vector<16x1xf32> to vector<16x16xf32>
    %106 = arith.mulf %101, %105 : vector<16x16xf32>
    %cst_51 = arith.constant 0.000000e+00 : f32
    %107 = vector.broadcast %cst_51 : f32 to vector<3x16xf32>
    %108 = vector.extract_strided_slice %90 {offsets = [0, 0], sizes = [13, 16], strides = [1, 1]} : vector<16x16xf32> to vector<13x16xf32>
    %109 = tpu.concatenate %107, %108 in 0 : vector<3x16xf32>, vector<13x16xf32> -> vector<16x16xf32>
    %c2_52 = arith.constant 2 : index
    %c0_53 = arith.constant 0 : index
    %c0_54 = arith.constant 0 : index
    %110 = vector.load %arg11[%c2_52, %c0_53, %c0_54] : memref<9x16x1xbf16, #tpu.memory_space<vmem>>, vector<1x16x1xbf16>
    %111 = vector.shape_cast %110 : vector<1x16x1xbf16> to vector<16x1xbf16>
    %112 = arith.extf %111 : vector<16x1xbf16> to vector<16x1xf32>
    %113 = vector.broadcast %112 : vector<16x1xf32> to vector<16x16xf32>
    %114 = arith.mulf %109, %113 : vector<16x16xf32>
    %cst_55 = arith.constant 0.000000e+00 : f32
    %115 = vector.broadcast %cst_55 : f32 to vector<1x16xf32>
    %116 = vector.extract_strided_slice %90 {offsets = [0, 0], sizes = [15, 16], strides = [1, 1]} : vector<16x16xf32> to vector<15x16xf32>
    %117 = tpu.concatenate %115, %116 in 0 : vector<1x16xf32>, vector<15x16xf32> -> vector<16x16xf32>
    %c3_56 = arith.constant 3 : index
    %c0_57 = arith.constant 0 : index
    %c0_58 = arith.constant 0 : index
    %118 = vector.load %arg11[%c3_56, %c0_57, %c0_58] : memref<9x16x1xbf16, #tpu.memory_space<vmem>>, vector<1x16x1xbf16>
    %119 = vector.shape_cast %118 : vector<1x16x1xbf16> to vector<16x1xbf16>
    %120 = arith.extf %119 : vector<16x1xbf16> to vector<16x1xf32>
    %121 = vector.broadcast %120 : vector<16x1xf32> to vector<16x16xf32>
    %122 = arith.mulf %117, %121 : vector<16x16xf32>
    %c4_59 = arith.constant 4 : index
    %c0_60 = arith.constant 0 : index
    %c0_61 = arith.constant 0 : index
    %123 = vector.load %arg11[%c4_59, %c0_60, %c0_61] : memref<9x16x1xbf16, #tpu.memory_space<vmem>>, vector<1x16x1xbf16>
    %124 = vector.shape_cast %123 : vector<1x16x1xbf16> to vector<16x1xbf16>
    %125 = arith.extf %124 : vector<16x1xbf16> to vector<16x1xf32>
    %126 = vector.broadcast %125 : vector<16x1xf32> to vector<16x16xf32>
    %127 = arith.mulf %90, %126 : vector<16x16xf32>
    %cst_62 = arith.constant 0.000000e+00 : f32
    %128 = vector.broadcast %cst_62 : f32 to vector<1x16xf32>
    %129 = vector.extract_strided_slice %90 {offsets = [1, 0], sizes = [15, 16], strides = [1, 1]} : vector<16x16xf32> to vector<15x16xf32>
    %130 = tpu.concatenate %129, %128 in 0 : vector<15x16xf32>, vector<1x16xf32> -> vector<16x16xf32>
    %c5_63 = arith.constant 5 : index
    %c0_64 = arith.constant 0 : index
    %c0_65 = arith.constant 0 : index
    %131 = vector.load %arg11[%c5_63, %c0_64, %c0_65] : memref<9x16x1xbf16, #tpu.memory_space<vmem>>, vector<1x16x1xbf16>
    %132 = vector.shape_cast %131 : vector<1x16x1xbf16> to vector<16x1xbf16>
    %133 = arith.extf %132 : vector<16x1xbf16> to vector<16x1xf32>
    %134 = vector.broadcast %133 : vector<16x1xf32> to vector<16x16xf32>
    %135 = arith.mulf %130, %134 : vector<16x16xf32>
    %cst_66 = arith.constant 0.000000e+00 : f32
    %136 = vector.broadcast %cst_66 : f32 to vector<3x16xf32>
    %137 = vector.extract_strided_slice %90 {offsets = [3, 0], sizes = [13, 16], strides = [1, 1]} : vector<16x16xf32> to vector<13x16xf32>
    %138 = tpu.concatenate %137, %136 in 0 : vector<13x16xf32>, vector<3x16xf32> -> vector<16x16xf32>
    %c6_67 = arith.constant 6 : index
    %c0_68 = arith.constant 0 : index
    %c0_69 = arith.constant 0 : index
    %139 = vector.load %arg11[%c6_67, %c0_68, %c0_69] : memref<9x16x1xbf16, #tpu.memory_space<vmem>>, vector<1x16x1xbf16>
    %140 = vector.shape_cast %139 : vector<1x16x1xbf16> to vector<16x1xbf16>
    %141 = arith.extf %140 : vector<16x1xbf16> to vector<16x1xf32>
    %142 = vector.broadcast %141 : vector<16x1xf32> to vector<16x16xf32>
    %143 = arith.mulf %138, %142 : vector<16x16xf32>
    %cst_70 = arith.constant 0.000000e+00 : f32
    %144 = vector.broadcast %cst_70 : f32 to vector<4x16xf32>
    %145 = vector.extract_strided_slice %90 {offsets = [4, 0], sizes = [12, 16], strides = [1, 1]} : vector<16x16xf32> to vector<12x16xf32>
    %146 = tpu.concatenate %145, %144 in 0 : vector<12x16xf32>, vector<4x16xf32> -> vector<16x16xf32>
    %c7_71 = arith.constant 7 : index
    %c0_72 = arith.constant 0 : index
    %c0_73 = arith.constant 0 : index
    %147 = vector.load %arg11[%c7_71, %c0_72, %c0_73] : memref<9x16x1xbf16, #tpu.memory_space<vmem>>, vector<1x16x1xbf16>
    %148 = vector.shape_cast %147 : vector<1x16x1xbf16> to vector<16x1xbf16>
    %149 = arith.extf %148 : vector<16x1xbf16> to vector<16x1xf32>
    %150 = vector.broadcast %149 : vector<16x1xf32> to vector<16x16xf32>
    %151 = arith.mulf %146, %150 : vector<16x16xf32>
    %cst_74 = arith.constant 0.000000e+00 : f32
    %152 = vector.broadcast %cst_74 : f32 to vector<5x16xf32>
    %153 = vector.extract_strided_slice %90 {offsets = [5, 0], sizes = [11, 16], strides = [1, 1]} : vector<16x16xf32> to vector<11x16xf32>
    %154 = tpu.concatenate %153, %152 in 0 : vector<11x16xf32>, vector<5x16xf32> -> vector<16x16xf32>
    %c8_75 = arith.constant 8 : index
    %c0_76 = arith.constant 0 : index
    %c0_77 = arith.constant 0 : index
    %155 = vector.load %arg11[%c8_75, %c0_76, %c0_77] : memref<9x16x1xbf16, #tpu.memory_space<vmem>>, vector<1x16x1xbf16>
    %156 = vector.shape_cast %155 : vector<1x16x1xbf16> to vector<16x1xbf16>
    %157 = arith.extf %156 : vector<16x1xbf16> to vector<16x1xf32>
    %158 = vector.broadcast %157 : vector<16x1xf32> to vector<16x16xf32>
    %159 = arith.mulf %154, %158 : vector<16x16xf32>
    %160 = tpu.concatenate %98, %106, %114, %122, %127, %135, %143, %151, %159 in 1 : vector<16x16xf32>, vector<16x16xf32>, vector<16x16xf32>, vector<16x16xf32>, vector<16x16xf32>, vector<16x16xf32>, vector<16x16xf32>, vector<16x16xf32>, vector<16x16xf32> -> vector<16x144xf32>
    %c0_78 = arith.constant 0 : index
    %c0_79 = arith.constant 0 : index
    %161 = vector.load %arg8[%c0_78, %c0_79] : memref<144x32xbf16, #tpu.memory_space<vmem>>, vector<144x32xbf16>
    %162 = arith.truncf %160 : vector<16x144xf32> to vector<16x144xbf16>
    %cst_80 = arith.constant dense<0.000000e+00> : vector<16x32xf32>
    %163 = tpu.matmul %162, %161, %cst_80 {dimension_numbers = #tpu.dot_dimension_numbers<[1], [0], [0], [1], [0, 0, 1, 1], [], []>} : vector<16x144xbf16>, vector<144x32xbf16>, vector<16x32xf32> -> vector<16x32xf32>
    %c0_81 = arith.constant 0 : index
    %c0_82 = arith.constant 0 : index
    %164 = vector.load %arg10[%c0_81, %c0_82] : memref<4x16xbf16, #tpu.memory_space<vmem>>, vector<4x16xbf16>
    %165 = arith.truncf %163 : vector<16x32xf32> to vector<16x32xbf16>
    %cst_83 = arith.constant dense<0.000000e+00> : vector<4x32xf32>
    %166 = tpu.matmul %164, %165, %cst_83 {dimension_numbers = #tpu.dot_dimension_numbers<[1], [0], [0], [1], [0, 0, 1, 1], [], []>} : vector<4x16xbf16>, vector<16x32xbf16>, vector<4x32xf32> -> vector<4x32xf32>
    %c0_84 = arith.constant 0 : index
    %c0_85 = arith.constant 0 : index
    %167 = vector.load %arg9[%c0_84, %c0_85] : memref<1x32xf32, #tpu.memory_space<vmem>>, vector<1x32xf32>
    %168 = vector.broadcast %167 : vector<1x32xf32> to vector<4x32xf32>
    %169 = arith.addf %166, %168 : vector<4x32xf32>
    %cst_86 = arith.constant 0.000000e+00 : f32
    %170 = vector.broadcast %cst_86 : f32 to vector<4x32xf32>
    %171 = arith.maximumf %169, %170 : vector<4x32xf32>
    %c0_87 = arith.constant 0 : index
    %c0_88 = arith.constant 0 : index
    %172 = vector.load %arg12[%c0_87, %c0_88] : memref<8x16xbf16, #tpu.memory_space<vmem>>, vector<8x16xbf16>
    %173 = arith.truncf %9 : vector<64x8xf32> to vector<64x8xbf16>
    %cst_89 = arith.constant dense<0.000000e+00> : vector<64x16xf32>
    %174 = tpu.matmul %173, %172, %cst_89 {dimension_numbers = #tpu.dot_dimension_numbers<[1], [0], [0], [1], [0, 0, 1, 1], [], []>} : vector<64x8xbf16>, vector<8x16xbf16>, vector<64x16xf32> -> vector<64x16xf32>
    %c0_90 = arith.constant 0 : index
    %c0_91 = arith.constant 0 : index
    %175 = vector.load %arg13[%c0_90, %c0_91] : memref<1x16xf32, #tpu.memory_space<vmem>>, vector<1x16xf32>
    %176 = vector.broadcast %175 : vector<1x16xf32> to vector<64x16xf32>
    %177 = arith.addf %174, %176 : vector<64x16xf32>
    %c0_92 = arith.constant 0 : index
    %c0_93 = arith.constant 0 : index
    %178 = vector.load %arg14[%c0_92, %c0_93] : memref<16x16xbf16, #tpu.memory_space<vmem>>, vector<16x16xbf16>
    %179 = arith.truncf %90 : vector<16x16xf32> to vector<16x16xbf16>
    %cst_94 = arith.constant dense<0.000000e+00> : vector<16x16xf32>
    %180 = tpu.matmul %179, %178, %cst_94 {dimension_numbers = #tpu.dot_dimension_numbers<[1], [0], [0], [1], [0, 0, 1, 1], [], []>} : vector<16x16xbf16>, vector<16x16xbf16>, vector<16x16xf32> -> vector<16x16xf32>
    %c0_95 = arith.constant 0 : index
    %c0_96 = arith.constant 0 : index
    %181 = vector.load %arg15[%c0_95, %c0_96] : memref<1x16xf32, #tpu.memory_space<vmem>>, vector<1x16xf32>
    %182 = vector.broadcast %181 : vector<1x16xf32> to vector<16x16xf32>
    %183 = arith.addf %180, %182 : vector<16x16xf32>
    %c0_97 = arith.constant 0 : index
    %c0_98 = arith.constant 0 : index
    %184 = vector.load %arg16[%c0_97, %c0_98] : memref<32x16xbf16, #tpu.memory_space<vmem>>, vector<32x16xbf16>
    %185 = arith.truncf %171 : vector<4x32xf32> to vector<4x32xbf16>
    %cst_99 = arith.constant dense<0.000000e+00> : vector<4x16xf32>
    %186 = tpu.matmul %185, %184, %cst_99 {dimension_numbers = #tpu.dot_dimension_numbers<[1], [0], [0], [1], [0, 0, 1, 1], [], []>} : vector<4x32xbf16>, vector<32x16xbf16>, vector<4x16xf32> -> vector<4x16xf32>
    %c0_100 = arith.constant 0 : index
    %c0_101 = arith.constant 0 : index
    %187 = vector.load %arg17[%c0_100, %c0_101] : memref<1x16xf32, #tpu.memory_space<vmem>>, vector<1x16xf32>
    %188 = vector.broadcast %187 : vector<1x16xf32> to vector<4x16xf32>
    %189 = arith.addf %186, %188 : vector<4x16xf32>
    %cst_102 = arith.constant 0.000000e+00 : f32
    %190 = vector.broadcast %cst_102 : f32 to vector<3x16xf32>
    %191 = vector.extract_strided_slice %189 {offsets = [0, 0], sizes = [1, 16], strides = [1, 1]} : vector<4x16xf32> to vector<1x16xf32>
    %192 = tpu.concatenate %190, %191 in 0 : vector<3x16xf32>, vector<1x16xf32> -> vector<4x16xf32>
    %c0_103 = arith.constant 0 : index
    %c0_104 = arith.constant 0 : index
    %c0_105 = arith.constant 0 : index
    %193 = vector.load %arg24[%c0_103, %c0_104, %c0_105] : memref<9x4x1xbf16, #tpu.memory_space<vmem>>, vector<1x4x1xbf16>
    %194 = vector.shape_cast %193 : vector<1x4x1xbf16> to vector<4x1xbf16>
    %195 = arith.extf %194 : vector<4x1xbf16> to vector<4x1xf32>
    %196 = vector.broadcast %195 : vector<4x1xf32> to vector<4x16xf32>
    %197 = arith.mulf %192, %196 : vector<4x16xf32>
    %cst_106 = arith.constant 0.000000e+00 : f32
    %198 = vector.broadcast %cst_106 : f32 to vector<2x16xf32>
    %199 = vector.extract_strided_slice %189 {offsets = [0, 0], sizes = [2, 16], strides = [1, 1]} : vector<4x16xf32> to vector<2x16xf32>
    %200 = tpu.concatenate %198, %199 in 0 : vector<2x16xf32>, vector<2x16xf32> -> vector<4x16xf32>
    %c1_107 = arith.constant 1 : index
    %c0_108 = arith.constant 0 : index
    %c0_109 = arith.constant 0 : index
    %201 = vector.load %arg24[%c1_107, %c0_108, %c0_109] : memref<9x4x1xbf16, #tpu.memory_space<vmem>>, vector<1x4x1xbf16>
    %202 = vector.shape_cast %201 : vector<1x4x1xbf16> to vector<4x1xbf16>
    %203 = arith.extf %202 : vector<4x1xbf16> to vector<4x1xf32>
    %204 = vector.broadcast %203 : vector<4x1xf32> to vector<4x16xf32>
    %205 = arith.mulf %200, %204 : vector<4x16xf32>
    %cst_110 = arith.constant 0.000000e+00 : f32
    %206 = vector.broadcast %cst_110 : f32 to vector<1x16xf32>
    %207 = vector.extract_strided_slice %189 {offsets = [0, 0], sizes = [3, 16], strides = [1, 1]} : vector<4x16xf32> to vector<3x16xf32>
    %208 = tpu.concatenate %206, %207 in 0 : vector<1x16xf32>, vector<3x16xf32> -> vector<4x16xf32>
    %c2_111 = arith.constant 2 : index
    %c0_112 = arith.constant 0 : index
    %c0_113 = arith.constant 0 : index
    %209 = vector.load %arg24[%c2_111, %c0_112, %c0_113] : memref<9x4x1xbf16, #tpu.memory_space<vmem>>, vector<1x4x1xbf16>
    %210 = vector.shape_cast %209 : vector<1x4x1xbf16> to vector<4x1xbf16>
    %211 = arith.extf %210 : vector<4x1xbf16> to vector<4x1xf32>
    %212 = vector.broadcast %211 : vector<4x1xf32> to vector<4x16xf32>
    %213 = arith.mulf %208, %212 : vector<4x16xf32>
    %cst_114 = arith.constant 0.000000e+00 : f32
    %214 = vector.broadcast %cst_114 : f32 to vector<1x16xf32>
    %215 = vector.extract_strided_slice %189 {offsets = [0, 0], sizes = [3, 16], strides = [1, 1]} : vector<4x16xf32> to vector<3x16xf32>
    %216 = tpu.concatenate %214, %215 in 0 : vector<1x16xf32>, vector<3x16xf32> -> vector<4x16xf32>
    %c3_115 = arith.constant 3 : index
    %c0_116 = arith.constant 0 : index
    %c0_117 = arith.constant 0 : index
    %217 = vector.load %arg24[%c3_115, %c0_116, %c0_117] : memref<9x4x1xbf16, #tpu.memory_space<vmem>>, vector<1x4x1xbf16>
    %218 = vector.shape_cast %217 : vector<1x4x1xbf16> to vector<4x1xbf16>
    %219 = arith.extf %218 : vector<4x1xbf16> to vector<4x1xf32>
    %220 = vector.broadcast %219 : vector<4x1xf32> to vector<4x16xf32>
    %221 = arith.mulf %216, %220 : vector<4x16xf32>
    %c4_118 = arith.constant 4 : index
    %c0_119 = arith.constant 0 : index
    %c0_120 = arith.constant 0 : index
    %222 = vector.load %arg24[%c4_118, %c0_119, %c0_120] : memref<9x4x1xbf16, #tpu.memory_space<vmem>>, vector<1x4x1xbf16>
    %223 = vector.shape_cast %222 : vector<1x4x1xbf16> to vector<4x1xbf16>
    %224 = arith.extf %223 : vector<4x1xbf16> to vector<4x1xf32>
    %225 = vector.broadcast %224 : vector<4x1xf32> to vector<4x16xf32>
    %226 = arith.mulf %189, %225 : vector<4x16xf32>
    %cst_121 = arith.constant 0.000000e+00 : f32
    %227 = vector.broadcast %cst_121 : f32 to vector<1x16xf32>
    %228 = vector.extract_strided_slice %189 {offsets = [1, 0], sizes = [3, 16], strides = [1, 1]} : vector<4x16xf32> to vector<3x16xf32>
    %229 = tpu.concatenate %228, %227 in 0 : vector<3x16xf32>, vector<1x16xf32> -> vector<4x16xf32>
    %c5_122 = arith.constant 5 : index
    %c0_123 = arith.constant 0 : index
    %c0_124 = arith.constant 0 : index
    %230 = vector.load %arg24[%c5_122, %c0_123, %c0_124] : memref<9x4x1xbf16, #tpu.memory_space<vmem>>, vector<1x4x1xbf16>
    %231 = vector.shape_cast %230 : vector<1x4x1xbf16> to vector<4x1xbf16>
    %232 = arith.extf %231 : vector<4x1xbf16> to vector<4x1xf32>
    %233 = vector.broadcast %232 : vector<4x1xf32> to vector<4x16xf32>
    %234 = arith.mulf %229, %233 : vector<4x16xf32>
    %cst_125 = arith.constant 0.000000e+00 : f32
    %235 = vector.broadcast %cst_125 : f32 to vector<1x16xf32>
    %236 = vector.extract_strided_slice %189 {offsets = [1, 0], sizes = [3, 16], strides = [1, 1]} : vector<4x16xf32> to vector<3x16xf32>
    %237 = tpu.concatenate %236, %235 in 0 : vector<3x16xf32>, vector<1x16xf32> -> vector<4x16xf32>
    %c6_126 = arith.constant 6 : index
    %c0_127 = arith.constant 0 : index
    %c0_128 = arith.constant 0 : index
    %238 = vector.load %arg24[%c6_126, %c0_127, %c0_128] : memref<9x4x1xbf16, #tpu.memory_space<vmem>>, vector<1x4x1xbf16>
    %239 = vector.shape_cast %238 : vector<1x4x1xbf16> to vector<4x1xbf16>
    %240 = arith.extf %239 : vector<4x1xbf16> to vector<4x1xf32>
    %241 = vector.broadcast %240 : vector<4x1xf32> to vector<4x16xf32>
    %242 = arith.mulf %237, %241 : vector<4x16xf32>
    %cst_129 = arith.constant 0.000000e+00 : f32
    %243 = vector.broadcast %cst_129 : f32 to vector<2x16xf32>
    %244 = vector.extract_strided_slice %189 {offsets = [2, 0], sizes = [2, 16], strides = [1, 1]} : vector<4x16xf32> to vector<2x16xf32>
    %245 = tpu.concatenate %244, %243 in 0 : vector<2x16xf32>, vector<2x16xf32> -> vector<4x16xf32>
    %c7_130 = arith.constant 7 : index
    %c0_131 = arith.constant 0 : index
    %c0_132 = arith.constant 0 : index
    %246 = vector.load %arg24[%c7_130, %c0_131, %c0_132] : memref<9x4x1xbf16, #tpu.memory_space<vmem>>, vector<1x4x1xbf16>
    %247 = vector.shape_cast %246 : vector<1x4x1xbf16> to vector<4x1xbf16>
    %248 = arith.extf %247 : vector<4x1xbf16> to vector<4x1xf32>
    %249 = vector.broadcast %248 : vector<4x1xf32> to vector<4x16xf32>
    %250 = arith.mulf %245, %249 : vector<4x16xf32>
    %cst_133 = arith.constant 0.000000e+00 : f32
    %251 = vector.broadcast %cst_133 : f32 to vector<3x16xf32>
    %252 = vector.extract_strided_slice %189 {offsets = [3, 0], sizes = [1, 16], strides = [1, 1]} : vector<4x16xf32> to vector<1x16xf32>
    %253 = tpu.concatenate %252, %251 in 0 : vector<1x16xf32>, vector<3x16xf32> -> vector<4x16xf32>
    %c8_134 = arith.constant 8 : index
    %c0_135 = arith.constant 0 : index
    %c0_136 = arith.constant 0 : index
    %254 = vector.load %arg24[%c8_134, %c0_135, %c0_136] : memref<9x4x1xbf16, #tpu.memory_space<vmem>>, vector<1x4x1xbf16>
    %255 = vector.shape_cast %254 : vector<1x4x1xbf16> to vector<4x1xbf16>
    %256 = arith.extf %255 : vector<4x1xbf16> to vector<4x1xf32>
    %257 = vector.broadcast %256 : vector<4x1xf32> to vector<4x16xf32>
    %258 = arith.mulf %253, %257 : vector<4x16xf32>
    %259 = tpu.concatenate %197, %205, %213, %221, %226, %234, %242, %250, %258 in 1 : vector<4x16xf32>, vector<4x16xf32>, vector<4x16xf32>, vector<4x16xf32>, vector<4x16xf32>, vector<4x16xf32>, vector<4x16xf32>, vector<4x16xf32>, vector<4x16xf32> -> vector<4x144xf32>
    %c0_137 = arith.constant 0 : index
    %c0_138 = arith.constant 0 : index
    %260 = vector.load %arg22[%c0_137, %c0_138] : memref<144x16xbf16, #tpu.memory_space<vmem>>, vector<144x16xbf16>
    %261 = arith.truncf %259 : vector<4x144xf32> to vector<4x144xbf16>
    %cst_139 = arith.constant dense<0.000000e+00> : vector<4x16xf32>
    %262 = tpu.matmul %261, %260, %cst_139 {dimension_numbers = #tpu.dot_dimension_numbers<[1], [0], [0], [1], [0, 0, 1, 1], [], []>} : vector<4x144xbf16>, vector<144x16xbf16>, vector<4x16xf32> -> vector<4x16xf32>
    %c0_140 = arith.constant 0 : index
    %c0_141 = arith.constant 0 : index
    %263 = vector.load %arg23[%c0_140, %c0_141] : memref<1x16xf32, #tpu.memory_space<vmem>>, vector<1x16xf32>
    %264 = vector.broadcast %263 : vector<1x16xf32> to vector<4x16xf32>
    %265 = arith.addf %262, %264 : vector<4x16xf32>
    %c0_142 = arith.constant 0 : index
    %c0_143 = arith.constant 0 : index
    %c0_144 = arith.constant 0 : index
    %266 = vector.load %arg29[%c0_142, %c0_143, %c0_144] : memref<1x4x16xf32, #tpu.memory_space<vmem>>, vector<1x4x16xf32>
    %267 = vector.shape_cast %266 : vector<1x4x16xf32> to vector<4x16xf32>
    %268 = vector.shape_cast %265 : vector<4x16xf32> to vector<1x4x16xf32>
    tpu.vector_store %arg29[%c0_142, %c0_143, %c0_144], %268 {strides = array<i32>} : memref<1x4x16xf32, #tpu.memory_space<vmem>>, vector<1x4x16xf32>,
    %c0_145 = arith.constant 0 : index
    %c0_146 = arith.constant 0 : index
    %269 = vector.load %arg26[%c0_145, %c0_146] : memref<16x4xbf16, #tpu.memory_space<vmem>>, vector<16x4xbf16>
    %270 = arith.truncf %189 : vector<4x16xf32> to vector<4x16xbf16>
    %cst_147 = arith.constant dense<0.000000e+00> : vector<16x16xf32>
    %271 = tpu.matmul %269, %270, %cst_147 {dimension_numbers = #tpu.dot_dimension_numbers<[1], [0], [0], [1], [0, 0, 1, 1], [], []>} : vector<16x4xbf16>, vector<4x16xbf16>, vector<16x16xf32> -> vector<16x16xf32>
    %272 = arith.addf %183, %271 : vector<16x16xf32>
    %cst_148 = arith.constant 0.000000e+00 : f32
    %273 = vector.broadcast %cst_148 : f32 to vector<5x16xf32>
    %274 = vector.extract_strided_slice %272 {offsets = [0, 0], sizes = [11, 16], strides = [1, 1]} : vector<16x16xf32> to vector<11x16xf32>
    %275 = tpu.concatenate %273, %274 in 0 : vector<5x16xf32>, vector<11x16xf32> -> vector<16x16xf32>
    %c0_149 = arith.constant 0 : index
    %c0_150 = arith.constant 0 : index
    %c0_151 = arith.constant 0 : index
    %276 = vector.load %arg11[%c0_149, %c0_150, %c0_151] : memref<9x16x1xbf16, #tpu.memory_space<vmem>>, vector<1x16x1xbf16>
    %277 = vector.shape_cast %276 : vector<1x16x1xbf16> to vector<16x1xbf16>
    %278 = arith.extf %277 : vector<16x1xbf16> to vector<16x1xf32>
    %279 = vector.broadcast %278 : vector<16x1xf32> to vector<16x16xf32>
    %280 = arith.mulf %275, %279 : vector<16x16xf32>
    %cst_152 = arith.constant 0.000000e+00 : f32
    %281 = vector.broadcast %cst_152 : f32 to vector<4x16xf32>
    %282 = vector.extract_strided_slice %272 {offsets = [0, 0], sizes = [12, 16], strides = [1, 1]} : vector<16x16xf32> to vector<12x16xf32>
    %283 = tpu.concatenate %281, %282 in 0 : vector<4x16xf32>, vector<12x16xf32> -> vector<16x16xf32>
    %c1_153 = arith.constant 1 : index
    %c0_154 = arith.constant 0 : index
    %c0_155 = arith.constant 0 : index
    %284 = vector.load %arg11[%c1_153, %c0_154, %c0_155] : memref<9x16x1xbf16, #tpu.memory_space<vmem>>, vector<1x16x1xbf16>
    %285 = vector.shape_cast %284 : vector<1x16x1xbf16> to vector<16x1xbf16>
    %286 = arith.extf %285 : vector<16x1xbf16> to vector<16x1xf32>
    %287 = vector.broadcast %286 : vector<16x1xf32> to vector<16x16xf32>
    %288 = arith.mulf %283, %287 : vector<16x16xf32>
    %cst_156 = arith.constant 0.000000e+00 : f32
    %289 = vector.broadcast %cst_156 : f32 to vector<3x16xf32>
    %290 = vector.extract_strided_slice %272 {offsets = [0, 0], sizes = [13, 16], strides = [1, 1]} : vector<16x16xf32> to vector<13x16xf32>
    %291 = tpu.concatenate %289, %290 in 0 : vector<3x16xf32>, vector<13x16xf32> -> vector<16x16xf32>
    %c2_157 = arith.constant 2 : index
    %c0_158 = arith.constant 0 : index
    %c0_159 = arith.constant 0 : index
    %292 = vector.load %arg11[%c2_157, %c0_158, %c0_159] : memref<9x16x1xbf16, #tpu.memory_space<vmem>>, vector<1x16x1xbf16>
    %293 = vector.shape_cast %292 : vector<1x16x1xbf16> to vector<16x1xbf16>
    %294 = arith.extf %293 : vector<16x1xbf16> to vector<16x1xf32>
    %295 = vector.broadcast %294 : vector<16x1xf32> to vector<16x16xf32>
    %296 = arith.mulf %291, %295 : vector<16x16xf32>
    %cst_160 = arith.constant 0.000000e+00 : f32
    %297 = vector.broadcast %cst_160 : f32 to vector<1x16xf32>
    %298 = vector.extract_strided_slice %272 {offsets = [0, 0], sizes = [15, 16], strides = [1, 1]} : vector<16x16xf32> to vector<15x16xf32>
    %299 = tpu.concatenate %297, %298 in 0 : vector<1x16xf32>, vector<15x16xf32> -> vector<16x16xf32>
    %c3_161 = arith.constant 3 : index
    %c0_162 = arith.constant 0 : index
    %c0_163 = arith.constant 0 : index
    %300 = vector.load %arg11[%c3_161, %c0_162, %c0_163] : memref<9x16x1xbf16, #tpu.memory_space<vmem>>, vector<1x16x1xbf16>
    %301 = vector.shape_cast %300 : vector<1x16x1xbf16> to vector<16x1xbf16>
    %302 = arith.extf %301 : vector<16x1xbf16> to vector<16x1xf32>
    %303 = vector.broadcast %302 : vector<16x1xf32> to vector<16x16xf32>
    %304 = arith.mulf %299, %303 : vector<16x16xf32>
    %c4_164 = arith.constant 4 : index
    %c0_165 = arith.constant 0 : index
    %c0_166 = arith.constant 0 : index
    %305 = vector.load %arg11[%c4_164, %c0_165, %c0_166] : memref<9x16x1xbf16, #tpu.memory_space<vmem>>, vector<1x16x1xbf16>
    %306 = vector.shape_cast %305 : vector<1x16x1xbf16> to vector<16x1xbf16>
    %307 = arith.extf %306 : vector<16x1xbf16> to vector<16x1xf32>
    %308 = vector.broadcast %307 : vector<16x1xf32> to vector<16x16xf32>
    %309 = arith.mulf %272, %308 : vector<16x16xf32>
    %cst_167 = arith.constant 0.000000e+00 : f32
    %310 = vector.broadcast %cst_167 : f32 to vector<1x16xf32>
    %311 = vector.extract_strided_slice %272 {offsets = [1, 0], sizes = [15, 16], strides = [1, 1]} : vector<16x16xf32> to vector<15x16xf32>
    %312 = tpu.concatenate %311, %310 in 0 : vector<15x16xf32>, vector<1x16xf32> -> vector<16x16xf32>
    %c5_168 = arith.constant 5 : index
    %c0_169 = arith.constant 0 : index
    %c0_170 = arith.constant 0 : index
    %313 = vector.load %arg11[%c5_168, %c0_169, %c0_170] : memref<9x16x1xbf16, #tpu.memory_space<vmem>>, vector<1x16x1xbf16>
    %314 = vector.shape_cast %313 : vector<1x16x1xbf16> to vector<16x1xbf16>
    %315 = arith.extf %314 : vector<16x1xbf16> to vector<16x1xf32>
    %316 = vector.broadcast %315 : vector<16x1xf32> to vector<16x16xf32>
    %317 = arith.mulf %312, %316 : vector<16x16xf32>
    %cst_171 = arith.constant 0.000000e+00 : f32
    %318 = vector.broadcast %cst_171 : f32 to vector<3x16xf32>
    %319 = vector.extract_strided_slice %272 {offsets = [3, 0], sizes = [13, 16], strides = [1, 1]} : vector<16x16xf32> to vector<13x16xf32>
    %320 = tpu.concatenate %319, %318 in 0 : vector<13x16xf32>, vector<3x16xf32> -> vector<16x16xf32>
    %c6_172 = arith.constant 6 : index
    %c0_173 = arith.constant 0 : index
    %c0_174 = arith.constant 0 : index
    %321 = vector.load %arg11[%c6_172, %c0_173, %c0_174] : memref<9x16x1xbf16, #tpu.memory_space<vmem>>, vector<1x16x1xbf16>
    %322 = vector.shape_cast %321 : vector<1x16x1xbf16> to vector<16x1xbf16>
    %323 = arith.extf %322 : vector<16x1xbf16> to vector<16x1xf32>
    %324 = vector.broadcast %323 : vector<16x1xf32> to vector<16x16xf32>
    %325 = arith.mulf %320, %324 : vector<16x16xf32>
    %cst_175 = arith.constant 0.000000e+00 : f32
    %326 = vector.broadcast %cst_175 : f32 to vector<4x16xf32>
    %327 = vector.extract_strided_slice %272 {offsets = [4, 0], sizes = [12, 16], strides = [1, 1]} : vector<16x16xf32> to vector<12x16xf32>
    %328 = tpu.concatenate %327, %326 in 0 : vector<12x16xf32>, vector<4x16xf32> -> vector<16x16xf32>
    %c7_176 = arith.constant 7 : index
    %c0_177 = arith.constant 0 : index
    %c0_178 = arith.constant 0 : index
    %329 = vector.load %arg11[%c7_176, %c0_177, %c0_178] : memref<9x16x1xbf16, #tpu.memory_space<vmem>>, vector<1x16x1xbf16>
    %330 = vector.shape_cast %329 : vector<1x16x1xbf16> to vector<16x1xbf16>
    %331 = arith.extf %330 : vector<16x1xbf16> to vector<16x1xf32>
    %332 = vector.broadcast %331 : vector<16x1xf32> to vector<16x16xf32>
    %333 = arith.mulf %328, %332 : vector<16x16xf32>
    %cst_179 = arith.constant 0.000000e+00 : f32
    %334 = vector.broadcast %cst_179 : f32 to vector<5x16xf32>
    %335 = vector.extract_strided_slice %272 {offsets = [5, 0], sizes = [11, 16], strides = [1, 1]} : vector<16x16xf32> to vector<11x16xf32>
    %336 = tpu.concatenate %335, %334 in 0 : vector<11x16xf32>, vector<5x16xf32> -> vector<16x16xf32>
    %c8_180 = arith.constant 8 : index
    %c0_181 = arith.constant 0 : index
    %c0_182 = arith.constant 0 : index
    %337 = vector.load %arg11[%c8_180, %c0_181, %c0_182] : memref<9x16x1xbf16, #tpu.memory_space<vmem>>, vector<1x16x1xbf16>
    %338 = vector.shape_cast %337 : vector<1x16x1xbf16> to vector<16x1xbf16>
    %339 = arith.extf %338 : vector<16x1xbf16> to vector<16x1xf32>
    %340 = vector.broadcast %339 : vector<16x1xf32> to vector<16x16xf32>
    %341 = arith.mulf %336, %340 : vector<16x16xf32>
    %342 = tpu.concatenate %280, %288, %296, %304, %309, %317, %325, %333, %341 in 1 : vector<16x16xf32>, vector<16x16xf32>, vector<16x16xf32>, vector<16x16xf32>, vector<16x16xf32>, vector<16x16xf32>, vector<16x16xf32>, vector<16x16xf32>, vector<16x16xf32> -> vector<16x144xf32>
    %c0_183 = arith.constant 0 : index
    %c0_184 = arith.constant 0 : index
    %343 = vector.load %arg20[%c0_183, %c0_184] : memref<144x16xbf16, #tpu.memory_space<vmem>>, vector<144x16xbf16>
    %344 = arith.truncf %342 : vector<16x144xf32> to vector<16x144xbf16>
    %cst_185 = arith.constant dense<0.000000e+00> : vector<16x16xf32>
    %345 = tpu.matmul %344, %343, %cst_185 {dimension_numbers = #tpu.dot_dimension_numbers<[1], [0], [0], [1], [0, 0, 1, 1], [], []>} : vector<16x144xbf16>, vector<144x16xbf16>, vector<16x16xf32> -> vector<16x16xf32>
    %c0_186 = arith.constant 0 : index
    %c0_187 = arith.constant 0 : index
    %346 = vector.load %arg21[%c0_186, %c0_187] : memref<1x16xf32, #tpu.memory_space<vmem>>, vector<1x16xf32>
    %347 = vector.broadcast %346 : vector<1x16xf32> to vector<16x16xf32>
    %348 = arith.addf %345, %347 : vector<16x16xf32>
    %c0_188 = arith.constant 0 : index
    %c0_189 = arith.constant 0 : index
    %c0_190 = arith.constant 0 : index
    %349 = vector.load %arg28[%c0_188, %c0_189, %c0_190] : memref<1x16x16xf32, #tpu.memory_space<vmem>>, vector<1x16x16xf32>
    %350 = vector.shape_cast %349 : vector<1x16x16xf32> to vector<16x16xf32>
    %351 = vector.shape_cast %348 : vector<16x16xf32> to vector<1x16x16xf32>
    tpu.vector_store %arg28[%c0_188, %c0_189, %c0_190], %351 {strides = array<i32>} : memref<1x16x16xf32, #tpu.memory_space<vmem>>, vector<1x16x16xf32>,
    %c0_191 = arith.constant 0 : index
    %c0_192 = arith.constant 0 : index
    %352 = vector.load %arg25[%c0_191, %c0_192] : memref<64x16xbf16, #tpu.memory_space<vmem>>, vector<64x16xbf16>
    %353 = arith.truncf %272 : vector<16x16xf32> to vector<16x16xbf16>
    %cst_193 = arith.constant dense<0.000000e+00> : vector<64x16xf32>
    %354 = tpu.matmul %352, %353, %cst_193 {dimension_numbers = #tpu.dot_dimension_numbers<[1], [0], [0], [1], [0, 0, 1, 1], [], []>} : vector<64x16xbf16>, vector<16x16xbf16>, vector<64x16xf32> -> vector<64x16xf32>
    %355 = arith.addf %177, %354 : vector<64x16xf32>
    %cst_194 = arith.constant 0.000000e+00 : f32
    %356 = vector.broadcast %cst_194 : f32 to vector<9x16xf32>
    %357 = vector.extract_strided_slice %355 {offsets = [0, 0], sizes = [55, 16], strides = [1, 1]} : vector<64x16xf32> to vector<55x16xf32>
    %358 = tpu.concatenate %356, %357 in 0 : vector<9x16xf32>, vector<55x16xf32> -> vector<64x16xf32>
    %c0_195 = arith.constant 0 : index
    %c0_196 = arith.constant 0 : index
    %c0_197 = arith.constant 0 : index
    %359 = vector.load %arg7[%c0_195, %c0_196, %c0_197] : memref<9x64x1xbf16, #tpu.memory_space<vmem>>, vector<1x64x1xbf16>
    %360 = vector.shape_cast %359 : vector<1x64x1xbf16> to vector<64x1xbf16>
    %361 = arith.extf %360 : vector<64x1xbf16> to vector<64x1xf32>
    %362 = vector.broadcast %361 : vector<64x1xf32> to vector<64x16xf32>
    %363 = arith.mulf %358, %362 : vector<64x16xf32>
    %cst_198 = arith.constant 0.000000e+00 : f32
    %364 = vector.broadcast %cst_198 : f32 to vector<8x16xf32>
    %365 = vector.extract_strided_slice %355 {offsets = [0, 0], sizes = [56, 16], strides = [1, 1]} : vector<64x16xf32> to vector<56x16xf32>
    %366 = tpu.concatenate %364, %365 in 0 : vector<8x16xf32>, vector<56x16xf32> -> vector<64x16xf32>
    %c1_199 = arith.constant 1 : index
    %c0_200 = arith.constant 0 : index
    %c0_201 = arith.constant 0 : index
    %367 = vector.load %arg7[%c1_199, %c0_200, %c0_201] : memref<9x64x1xbf16, #tpu.memory_space<vmem>>, vector<1x64x1xbf16>
    %368 = vector.shape_cast %367 : vector<1x64x1xbf16> to vector<64x1xbf16>
    %369 = arith.extf %368 : vector<64x1xbf16> to vector<64x1xf32>
    %370 = vector.broadcast %369 : vector<64x1xf32> to vector<64x16xf32>
    %371 = arith.mulf %366, %370 : vector<64x16xf32>
    %cst_202 = arith.constant 0.000000e+00 : f32
    %372 = vector.broadcast %cst_202 : f32 to vector<7x16xf32>
    %373 = vector.extract_strided_slice %355 {offsets = [0, 0], sizes = [57, 16], strides = [1, 1]} : vector<64x16xf32> to vector<57x16xf32>
    %374 = tpu.concatenate %372, %373 in 0 : vector<7x16xf32>, vector<57x16xf32> -> vector<64x16xf32>
    %c2_203 = arith.constant 2 : index
    %c0_204 = arith.constant 0 : index
    %c0_205 = arith.constant 0 : index
    %375 = vector.load %arg7[%c2_203, %c0_204, %c0_205] : memref<9x64x1xbf16, #tpu.memory_space<vmem>>, vector<1x64x1xbf16>
    %376 = vector.shape_cast %375 : vector<1x64x1xbf16> to vector<64x1xbf16>
    %377 = arith.extf %376 : vector<64x1xbf16> to vector<64x1xf32>
    %378 = vector.broadcast %377 : vector<64x1xf32> to vector<64x16xf32>
    %379 = arith.mulf %374, %378 : vector<64x16xf32>
    %cst_206 = arith.constant 0.000000e+00 : f32
    %380 = vector.broadcast %cst_206 : f32 to vector<1x16xf32>
    %381 = vector.extract_strided_slice %355 {offsets = [0, 0], sizes = [63, 16], strides = [1, 1]} : vector<64x16xf32> to vector<63x16xf32>
    %382 = tpu.concatenate %380, %381 in 0 : vector<1x16xf32>, vector<63x16xf32> -> vector<64x16xf32>
    %c3_207 = arith.constant 3 : index
    %c0_208 = arith.constant 0 : index
    %c0_209 = arith.constant 0 : index
    %383 = vector.load %arg7[%c3_207, %c0_208, %c0_209] : memref<9x64x1xbf16, #tpu.memory_space<vmem>>, vector<1x64x1xbf16>
    %384 = vector.shape_cast %383 : vector<1x64x1xbf16> to vector<64x1xbf16>
    %385 = arith.extf %384 : vector<64x1xbf16> to vector<64x1xf32>
    %386 = vector.broadcast %385 : vector<64x1xf32> to vector<64x16xf32>
    %387 = arith.mulf %382, %386 : vector<64x16xf32>
    %c4_210 = arith.constant 4 : index
    %c0_211 = arith.constant 0 : index
    %c0_212 = arith.constant 0 : index
    %388 = vector.load %arg7[%c4_210, %c0_211, %c0_212] : memref<9x64x1xbf16, #tpu.memory_space<vmem>>, vector<1x64x1xbf16>
    %389 = vector.shape_cast %388 : vector<1x64x1xbf16> to vector<64x1xbf16>
    %390 = arith.extf %389 : vector<64x1xbf16> to vector<64x1xf32>
    %391 = vector.broadcast %390 : vector<64x1xf32> to vector<64x16xf32>
    %392 = arith.mulf %355, %391 : vector<64x16xf32>
    %cst_213 = arith.constant 0.000000e+00 : f32
    %393 = vector.broadcast %cst_213 : f32 to vector<1x16xf32>
    %394 = vector.extract_strided_slice %355 {offsets = [1, 0], sizes = [63, 16], strides = [1, 1]} : vector<64x16xf32> to vector<63x16xf32>
    %395 = tpu.concatenate %394, %393 in 0 : vector<63x16xf32>, vector<1x16xf32> -> vector<64x16xf32>
    %c5_214 = arith.constant 5 : index
    %c0_215 = arith.constant 0 : index
    %c0_216 = arith.constant 0 : index
    %396 = vector.load %arg7[%c5_214, %c0_215, %c0_216] : memref<9x64x1xbf16, #tpu.memory_space<vmem>>, vector<1x64x1xbf16>
    %397 = vector.shape_cast %396 : vector<1x64x1xbf16> to vector<64x1xbf16>
    %398 = arith.extf %397 : vector<64x1xbf16> to vector<64x1xf32>
    %399 = vector.broadcast %398 : vector<64x1xf32> to vector<64x16xf32>
    %400 = arith.mulf %395, %399 : vector<64x16xf32>
    %cst_217 = arith.constant 0.000000e+00 : f32
    %401 = vector.broadcast %cst_217 : f32 to vector<7x16xf32>
    %402 = vector.extract_strided_slice %355 {offsets = [7, 0], sizes = [57, 16], strides = [1, 1]} : vector<64x16xf32> to vector<57x16xf32>
    %403 = tpu.concatenate %402, %401 in 0 : vector<57x16xf32>, vector<7x16xf32> -> vector<64x16xf32>
    %c6_218 = arith.constant 6 : index
    %c0_219 = arith.constant 0 : index
    %c0_220 = arith.constant 0 : index
    %404 = vector.load %arg7[%c6_218, %c0_219, %c0_220] : memref<9x64x1xbf16, #tpu.memory_space<vmem>>, vector<1x64x1xbf16>
    %405 = vector.shape_cast %404 : vector<1x64x1xbf16> to vector<64x1xbf16>
    %406 = arith.extf %405 : vector<64x1xbf16> to vector<64x1xf32>
    %407 = vector.broadcast %406 : vector<64x1xf32> to vector<64x16xf32>
    %408 = arith.mulf %403, %407 : vector<64x16xf32>
    %cst_221 = arith.constant 0.000000e+00 : f32
    %409 = vector.broadcast %cst_221 : f32 to vector<8x16xf32>
    %410 = vector.extract_strided_slice %355 {offsets = [8, 0], sizes = [56, 16], strides = [1, 1]} : vector<64x16xf32> to vector<56x16xf32>
    %411 = tpu.concatenate %410, %409 in 0 : vector<56x16xf32>, vector<8x16xf32> -> vector<64x16xf32>
    %c7_222 = arith.constant 7 : index
    %c0_223 = arith.constant 0 : index
    %c0_224 = arith.constant 0 : index
    %412 = vector.load %arg7[%c7_222, %c0_223, %c0_224] : memref<9x64x1xbf16, #tpu.memory_space<vmem>>, vector<1x64x1xbf16>
    %413 = vector.shape_cast %412 : vector<1x64x1xbf16> to vector<64x1xbf16>
    %414 = arith.extf %413 : vector<64x1xbf16> to vector<64x1xf32>
    %415 = vector.broadcast %414 : vector<64x1xf32> to vector<64x16xf32>
    %416 = arith.mulf %411, %415 : vector<64x16xf32>
    %cst_225 = arith.constant 0.000000e+00 : f32
    %417 = vector.broadcast %cst_225 : f32 to vector<9x16xf32>
    %418 = vector.extract_strided_slice %355 {offsets = [9, 0], sizes = [55, 16], strides = [1, 1]} : vector<64x16xf32> to vector<55x16xf32>
    %419 = tpu.concatenate %418, %417 in 0 : vector<55x16xf32>, vector<9x16xf32> -> vector<64x16xf32>
    %c8_226 = arith.constant 8 : index
    %c0_227 = arith.constant 0 : index
    %c0_228 = arith.constant 0 : index
    %420 = vector.load %arg7[%c8_226, %c0_227, %c0_228] : memref<9x64x1xbf16, #tpu.memory_space<vmem>>, vector<1x64x1xbf16>
    %421 = vector.shape_cast %420 : vector<1x64x1xbf16> to vector<64x1xbf16>
    %422 = arith.extf %421 : vector<64x1xbf16> to vector<64x1xf32>
    %423 = vector.broadcast %422 : vector<64x1xf32> to vector<64x16xf32>
    %424 = arith.mulf %419, %423 : vector<64x16xf32>
    %425 = tpu.concatenate %363, %371, %379, %387, %392, %400, %408, %416, %424 in 1 : vector<64x16xf32>, vector<64x16xf32>, vector<64x16xf32>, vector<64x16xf32>, vector<64x16xf32>, vector<64x16xf32>, vector<64x16xf32>, vector<64x16xf32>, vector<64x16xf32> -> vector<64x144xf32>
    %c0_229 = arith.constant 0 : index
    %c0_230 = arith.constant 0 : index
    %426 = vector.load %arg18[%c0_229, %c0_230] : memref<144x16xbf16, #tpu.memory_space<vmem>>, vector<144x16xbf16>
    %427 = arith.truncf %425 : vector<64x144xf32> to vector<64x144xbf16>
    %cst_231 = arith.constant dense<0.000000e+00> : vector<64x16xf32>
    %428 = tpu.matmul %427, %426, %cst_231 {dimension_numbers = #tpu.dot_dimension_numbers<[1], [0], [0], [1], [0, 0, 1, 1], [], []>} : vector<64x144xbf16>, vector<144x16xbf16>, vector<64x16xf32> -> vector<64x16xf32>
    %c0_232 = arith.constant 0 : index
    %c0_233 = arith.constant 0 : index
    %429 = vector.load %arg19[%c0_232, %c0_233] : memref<1x16xf32, #tpu.memory_space<vmem>>, vector<1x16xf32>
    %430 = vector.broadcast %429 : vector<1x16xf32> to vector<64x16xf32>
    %431 = arith.addf %428, %430 : vector<64x16xf32>
    %c0_234 = arith.constant 0 : index
    %c0_235 = arith.constant 0 : index
    %c0_236 = arith.constant 0 : index
    %432 = vector.load %arg27[%c0_234, %c0_235, %c0_236] : memref<1x64x16xf32, #tpu.memory_space<vmem>>, vector<1x64x16xf32>
    %433 = vector.shape_cast %432 : vector<1x64x16xf32> to vector<64x16xf32>
    %434 = vector.shape_cast %431 : vector<64x16xf32> to vector<1x64x16xf32>
    tpu.vector_store %arg27[%c0_234, %c0_235, %c0_236], %434 {strides = array<i32>} : memref<1x64x16xf32, #tpu.memory_space<vmem>>, vector<1x64x16xf32>,
    return
  }
  func.func @transform_0(%arg0: i32) -> (i32, i32, i32) {
    %c0_i32 = arith.constant 0 : i32
    %c0_i32_0 = arith.constant 0 : i32
    %c0_i32_1 = arith.constant 0 : i32
    return %arg0, %c0_i32, %c0_i32_0 : i32, i32, i32
  }
  func.func @transform_1(%arg0: i32) -> (i32, i32) {
    %c0_i32 = arith.constant 0 : i32
    %c0_i32_0 = arith.constant 0 : i32
    %c0_i32_1 = arith.constant 0 : i32
    return %c0_i32, %c0_i32_0 : i32, i32
  }
  func.func @transform_2(%arg0: i32) -> (i32, i32) {
    %c0_i32 = arith.constant 0 : i32
    %c0_i32_0 = arith.constant 0 : i32
    %c0_i32_1 = arith.constant 0 : i32
    return %c0_i32, %c0_i32_0 : i32, i32
  }
  func.func @transform_3(%arg0: i32) -> (i32, i32) {
    %c0_i32 = arith.constant 0 : i32
    %c0_i32_0 = arith.constant 0 : i32
    %c0_i32_1 = arith.constant 0 : i32
    return %c0_i32, %c0_i32_0 : i32, i32
  }
  func.func @transform_4(%arg0: i32) -> (i32, i32) {
    %c0_i32 = arith.constant 0 : i32
    %c0_i32_0 = arith.constant 0 : i32
    %c0_i32_1 = arith.constant 0 : i32
    return %c0_i32, %c0_i32_0 : i32, i32
  }
  func.func @transform_5(%arg0: i32) -> (i32, i32) {
    %c0_i32 = arith.constant 0 : i32
    %c0_i32_0 = arith.constant 0 : i32
    %c0_i32_1 = arith.constant 0 : i32
    return %c0_i32, %c0_i32_0 : i32, i32
  }
  func.func @transform_6(%arg0: i32) -> (i32, i32, i32) {
    %c0_i32 = arith.constant 0 : i32
    %c0_i32_0 = arith.constant 0 : i32
    %c0_i32_1 = arith.constant 0 : i32
    %c0_i32_2 = arith.constant 0 : i32
    return %c0_i32, %c0_i32_0, %c0_i32_1 : i32, i32, i32
  }
  func.func @transform_7(%arg0: i32) -> (i32, i32) {
    %c0_i32 = arith.constant 0 : i32
    %c0_i32_0 = arith.constant 0 : i32
    %c0_i32_1 = arith.constant 0 : i32
    return %c0_i32, %c0_i32_0 : i32, i32
  }
  func.func @transform_8(%arg0: i32) -> (i32, i32) {
    %c0_i32 = arith.constant 0 : i32
    %c0_i32_0 = arith.constant 0 : i32
    %c0_i32_1 = arith.constant 0 : i32
    return %c0_i32, %c0_i32_0 : i32, i32
  }
  func.func @transform_9(%arg0: i32) -> (i32, i32) {
    %c0_i32 = arith.constant 0 : i32
    %c0_i32_0 = arith.constant 0 : i32
    %c0_i32_1 = arith.constant 0 : i32
    return %c0_i32, %c0_i32_0 : i32, i32
  }
  func.func @transform_10(%arg0: i32) -> (i32, i32, i32) {
    %c0_i32 = arith.constant 0 : i32
    %c0_i32_0 = arith.constant 0 : i32
    %c0_i32_1 = arith.constant 0 : i32
    %c0_i32_2 = arith.constant 0 : i32
    return %c0_i32, %c0_i32_0, %c0_i32_1 : i32, i32, i32
  }
  func.func @transform_11(%arg0: i32) -> (i32, i32) {
    %c0_i32 = arith.constant 0 : i32
    %c0_i32_0 = arith.constant 0 : i32
    %c0_i32_1 = arith.constant 0 : i32
    return %c0_i32, %c0_i32_0 : i32, i32
  }
  func.func @transform_12(%arg0: i32) -> (i32, i32) {
    %c0_i32 = arith.constant 0 : i32
    %c0_i32_0 = arith.constant 0 : i32
    %c0_i32_1 = arith.constant 0 : i32
    return %c0_i32, %c0_i32_0 : i32, i32
  }
  func.func @transform_13(%arg0: i32) -> (i32, i32) {
    %c0_i32 = arith.constant 0 : i32
    %c0_i32_0 = arith.constant 0 : i32
    %c0_i32_1 = arith.constant 0 : i32
    return %c0_i32, %c0_i32_0 : i32, i32
  }
  func.func @transform_14(%arg0: i32) -> (i32, i32) {
    %c0_i32 = arith.constant 0 : i32
    %c0_i32_0 = arith.constant 0 : i32
    %c0_i32_1 = arith.constant 0 : i32
    return %c0_i32, %c0_i32_0 : i32, i32
  }
  func.func @transform_15(%arg0: i32) -> (i32, i32) {
    %c0_i32 = arith.constant 0 : i32
    %c0_i32_0 = arith.constant 0 : i32
    %c0_i32_1 = arith.constant 0 : i32
    return %c0_i32, %c0_i32_0 : i32, i32
  }
  func.func @transform_16(%arg0: i32) -> (i32, i32) {
    %c0_i32 = arith.constant 0 : i32
    %c0_i32_0 = arith.constant 0 : i32
    %c0_i32_1 = arith.constant 0 : i32
    return %c0_i32, %c0_i32_0 : i32, i32
  }
  func.func @transform_17(%arg0: i32) -> (i32, i32) {
    %c0_i32 = arith.constant 0 : i32
    %c0_i32_0 = arith.constant 0 : i32
    %c0_i32_1 = arith.constant 0 : i32
    return %c0_i32, %c0_i32_0 : i32, i32
  }
  func.func @transform_18(%arg0: i32) -> (i32, i32) {
    %c0_i32 = arith.constant 0 : i32
    %c0_i32_0 = arith.constant 0 : i32
    %c0_i32_1 = arith.constant 0 : i32
    return %c0_i32, %c0_i32_0 : i32, i32
  }
  func.func @transform_19(%arg0: i32) -> (i32, i32) {
    %c0_i32 = arith.constant 0 : i32
    %c0_i32_0 = arith.constant 0 : i32
    %c0_i32_1 = arith.constant 0 : i32
    return %c0_i32, %c0_i32_0 : i32, i32
  }
  func.func @transform_20(%arg0: i32) -> (i32, i32) {
    %c0_i32 = arith.constant 0 : i32
    %c0_i32_0 = arith.constant 0 : i32
    %c0_i32_1 = arith.constant 0 : i32
    return %c0_i32, %c0_i32_0 : i32, i32
  }
  func.func @transform_21(%arg0: i32) -> (i32, i32) {
    %c0_i32 = arith.constant 0 : i32
    %c0_i32_0 = arith.constant 0 : i32
    %c0_i32_1 = arith.constant 0 : i32
    return %c0_i32, %c0_i32_0 : i32, i32
  }
  func.func @transform_22(%arg0: i32) -> (i32, i32) {
    %c0_i32 = arith.constant 0 : i32
    %c0_i32_0 = arith.constant 0 : i32
    %c0_i32_1 = arith.constant 0 : i32
    return %c0_i32, %c0_i32_0 : i32, i32
  }
  func.func @transform_23(%arg0: i32) -> (i32, i32, i32) {
    %c0_i32 = arith.constant 0 : i32
    %c0_i32_0 = arith.constant 0 : i32
    %c0_i32_1 = arith.constant 0 : i32
    %c0_i32_2 = arith.constant 0 : i32
    return %c0_i32, %c0_i32_0, %c0_i32_1 : i32, i32, i32
  }
  func.func @transform_24(%arg0: i32) -> (i32, i32) {
    %c0_i32 = arith.constant 0 : i32
    %c0_i32_0 = arith.constant 0 : i32
    %c0_i32_1 = arith.constant 0 : i32
    return %c0_i32, %c0_i32_0 : i32, i32
  }
  func.func @transform_25(%arg0: i32) -> (i32, i32) {
    %c0_i32 = arith.constant 0 : i32
    %c0_i32_0 = arith.constant 0 : i32
    %c0_i32_1 = arith.constant 0 : i32
    return %c0_i32, %c0_i32_0 : i32, i32
  }
  func.func @transform_26(%arg0: i32) -> (i32, i32, i32) {
    %c0_i32 = arith.constant 0 : i32
    %c0_i32_0 = arith.constant 0 : i32
    %c0_i32_1 = arith.constant 0 : i32
    return %arg0, %c0_i32, %c0_i32_0 : i32, i32, i32
  }
  func.func @transform_27(%arg0: i32) -> (i32, i32, i32) {
    %c0_i32 = arith.constant 0 : i32
    %c0_i32_0 = arith.constant 0 : i32
    %c0_i32_1 = arith.constant 0 : i32
    return %arg0, %c0_i32, %c0_i32_0 : i32, i32, i32
  }
  func.func @transform_28(%arg0: i32) -> (i32, i32, i32) {
    %c0_i32 = arith.constant 0 : i32
    %c0_i32_0 = arith.constant 0 : i32
    %c0_i32_1 = arith.constant 0 : i32
    return %arg0, %c0_i32, %c0_i32_0 : i32, i32, i32
  }
}

</mosaic_0001>

<bundles_post_ra>
// kernel: backbone_fpn_forward.1
= control target key start
LH: loop header
LB: loop body
LE: loop exit
PB: predicated region body
PF: predicated region fallthrough
CT: control target
= control target key end

     0   :  { %s9303_s0 = inlined_call_operand.vmem [shape: f32[2,64,36], index: 0, kind: input, shape index: {}]   ;;  %s9304_s1 = inlined_call_operand.vmem [shape: bf16[36,8], index: 1, kind: input, shape index: {}]   ;;  %s9305_s2 = inlined_call_operand.vmem [shape: f32[1,8], index: 2, kind: input, shape index: {}]   ;;  %s9306_s3 = inlined_call_operand.vmem [shape: bf16[72,16], index: 3, kind: input, shape index: {}]   ;;  %s9307_s4 = inlined_call_operand.vmem [shape: f32[1,16], index: 4, kind: input, shape index: {}]   ;;  %s9308_s5 = inlined_call_operand.vmem [shape: bf16[16,64], index: 5, kind: input, shape index: {}]   ;;  %s9309_s6 = inlined_call_operand.vmem [shape: bf16[9,64,1], index: 6, kind: input, shape index: {}]   ;;  %s9310_s7 = inlined_call_operand.vmem [shape: bf16[144,32], index: 7, kind: input, shape index: {}]   ;;  %s9311_s8 = inlined_call_operand.vmem [shape: f32[1,32], index: 8, kind: input, shape index: {}]   ;;  %s9312_s9 = inlined_call_operand.vmem [shape: bf16[4,16], index: 9, kind: input, shape index: {}]   ;;  %s9313_s10 = inlined_call_operand.vmem [shape: bf16[9,16,1], index: 10, kind: input, shape index: {}]   ;;  %s9314_s11 = inlined_call_operand.vmem [shape: bf16[8,16], index: 11, kind: input, shape index: {}]   ;;  %s9315_s12 = inlined_call_operand.vmem [shape: f32[1,16], index: 12, kind: input, shape index: {}]   ;;  %s9316_s13 = inlined_call_operand.vmem [shape: bf16[16,16], index: 13, kind: input, shape index: {}]   ;;  %s9317_s14 = inlined_call_operand.vmem [shape: f32[1,16], index: 14, kind: input, shape index: {}]   ;;  %s9318_s15 = inlined_call_operand.vmem [shape: bf16[32,16], index: 15, kind: input, shape index: {}]   ;;  %s9319_s16 = inlined_call_operand.vmem [shape: f32[1,16], index: 16, kind: input, shape index: {}]   ;;  %s9320_s17 = inlined_call_operand.vmem [shape: bf16[144,16], index: 17, kind: input, shape index: {}]   ;;  %s9321_s18 = inlined_call_operand.vmem [shape: f32[1,16], index: 18, kind: input, shape index: {}]   ;;  %s9322_s19 = inlined_call_operand.vmem [shape: bf16[144,16], index: 19, kind: input, shape index: {}]   ;;  %s9323_s20 = inlined_call_operand.vmem [shape: f32[1,16], index: 20, kind: input, shape index: {}]   ;;  %s9324_s21 = inlined_call_operand.vmem [shape: bf16[144,16], index: 21, kind: input, shape index: {}]   ;;  %s9325_s22 = inlined_call_operand.vmem [shape: f32[1,16], index: 22, kind: input, shape index: {}]   ;;  %s9326_s23 = inlined_call_operand.vmem [shape: bf16[9,4,1], index: 23, kind: input, shape index: {}]   ;;  %s9327_s24 = inlined_call_operand.vmem [shape: bf16[64,16], index: 24, kind: input, shape index: {}]   ;;  %s9328_s25 = inlined_call_operand.vmem [shape: bf16[16,4], index: 25, kind: input, shape index: {}]   ;;  %s9329_s26 = inlined_call_operand.hbm [shape: f32[2,64,16], index: 26, kind: output, shape index: {0}]   ;;  %s9330_s27 = inlined_call_operand.hbm [shape: f32[2,16,16], index: 27, kind: output, shape index: {1}]   ;;  %s9331_s28 = inlined_call_operand.hbm [shape: f32[2,4,16], index: 28, kind: output, shape index: {2}]  }
   0x1   :  { %9377 = sst [smem:[#allocation18_spill]] %s9303_s0 }
   0x2   :  { %9378 = sst [smem:[#allocation19_spill]] %s9304_s1 }
   0x3   :  { %9379 = sst [smem:[#allocation20_spill]] %s9305_s2 }
   0x4   :  { %9380 = sst [smem:[#allocation21_spill]] %s9306_s3 }
   0x5   :  { %9381 = sst [smem:[#allocation22_spill]] %s9307_s4 }
   0x6   :  { %9382 = sst [smem:[#allocation23_spill]] %s9308_s5 }
   0x7   :  { %9383 = sst [smem:[#allocation24_spill]] %s9309_s6 }
   0x8   :  { %9384 = sst [smem:[#allocation25_spill]] %s9310_s7 }
   0x9   :  { %9385 = sst [smem:[#allocation26_spill]] %s9311_s8 }
   0xa   :  { %9386 = sst [smem:[#allocation27_spill]] %s9312_s9 }
   0xb   :  { %9387 = sst [smem:[#allocation28_spill]] %s9313_s10 }
   0xc   :  { %9388 = sst [smem:[#allocation29_spill]] %s9314_s11 }
   0xd   :  { %9389 = sst [smem:[#allocation30_spill]] %s9315_s12 }
   0xe   :  { %9390 = sst [smem:[#allocation31_spill]] %s9316_s13 }
   0xf   :  { %9391 = sst [smem:[#allocation32_spill]] %s9318_s15 }
  0x10   :  { %9392 = sst [smem:[#allocation33_spill]] %s9319_s16 }
  0x11   :  { %9393 = sst [smem:[#allocation34_spill]] %s9321_s18 }
  0x12   :  { %9394 = sst [smem:[#allocation35_spill]] %s9329_s26 }
  0x13   :  { %34 = vsyncpa [#allocation3], 0 }
  0x14   :  { %36 = vsyncpa [#allocation3 + $0x1], 0 }
  0x15   :  { %37 = vsyncpa [#allocation5], 0 }
  0x16   :  { %39 = vsyncpa [#allocation5 + $0x1], 0  ;;  %s7069_s8 = smov 0   ;;  %s7071_s5 = smov 0  }
  0x17   :  { %s7073_s9 = smov 0   ;;  %s7075_s30 = smov 0  }
  0x18 LB: > { %9395 = sst [smem:[#allocation9_spill]] %s6891_s8  ;;  %s7090_s3 = sadd.s32 4294967295, %s6903_s30   ;;  %s6903_s30 = sphi %s7075_s30, %s9546_s30   ;;  %s6899_s9 = sphi %s7073_s9, %s9548_s9   ;;  %s6895_s5 = sphi %s7071_s5, %s9550_s5   ;;  %s6891_s8 = sphi %s7069_s8, %s9549_s8  }
  0x19   : > { %9396 = sst [smem:[#allocation10_spill]] %s6899_s9  ;;  %s9337_s6 = sadd.s32 4294967294, %s6903_s30  }
  0x1a   : > { %9397 = sst [smem:[#allocation11_spill]] %s6903_s30  ;;  %s7094_s10 = sadd.s32 1, %s6903_s30  }
  0x1b   : > { %9398 = sst [smem:[#allocation12_spill]] %s7094_s10  ;;  %s603_s0 = sadd.s32 1, %s6899_s9 }
  0x1c   : > { %s600_s11 = ssub.s32 %s6903_s30, %s7094_s10  ;;  %p613_p0 = scmp.ne.s32.totalorder %s6899_s9, %s6895_s5 }
  0x1d   : > { %p601_p1 = scmp.eq.s32.totalorder %s600_s11, 0  ;;  %p614_p2 = scmp.eq.s32.totalorder %s7090_s3, 1 }
  0x1e   : > { %p619_p3 = scmp.ne.s32.totalorder %s6895_s5, %s6891_s8  ;;  %p620_p4 = scmp.eq.s32.totalorder %s9337_s6, 1 }
  0x1f   : > { %s7107_s29 = scalar_select %p601_p1, %s6899_s9, %s603_s0  }
  0x20   : > { %p7109_p5 = por %p614_p2, %p613_p0  ;;  %p7113_p6 = por %p620_p4, %p619_p3 }
  0x21   : > { %9399 = sst [smem:[#allocation13_spill]] %s7107_s29  ;;  %p4948_p7 = scmp.ge.s32.totalorder %s6903_s30, 1 }
  0x22   : > { %s9401_s7 = scalar_select %p7113_p6, 1, 0 }
  0x23   : > { %p773_p8 = scmp.lt.s32.totalorder %s6903_s30, 3 }
  0x24   : > { %9402 = sst [smem:[#allocation14_spill]] %s9401_s7 }
  0x25   : > { %p774_p9 = pnand %p4948_p7, %p773_p8 }
  0x27   : > { %777 = sbr.rel (%p774_p9) target bundleno = 2700 (0xa8c), region = 124 }
  0x2e   : > { %s9403_s4 = sld [smem:[#allocation19_spill]]  ;;  %v9343_v2 = vmov 0   ;;  %s9404_s9 = sld [smem:[#allocation24_spill]]  ;;  %vm915_vm0 = vcmask 1041408   ;;  %vm902_vm1 = vcmask 293888   ;;  %vm1151_vm2 = vcmask 1046528  }
  0x2f   : > { %5891 = vset.pattern.permute.xlu0 %v9343_v2  ;;  %5902 = vset.pattern.permute.xlu1 %v9343_v2  ;;  %p857_p10 = scmp.lt.s32.totalorder %s7090_s3, 1  ;;  %s9406_s12 = sld [smem:[#allocation18_spill]]  ;;  %vm999_vm3 = vcmask 1040384   ;;  %vm2019_vm4 = vcmask 1043456   ;;  %vm1894_vm5 = vcmask 64512   ;;  %vm1903_vm6 = vcmask 130048  }
  0x30   : > { %2494 = vmatprep.subr.bf16.mxu1 %v9343_v2  ;;  %s9407_s29 = sld [smem:[#allocation20_spill]]  ;;  %s9356_s7 = smov 56   ;;  %vm1912_vm7 = vcmask 195584   ;;  %vm1930_vm8 = vcmask 326656   ;;  %vm1921_vm9 = vcmask 261120   ;;  %vm1939_vm10 = vcmask 392192  }
  0x31   : > { %s858_s1 = scalar_select %p857_p10, %s7090_s3, 1  ;;  %vm1948_vm11 = vcmask 457728   ;;  %vm1957_vm12 = vcmask 523264   ;;  %vm2006_vm13 = vcmask 588800   ;;  %vm6915_vm14 = vmmov 0  }
  0x32   : > { %s9346_s0 = smov 24   ;;  %s9418_s6 = sld [smem:[#allocation21_spill]]  ;;  %vm2200_vm15 = vcmask 1042432  }
  0x33   : > { %s5222_s11 = sshll.u32 %s858_s1, 6  ;;  %s9352_s1 = smov 32  }
  0x34   : > { %v6728_v0 = vld [vmem:[%s9403_s4] sm:$0xff]   ;;  %v6729_v1 = vld [vmem:[%s9403_s4 + $0x8] sm:$0xff]   ;;  %s9405_s10 = smov %s9404_s9  ;;  %v6730_v9 = vld [vmem:[%s9403_s4 + $0x10] ss:$0 sps:$4 sm:$0x33]   ;;  %s9449_s4 = smov 48  }
  0x35   : > { %5711 = vmatprep.subr.bf16.mxu0 %v6728_v0  ;;  %v5588_v3 = vld [vmem:[%s9404_s9 + $0x20] sm:$0xff]   ;;  %v5589_v7 = vld [vmem:[%s9405_s10 + $0x28] sm:$0xff]   ;;  %v917_v24 = vsel %vm915_vm0, %v6730_v9, 0  ;;  %s7159_s8 = scalar_lea.vmem %s9406_s12, %s5222_s11  ;;  %s9350_s12 = smov 8  }
  0x36   : > { %5712 = vmatpush3.bf16.msra.mxu0 %v6728_v0  ;;  %v5243_v4 = vunpack.c.l.bf16 %v5588_v3  ;;  %v5244_v5 = vunpack.c.h.bf16 %v5588_v3  ;;  %v5592_v6 = vld [vmem:[%s9405_s10 + $0x40] sm:$0xff]   ;;  %v5593_v8 = vld [vmem:[%s9405_s10 + $0x48] sm:$0xff]   ;;  %v5247_v12 = vunpack.c.l.bf16 %v5589_v7  ;;  %v5248_v15 = vunpack.c.h.bf16 %v5589_v7  ;;  %v865_v31 = vld [vmem:[%s7159_s8 + $0x10] sm:$0xff]  ;;  %s9348_s11 = smov 16   ;;  %s6911_s9 = smov 40  }
  0x37   : > { %5713 = vmatprep.subr.bf16.mxu0 %v6729_v1  ;;  %v5259_v10 = vunpack.c.l.bf16 %v5592_v6  ;;  %v5260_v11 = vunpack.c.h.bf16 %v5592_v6  ;;  %v5596_v13 = vld [vmem:[%s9405_s10 + $0x60] sm:$0xff]   ;;  %v5263_v16 = vunpack.c.l.bf16 %v5593_v8  ;;  %v5264_v17 = vunpack.c.h.bf16 %v5593_v8  ;;  %v5597_v18 = vld [vmem:[%s9405_s10 + $0x68] sm:$0xff]   ;;  %v866_v33 = vld [vmem:[%s7159_s8 + $0x18] sm:$0xff]  ;;  %s9455_s18 = sld [smem:[#allocation22_spill]]  ;;  %s9366_s30 = smov 96  }
  0x38   : > { %v5892_v14 = vpack.i.bf16 %v5244_v5, %v5243_v4  ;;  %v5897_v20 = vpack.i.bf16 %v5248_v15, %v5247_v12  ;;  %v5275_v21 = vunpack.c.l.bf16 %v5596_v13  ;;  %v5276_v22 = vunpack.c.h.bf16 %v5596_v13  ;;  %v5600_v23 = vld [vmem:[%s9405_s10 + $0x80] sm:$0xff]   ;;  %v5601_v28 = vld [vmem:[%s9405_s10 + $0x88] sm:$0xff]   ;;  %v869_v46 = vld [vmem:[%s7159_s8 + $0x30] sm:$0xff]  ;;  %s9457_s26 = sld [smem:[#allocation29_spill]]  ;;  %s9459_s13 = sld [smem:[#allocation31_spill]] }
  0x39   : > { %v5903_v19 = vpack.i.bf16 %v5260_v11, %v5259_v10  ;;  %v5908_v25 = vpack.i.bf16 %v5264_v17, %v5263_v16  ;;  %v5279_v26 = vunpack.c.l.bf16 %v5597_v18  ;;  %v5280_v27 = vunpack.c.h.bf16 %v5597_v18  ;;  %v863_v29 = vld [vmem:[%s7159_s8] sm:$0xff]  ;;  %v864_v30 = vld [vmem:[%s7159_s8 + $0x8] sm:$0xff]  ;;  %v870_v47 = vld [vmem:[%s7159_s8 + $0x38] sm:$0xff]  ;;  %s9460_s15 = sld [smem:[#allocation32_spill]]  ;;  %s9462_s16 = sld [smem:[#allocation33_spill]] }
  0x3a   : > { %5714 = vmatpush3.bf16.msra.mxu0 %v6729_v1  ;;  %5893 = vperm.xlu0 %5891, %v5892_v14   ;;  %v876_v32 = vpack.c.bf16 %v864_v30, %v863_v29  ;;  %v867_v34 = vld [vmem:[%s7159_s8 + $0x20] sm:$0xff]  ;;  %v868_v35 = vld [vmem:[%s7159_s8 + $0x28] sm:$0xff]  ;;  %v5291_v36 = vunpack.c.l.bf16 %v5600_v23  ;;  %v877_v37 = vpack.c.bf16 %v866_v33, %v865_v31  ;;  %v5913_v38 = vpack.i.bf16 %v5276_v22, %v5275_v21  ;;  %v5590_v6 = vld [vmem:[%s9405_s10 + $0x30] sm:$0xff]   ;;  %s9447_s8 = smov 24  }
  0x3b   : > { %5823 = vmatprep.subr.msk.bf16.mxu0 %vm915_vm0, %v6730_v9  ;;  %5904 = vperm.xlu1 %5902, %v5903_v19   ;;  %v878_v39 = vpack.c.bf16 %v868_v35, %v867_v34  ;;  %v5292_v40 = vunpack.c.h.bf16 %v5600_v23  ;;  %v5918_v41 = vpack.i.bf16 %v5280_v27, %v5279_v26  ;;  %v5295_v42 = vunpack.c.l.bf16 %v5601_v28  ;;  %v5604_v44 = vld [vmem:[%s9405_s10 + $0xa0] sm:$0xff]   ;;  %v5605_v45 = vld [vmem:[%s9405_s10 + $0xa8] sm:$0xff]   ;;  %v5591_v14 = vld [vmem:[%s9405_s10 + $0x38] sm:$0xff]  }
  0x3c   : > { %5717 = vmatprep.mubr.msk.bf16.mxu0 %vm902_vm1, %v876_v32  ;;  %v5296_v43 = vunpack.c.h.bf16 %v5601_v28  ;;  %v5307_v49 = vunpack.c.l.bf16 %v5604_v44  ;;  %v5308_v50 = vunpack.c.h.bf16 %v5604_v44  ;;  %v5311_v52 = vunpack.c.l.bf16 %v5605_v45  ;;  %v5608_v54 = vld [vmem:[%s9405_s10 + $0xc0] sm:$0xff]   ;;  %v5609_v55 = vld [vmem:[%s9405_s10 + $0xc8] sm:$0xff]   ;;  %v5594_v18 = vld [vmem:[%s9405_s10 + $0x50] sm:$0xff]  }
  0x3d   : > { %v5923_v48 = vpack.i.bf16 %v5292_v40, %v5291_v36  ;;  %v5312_v53 = vunpack.c.h.bf16 %v5605_v45  ;;  %v879_v56 = vpack.c.bf16 %v870_v47, %v869_v46  ;;  %v5612_v57 = vld [vmem:[%s9405_s10 + $0xe0] sm:$0xff]   ;;  %v5323_v59 = vunpack.c.l.bf16 %v5608_v54  ;;  %v5613_v61 = vld [vmem:[%s9405_s10 + $0xe8] sm:$0xff]   ;;  %v5595_v22 = vld [vmem:[%s9405_s10 + $0x58] sm:$0xff]  }
  0x3e   : > { %5716 = vmatpush3.bf16.msra.mxu0 %v917_v24  ;;  %5898 = vperm.xlu0 %5891, %v5897_v20   ;;  %v5928_v51 = vpack.i.bf16 %v5296_v43, %v5295_v42  ;;  %v5933_v58 = vpack.i.bf16 %v5308_v50, %v5307_v49  ;;  %v5324_v60 = vunpack.c.h.bf16 %v5608_v54  ;;  %v5327_v63 = vunpack.c.l.bf16 %v5609_v55  ;;  %v5616_v1 = vld [vmem:[%s9405_s10 + $0x100] sm:$0xff]   ;;  %v5617_v10 = vld [vmem:[%s9405_s10 + $0x108] sm:$0xff]   ;;  %v5598_v26 = vld [vmem:[%s9405_s10 + $0x70] sm:$0xff]  }
  0x3f   : > { %5909 = vperm.xlu1 %5902, %v5908_v25   ;;  %v5938_v62 = vpack.i.bf16 %v5312_v53, %v5311_v52  ;;  %v5328_v0 = vunpack.c.h.bf16 %v5609_v55  ;;  %v5339_v4 = vunpack.c.l.bf16 %v5612_v57  ;;  %v5340_v5 = vunpack.c.h.bf16 %v5612_v57  ;;  %v5599_v30 = vld [vmem:[%s9405_s10 + $0x78] sm:$0xff]   ;;  %v5602_v34 = vld [vmem:[%s9405_s10 + $0x90] sm:$0xff]  }
  0x40   : > { %v5943_v3 = vpack.i.bf16 %v5324_v60, %v5323_v59  ;;  %v5343_v8 = vunpack.c.l.bf16 %v5613_v61  ;;  %v5344_v9 = vunpack.c.h.bf16 %v5613_v61  ;;  %v5355_v12 = vunpack.c.l.bf16 %v5616_v1  ;;  %v5606_v42 = vld [vmem:[%s9405_s10 + $0xb0] sm:$0xff]   ;;  %v5607_v46 = vld [vmem:[%s9405_s10 + $0xb8] sm:$0xff]  }
  0x41   : > { %5718 = vmatmul.mubr.msk.bf16.vlgmr.msra.gmra.mrb[0].mxu0 %vm902_vm1, %v877_v37  ;;  %v5948_v7 = vpack.i.bf16 %v5328_v0, %v5327_v63  ;;  %v5953_v11 = vpack.i.bf16 %v5340_v5, %v5339_v4  ;;  %v5356_v13 = vunpack.c.h.bf16 %v5616_v1  ;;  %v5251_v16 = vunpack.c.l.bf16 %v5590_v6  ;;  %v5610_v50 = vld [vmem:[%s9405_s10 + $0xd0] sm:$0xff]   ;;  %v5611_v54 = vld [vmem:[%s9405_s10 + $0xd8] sm:$0xff]  }
  0x42   : > { %5914 = vperm.xlu0 %5891, %v5913_v38   ;;  %5721 = vmatprep.mubr.msk.bf16.mxu0 %vm902_vm1, %v878_v39  ;;  %v5958_v15 = vpack.i.bf16 %v5344_v9, %v5343_v8  ;;  %v5252_v17 = vunpack.c.h.bf16 %v5590_v6  ;;  %v5359_v20 = vunpack.c.l.bf16 %v5617_v10  ;;  %v5360_v21 = vunpack.c.h.bf16 %v5617_v10  ;;  %v5603_v38 = vld [vmem:[%s9405_s10 + $0x98] sm:$0xff]   ;;  %v5614_v0 = vld [vmem:[%s9405_s10 + $0xf0] sm:$0xff]  }
  0x43   : > { %5919 = vperm.xlu1 %5902, %v5918_v41   ;;  %v5963_v19 = vpack.i.bf16 %v5356_v13, %v5355_v12  ;;  %v5255_v24 = vunpack.c.l.bf16 %v5591_v14  ;;  %v5256_v25 = vunpack.c.h.bf16 %v5591_v14  ;;  %v5267_v28 = vunpack.c.l.bf16 %v5594_v18  ;;  %v5615_v1 = vld [vmem:[%s9405_s10 + $0xf8] sm:$0xff]   ;;  %v5618_v9 = vld [vmem:[%s9405_s10 + $0x110] sm:$0xff]  }
  0x44   : > { %v5968_v23 = vpack.i.bf16 %v5252_v17, %v5251_v16  ;;  %v5973_v27 = vpack.i.bf16 %v5360_v21, %v5359_v20  ;;  %v5268_v29 = vunpack.c.h.bf16 %v5594_v18  ;;  %v5271_v32 = vunpack.c.l.bf16 %v5595_v22  ;;  %v5619_v10 = vld [vmem:[%s9405_s10 + $0x118] sm:$0xff]   ;;  %v5226_v17 = vld [vmem:[%s9405_s10] sm:$0xff]   ;;  %v5585_v18 = vld [vmem:[%s9405_s10 + $0x8] sm:$0xff]  }
  0x45   : > { %v5978_v31 = vpack.i.bf16 %v5256_v25, %v5255_v24  ;;  %v5272_v33 = vunpack.c.h.bf16 %v5595_v22  ;;  %v5283_v36 = vunpack.c.l.bf16 %v5598_v26  ;;  %v5284_v37 = vunpack.c.h.bf16 %v5598_v26  ;;  %v5586_v25 = vld [vmem:[%s9405_s10 + $0x10] sm:$0xff]   ;;  %v5587_v26 = vld [vmem:[%s9405_s10 + $0x18] sm:$0xff]  }
  0x46   : > { %5924 = vperm.xlu0 %5891, %v5923_v48   ;;  %v5983_v35 = vpack.i.bf16 %v5268_v29, %v5267_v28  ;;  %v5287_v40 = vunpack.c.l.bf16 %v5599_v30  ;;  %v5288_v41 = vunpack.c.h.bf16 %v5599_v30  ;;  %v5299_v44 = vunpack.c.l.bf16 %v5602_v34 }
  0x47   : > { %5929 = vperm.xlu1 %5902, %v5928_v51   ;;  %v5988_v39 = vpack.i.bf16 %v5272_v33, %v5271_v32  ;;  %v5993_v43 = vpack.i.bf16 %v5284_v37, %v5283_v36  ;;  %v5300_v45 = vunpack.c.h.bf16 %v5602_v34  ;;  %v5303_v48 = vunpack.c.l.bf16 %v5603_v38 }
  0x48   : > { %v5998_v47 = vpack.i.bf16 %v5288_v41, %v5287_v40  ;;  %v5304_v49 = vunpack.c.h.bf16 %v5603_v38  ;;  %v5315_v52 = vunpack.c.l.bf16 %v5606_v42  ;;  %v5316_v53 = vunpack.c.h.bf16 %v5606_v42 }
  0x49   : > { %5722 = vmatmul.mubr.msk.bf16.gmra.mrb[4].mxu0 %vm902_vm1, %v879_v56  ;;  %v6003_v51 = vpack.i.bf16 %v5300_v45, %v5299_v44  ;;  %v5319_v56 = vunpack.c.l.bf16 %v5607_v46  ;;  %v5320_v57 = vunpack.c.h.bf16 %v5607_v46  ;;  %v5331_v59 = vunpack.c.l.bf16 %v5610_v50 }
  0x4a   : > { %5934 = vperm.xlu0 %5891, %v5933_v58   ;;  %v6008_v55 = vpack.i.bf16 %v5304_v49, %v5303_v48  ;;  %v6013_v58 = vpack.i.bf16 %v5316_v53, %v5315_v52  ;;  %v5332_v60 = vunpack.c.h.bf16 %v5610_v50  ;;  %v5336_v63 = vunpack.c.h.bf16 %v5611_v54 }
  0x4b   : > { %5939 = vperm.xlu1 %5902, %v5938_v62   ;;  %v6018_v61 = vpack.i.bf16 %v5320_v57, %v5319_v56  ;;  %v5335_v62 = vunpack.c.l.bf16 %v5611_v54  ;;  %v5347_v4 = vunpack.c.l.bf16 %v5614_v0  ;;  %v5348_v5 = vunpack.c.h.bf16 %v5614_v0 }
  0x4c   : > { %v5352_v8 = vunpack.c.h.bf16 %v5615_v1  ;;  %v5363_v12 = vunpack.c.l.bf16 %v5618_v9  ;;  %v5364_v13 = vunpack.c.h.bf16 %v5618_v9  ;;  %v5368_v16 = vunpack.c.h.bf16 %v5619_v10 }
  0x4d   : > { %v6028_v6 = vpack.i.bf16 %v5336_v63, %v5335_v62  ;;  %v5227_v20 = vunpack.c.l.bf16 %v5226_v17  ;;  %v5228_v21 = vunpack.c.h.bf16 %v5226_v17  ;;  %v5232_v24 = vunpack.c.h.bf16 %v5585_v18 }
  0x4e   : > { %5944 = vperm.xlu0 %5891, %v5943_v3   ;;  %v6023_v3 = vpack.i.bf16 %v5332_v60, %v5331_v59  ;;  %v5235_v28 = vunpack.c.l.bf16 %v5586_v25  ;;  %v5236_v29 = vunpack.c.h.bf16 %v5586_v25  ;;  %v5240_v32 = vunpack.c.h.bf16 %v5587_v26 }
  0x4f   : > { %5949 = vperm.xlu1 %5902, %v5948_v7   ;;  %v5351_v7 = vunpack.c.l.bf16 %v5615_v1  ;;  %vm2154_vm1 = vcmask 1044480  }
  0x50   : > { %v6063_v33 = vpack.i.bf16 %v5236_v29, %v5235_v28 }
  0x51   : > { %v6038_v14 = vpack.i.bf16 %v5352_v8, %v5351_v7 }
  0x52   : > { %5954 = vperm.xlu0 %5891, %v5953_v11   ;;  %v6033_v11 = vpack.i.bf16 %v5348_v5, %v5347_v4 }
  0x53   : > { %5959 = vperm.xlu1 %5902, %v5958_v15   ;;  %v5367_v15 = vunpack.c.l.bf16 %v5619_v10 }
  0x55   : > { %v6048_v22 = vpack.i.bf16 %v5368_v16, %v5367_v15 }
  0x56   : > { %5964 = vperm.xlu0 %5891, %v5963_v19   ;;  %v6043_v19 = vpack.i.bf16 %v5364_v13, %v5363_v12 }
  0x57   : > { %5969 = vperm.xlu1 %5902, %v5968_v23   ;;  %v5231_v23 = vunpack.c.l.bf16 %v5585_v18 }
  0x59   : > { %v6058_v30 = vpack.i.bf16 %v5232_v24, %v5231_v23 }
  0x5a   : > { %5974 = vperm.xlu0 %5891, %v5973_v27   ;;  %v6053_v27 = vpack.i.bf16 %v5228_v21, %v5227_v20 }
  0x5b   : > { %5979 = vperm.xlu1 %5902, %v5978_v31   ;;  %v5239_v31 = vunpack.c.l.bf16 %v5587_v26 }
  0x5d   : > { %v6068_v34 = vpack.i.bf16 %v5240_v32, %v5239_v31 }
  0x5e   : > { %5984 = vperm.xlu0 %5891, %v5983_v35  }
  0x5f   : > { %5989 = vperm.xlu1 %5902, %v5988_v39  }
  0x62   : > { %5994 = vperm.xlu0 %5891, %v5993_v43  }
  0x63   : > { %5999 = vperm.xlu1 %5902, %v5998_v47  }
  0x66   : > { %6004 = vperm.xlu0 %5891, %v6003_v51  }
  0x67   : > { %6009 = vperm.xlu1 %5902, %v6008_v55  }
  0x6a   : > { %6014 = vperm.xlu0 %5891, %v6013_v58  }
  0x6b   : > { %6019 = vperm.xlu1 %5902, %v6018_v61  }
  0x6e   : > { %6024 = vperm.xlu0 %5891, %v6023_v3  }
  0x6f   : > { %6029 = vperm.xlu1 %5902, %v6028_v6  }
  0x72   : > { %6034 = vperm.xlu0 %5891, %v6033_v11  }
  0x73   : > { %6039 = vperm.xlu1 %5902, %v6038_v14  }
  0x76   : > { %6044 = vperm.xlu0 %5891, %v6043_v19  }
  0x77   : > { %6049 = vperm.xlu1 %5902, %v6048_v22  }
  0x7a   : > { %6054 = vperm.xlu0 %5891, %v6053_v27  }
  0x7b   : > { %6059 = vperm.xlu1 %5902, %v6058_v30  }
  0x7e   : > { %6064 = vperm.xlu0 %5891, %v6063_v33  }
  0x7f   : > { %6069 = vperm.xlu1 %5902, %v6068_v34   ;;  %v7352_v34 = vld [vmem:[%s9407_s29] ss:$0 sm:$0xff]  ;;  %s9446_s29 = smov 16  }
  0xb9   : > { %v7260_v35 = vpop.permute.xlu0 %5893 }
  0xba   : > { %v7262_v36 = vpop.permute.xlu1 %5904  ;;  %v5895_v57 = vunpack.i.l.bf16 %v7260_v35  ;;  %v5896_v58 = vunpack.i.h.bf16 %v7260_v35 }
  0xbb   : > { %v5907_v59 = vunpack.i.h.bf16 %v7262_v36  ;;  %v5906_v60 = vunpack.i.l.bf16 %v7262_v36 }
  0xbc   : > { %v7308_v61 = vmul.f32 0.0, %v5895_v57 }
  0xbd   : > { %v7264_v37 = vpop.permute.xlu0 %5898 }
  0xbe   : > { %v7266_v38 = vpop.permute.xlu1 %5909  ;;  %v5901_v62 = vunpack.i.h.bf16 %v7264_v37  ;;  %v5900_v63 = vunpack.i.l.bf16 %v7264_v37 }
  0xbf   : > { %v5912_v0 = vunpack.i.h.bf16 %v7266_v38  ;;  %v5911_v3 = vunpack.i.l.bf16 %v7266_v38 }
  0xc1   : > { %v7268_v39 = vpop.permute.xlu0 %5914 }
  0xc2   : > { %v7270_v40 = vpop.permute.xlu1 %5919  ;;  %v5917_v4 = vunpack.i.h.bf16 %v7268_v39  ;;  %v5916_v5 = vunpack.i.l.bf16 %v7268_v39 }
  0xc3   : > { %v5922_v6 = vunpack.i.h.bf16 %v7270_v40  ;;  %v5921_v8 = vunpack.i.l.bf16 %v7270_v40 }
  0xc5   : > { %v7272_v41 = vpop.permute.xlu0 %5924 }
  0xc6   : > { %v7274_v42 = vpop.permute.xlu1 %5929  ;;  %v5927_v9 = vunpack.i.h.bf16 %v7272_v41  ;;  %v5926_v10 = vunpack.i.l.bf16 %v7272_v41 }
  0xc7   : > { %v5932_v11 = vunpack.i.h.bf16 %v7274_v42  ;;  %v5931_v12 = vunpack.i.l.bf16 %v7274_v42 }
  0xc9   : > { %v7276_v43 = vpop.permute.xlu0 %5934 }
  0xca   : > { %v7278_v44 = vpop.permute.xlu1 %5939  ;;  %v5937_v13 = vunpack.i.h.bf16 %v7276_v43  ;;  %v5936_v14 = vunpack.i.l.bf16 %v7276_v43 }
  0xcd   : > { %v7280_v45 = vpop.permute.xlu0 %5944 }
  0xce   : > { %v7282_v46 = vpop.permute.xlu1 %5949 }
  0xd1   : > { %v7284_v47 = vpop.permute.xlu0 %5954 }
  0xd2   : > { %v7286_v48 = vpop.permute.xlu1 %5959  ;;  %v5957_v21 = vunpack.i.h.bf16 %v7284_v47  ;;  %v5956_v22 = vunpack.i.l.bf16 %v7284_v47 }
  0xd3   : > { %v5962_v23 = vunpack.i.h.bf16 %v7286_v48  ;;  %v5961_v24 = vunpack.i.l.bf16 %v7286_v48 }
  0xd5   : > { %v7288_v49 = vpop.permute.xlu0 %5964 }
  0xd6   : > { %v7290_v50 = vpop.permute.xlu1 %5969 }
  0xd7   : > { %v9409_v39 = vunpack.i.h.bf16 %v7290_v50 }
  0xd9   : > { %v7292_v51 = vpop.permute.xlu0 %5974 }
  0xda   : > { %v7294_v52 = vpop.permute.xlu1 %5979 }
  0xdd   : > { %v7296_v53 = vpop.permute.xlu0 %5984 }
  0xde   : > { %v7298_v54 = vpop.permute.xlu1 %5989 }
  0xe1   : > { %v7300_v55 = vpop.permute.xlu0 %5994 }
  0xe2   : > { %v7302_v56 = vpop.permute.xlu1 %5999 }
  0xe5   : > { %v7313_v1 = vpop.permute.xlu0 %6004 }
  0xe6   : > { %v7319_v7 = vpop.permute.xlu1 %6009 }
  0xe9   : > { %v7341_v28 = vpop.permute.xlu0 %6014 }
  0xea   : > { %v7347_v33 = vpop.permute.xlu1 %6019 }
  0xed   : > { %v7372_v17 = vpop.permute.xlu0 %6024 }
  0xee   : > { %v7379_v18 = vpop.permute.xlu1 %6029 }
 0x114   : > { %v5719_v16 = vpop.f32.mrb[0].mxu0 }
 0x115   : > { %v962_v57 = vadd.f32 %v5719_v16, %v7352_v34  ;;  %v953_v2 = vpop.f32.mrb[1].mxu0 }
 0x116   : > { %v954_v20 = vadd.f32 %v7352_v34, %v953_v2  ;;  %v5720_v26 = vpop.f32.mrb[2].mxu0 }
 0x117   : > { %v7374_v25 = vmax.f32 %v962_v57, 0.0  ;;  %v965_v16 = vadd.f32 %v5720_v26, %v7352_v34  ;;  %v956_v47 = vpop.f32.mrb[3].mxu0 }
 0x118   : > { %v7381_v19 = vmax.f32 %v954_v20, 0.0  ;;  %v957_v2 = vadd.f32 %v7352_v34, %v956_v47 }
 0x119   : > { %v7386_v27 = vmax.f32 %v965_v16, 0.0  ;;  %v1368_v57 = vmul.f32 %v5931_v12, %v7374_v25  ;;  %v1145_v20 = vmul.f32 %v5901_v62, %v7374_v25  ;;  %v1566_v47 = vmul.f32 %v5957_v21, %v7374_v25 }
 0x11a   : > { %v7389_v26 = vmax.f32 %v957_v2, 0.0  ;;  %v1143_v31 = vmul.f32 %v5896_v58, %v7381_v19  ;;  %v1366_v12 = vmul.f32 %v5926_v10, %v7381_v19  ;;  %v1155_v2 = vrot.slane %v7374_v25, 1 }
 0x11b   : > { %v1369_v16 = vmul.f32 %v5932_v11, %v7386_v27  ;;  %v9345_v15 = vrot.slane %v7386_v27, 1 }
 0x11c   : > { %v5723_v35 = vpop.f32.mrb[4].mxu0  ;;  %v6073_v58 = vpack.i.bf16 %v1143_v31, %v7308_v61  ;;  %v1367_v62 = vmul.f32 %v5927_v9, %v7389_v26  ;;  %v1144_v42 = vmul.f32 %v5900_v63, %v7389_v26  ;;  %v1565_v11 = vmul.f32 %v5956_v22, %v7389_v26 }
 0x11d   : > { %v969_v21 = vpop.f32.mrb[5].mxu0  ;;  %v6078_v32 = vpack.i.bf16 %v1369_v16, %v1368_v57  ;;  %v1153_v10 = vrot.slane %v7389_v26, 1  ;;  %v7418_v30 = vsel %vm1151_vm2, %v1155_v2, %v9345_v15  ;;  %v1152_v61 = vrot.slane %v7381_v19, 1 }
 0x11e   : > { %v970_v41 = vadd.f32 %v7352_v34, %v969_v21  ;;  %v5724_v9 = vpop.f32.mrb[6].mxu0  ;;  %6074 = vrot.lane.b32.xlu0 %v6073_v58, %s9350_s12  ;;  %v6088_v37 = vpack.i.bf16 %v1367_v62, %v1366_v12  ;;  %v6083_v63 = vpack.i.bf16 %v1145_v20, %v1144_v42  ;;  %v6093_v22 = vpack.i.bf16 %v1566_v47, %v1565_v11 }
 0x11f   : > { %v6031_v31 = vunpack.i.l.bf16 %v7379_v18  ;;  %v978_v57 = vadd.f32 %v5723_v35, %v7352_v34  ;;  %6079 = vrot.lane.b32.xlu1 %v6078_v32, %s9352_s1  ;;  %v972_v16 = vpop.f32.mrb[7].mxu0  ;;  %v1156_v15 = vsel %vm1151_vm2, %v1153_v10, %v1155_v2  ;;  %v1236_v21 = vmul.f32 %v5912_v0, %v7418_v30 }
 0x120   : > { %v7430_v29 = vmax.f32 %v970_v41, 0.0  ;;  %v981_v12 = vadd.f32 %v5724_v9, %v7352_v34  ;;  %v1235_v20 = vmul.f32 %v5911_v3, %v1156_v15  ;;  %v1154_v47 = vsel %vm1151_vm2, %v1152_v61, %v1153_v10  ;;  %v6035_v41 = vpop.permute.xlu0 %6034 }
 0x121   : > { %v1175_v35 = vsel %vm1151_vm2, 0.0, %v1152_v61  ;;  %v1234_v32 = vmul.f32 %v5907_v59, %v1154_v47  ;;  %v1001_v2 = vrot.slane %v7389_v26, 7  ;;  %v1003_v58 = vrot.slane %v7374_v25, 7 }
 0x122   : > { %v973_v0 = vadd.f32 %v7352_v34, %v972_v16  ;;  %6089 = vrot.lane.b32.xlu0 %v6088_v37, %s9352_s1  ;;  %v6103_v62 = vpack.i.bf16 %v1236_v21, %v1235_v20  ;;  %v1233_v38 = vmul.f32 %v5906_v60, %v1175_v35  ;;  %v1005_v3 = vrot.slane %v7386_v27, 7 }
 0x123   : > { %v7446_v42 = vmax.f32 %v978_v57, 0.0  ;;  %6084 = vrot.lane.b32.xlu1 %v6083_v63, %s9350_s12  ;;  %v7450_v59 = vsel %vm999_vm3, %v1001_v2, %v1003_v58  ;;  %v1000_v11 = vrot.slane %v7381_v19, 7  ;;  %v1568_v34 = vmul.f32 %v5962_v23, %v7430_v29 }
 0x124   : > { %v7456_v10 = vmax.f32 %v981_v12, 0.0  ;;  %v6098_v61 = vpack.i.bf16 %v1234_v32, %v1233_v38  ;;  %v7461_v36 = vsel %vm999_vm3, %v1003_v58, %v1005_v3  ;;  %v1303_v60 = vmul.f32 %v5921_v8, %v7450_v59 }
 0x125   : > { %v1304_v9 = vmul.f32 %v5922_v6, %v7461_v36  ;;  %v7470_v37 = vsel %vm999_vm3, %v1000_v11, %v1001_v2  ;;  %v7473_v23 = vsel %vm999_vm3, 0.0, %v1000_v11  ;;  %v1567_v63 = vmul.f32 %v5961_v24, %v7386_v27 }
 0x126   : > { %v6037_v57 = vunpack.i.h.bf16 %v6035_v41  ;;  %v7478_v16 = vmax.f32 %v973_v0, 0.0  ;;  %6094 = vrot.lane.b32.xlu0 %v6093_v22, %s9356_s7  ;;  %v1301_v40 = vmul.f32 %v5916_v5, %v7473_v23  ;;  %v1302_v6 = vmul.f32 %v5917_v4, %v7470_v37 }
 0x127   : > { %6104 = vrot.lane.b32.xlu1 %v6103_v62, %s9348_s11  ;;  %v6113_v8 = vpack.i.bf16 %v1304_v9, %v1303_v60  ;;  %v6133_v48 = vpack.i.bf16 %v1568_v34, %v1567_v63  ;;  %v1433_v24 = vmul.f32 %v5936_v14, %v1154_v47  ;;  %v1434_v21 = vmul.f32 %v5937_v13, %v1156_v15  ;;  %v6731_v9 = vld [vmem:[%s9418_s6] sm:$0xff]  }
 0x128   : > { %v6108_v22 = vpack.i.bf16 %v1302_v6, %v1301_v40  ;;  %v9408_v12 = vunpack.i.l.bf16 %v7290_v50  ;;  %v1147_v4 = vmul.f32 %v9409_v39, %v7430_v29  ;;  %v9410_v20 = vunpack.i.l.bf16 %v7280_v45  ;;  %5725 = vmatprep.subr.bf16.mxu0 %v6731_v9 }
 0x129   : > { %v6118_v32 = vpack.i.bf16 %v1434_v21, %v1433_v24  ;;  %v9411_v14 = vunpack.i.h.bf16 %v7280_v45  ;;  %v9412_v13 = vunpack.i.l.bf16 %v7319_v7  ;;  %v9413_v50 = vunpack.i.h.bf16 %v7319_v7  ;;  %5726 = vmatpush3.bf16.msra.mxu0 %v6731_v9 }
 0x12a   : > { %v1146_v5 = vmul.f32 %v9408_v12, %v7386_v27  ;;  %v7501_v35 = vmul.f32 %v9410_v20, %v7470_v37  ;;  %6099 = vrot.lane.b32.xlu0 %v6098_v61, %s9348_s11  ;;  %v9414_v0 = vunpack.i.l.bf16 %v7288_v49  ;;  %v9415_v45 = vunpack.i.h.bf16 %v7288_v49  ;;  %s9354_s11 = smov 64  }
 0x12b   : > { %v7506_v43 = vmul.f32 %v9411_v14, %v7450_v59  ;;  %v7511_v47 = vmul.f32 %v9412_v13, %v7446_v42  ;;  %v7516_v2 = vmul.f32 %v9413_v50, %v7456_v10  ;;  %v9416_v11 = vunpack.i.l.bf16 %v7294_v52  ;;  %6114 = vrot.lane.b32.xlu1 %v6113_v8, %s9346_s0 }
 0x12c   : > { %v6138_v58 = vpack.i.bf16 %v1147_v4, %v1146_v5  ;;  %v7521_v62 = vmul.f32 %v9414_v0, %v1156_v15  ;;  %v7526_v38 = vmul.f32 %v9415_v45, %v7418_v30  ;;  %v6036_v7 = vunpack.i.l.bf16 %v6035_v41 }
 0x12d   : > { %v7531_v34 = vmul.f32 %v9416_v11, %v7478_v16  ;;  %v6123_v61 = vpack.i.bf16 %v7506_v43, %v7501_v35  ;;  %v6143_v15 = vpack.i.bf16 %v7516_v2, %v7511_v47  ;;  %v9417_v49 = vunpack.i.h.bf16 %v7294_v52 }
 0x12e   : > { %v6128_v41 = vpack.i.bf16 %v7526_v38, %v7521_v62  ;;  %v9419_v63 = vunpack.i.l.bf16 %v7313_v1  ;;  %v9420_v6 = vunpack.i.h.bf16 %v7313_v1  ;;  %v1159_v52 = vrot.slane %v7430_v29, 1  ;;  %6109 = vrot.lane.b32.xlu0 %v6108_v22, %s9346_s0  ;;  %s9357_s0 = smov 48   ;;  %v6735_v62 = vld [vmem:[%s9418_s6 + $0x20] ss:$0 sps:$4 sm:$0xff]  }
 0x12f   : > { %v7541_v60 = vmul.f32 %v9417_v49, %v7446_v42  ;;  %v7562_v21 = vmul.f32 %v6036_v7, %v7478_v16  ;;  %v7565_v12 = vmul.f32 %v6037_v57, %v7446_v42  ;;  %v1007_v5 = vrot.slane %v7430_v29, 7  ;;  %6134 = vrot.lane.b32.xlu1 %v6133_v48, %s9356_s7 }
 0x130   : > { %v7551_v40 = vmul.f32 %v9419_v63, %v7430_v29  ;;  %v7556_v8 = vmul.f32 %v9420_v6, %v7478_v16  ;;  %v9421_v39 = vrot.slane %v7386_v27, 1  ;;  %v9422_v20 = vunpack.i.l.bf16 %v7278_v44 }
 0x131   : > { %v6148_v24 = vpack.i.bf16 %v7541_v60, %v7531_v34  ;;  %v1161_v57 = vrot.slane %v7478_v16, 1  ;;  %v9423_v14 = vunpack.i.h.bf16 %v7278_v44  ;;  %v7590_v13 = vsel %vm999_vm3, %v1005_v3, %v1007_v5  ;;  %v6732_v3 = vld [vmem:[%s9418_s6 + $0x8] sm:$0xff]  }
 0x132   : > { %v6153_v1 = vpack.i.bf16 %v7556_v8, %v7551_v40  ;;  %v1160_v4 = vsel %vm1151_vm2, %v9421_v39, %v1159_v52  ;;  %v7577_v35 = vmul.f32 %v9422_v20, %v7418_v30  ;;  %v9424_v30 = vunpack.i.l.bf16 %v7282_v46  ;;  %6119 = vrot.lane.b32.xlu0 %v6118_v32, %s6911_s9  ;;  %5727 = vmatprep.subr.bf16.mxu0 %v6732_v3 }
 0x133   : > { %v7583_v22 = vmul.f32 %v9423_v14, %v1160_v4  ;;  %v9425_v48 = vunpack.i.h.bf16 %v7282_v46  ;;  %v1162_v44 = vsel %vm1151_vm2, %v1159_v52, %v1161_v57  ;;  %v9426_v2 = vunpack.i.l.bf16 %v7292_v51  ;;  %6139 = vrot.lane.b32.xlu1 %v6138_v58, %s9350_s12  ;;  %5728 = vmatpush3.bf16.msra.mxu0 %v6732_v3 }
 0x134   : > { %v7595_v47 = vmul.f32 %v9424_v30, %v7461_v36  ;;  %v1163_v45 = vrot.slane %v7446_v42, 1  ;;  %v9427_v7 = vunpack.i.h.bf16 %v7292_v51  ;;  %v1165_v49 = vrot.slane %v7456_v10, 1 }
 0x135   : > { %v7600_v50 = vmul.f32 %v9425_v48, %v7590_v13  ;;  %v7605_v0 = vmul.f32 %v9426_v2, %v1160_v4  ;;  %v9428_v9 = vunpack.i.l.bf16 %v7296_v53  ;;  %v9429_v52 = vunpack.i.h.bf16 %v7296_v53  ;;  %v6045_v53 = vpop.permute.xlu0 %6044 }
 0x136   : > { %v7615_v46 = vmul.f32 %v9427_v7, %v1162_v44  ;;  %v1011_v51 = vrot.slane %v7446_v42, 7  ;;  %v1241_v20 = vrot.slane %v7456_v10, 7  ;;  %v1166_v14 = vsel %vm1151_vm2, %v1163_v45, %v1165_v49  ;;  %6124 = vrot.lane.b32.xlu0 %v6123_v61, %s9357_s0 }
 0x137   : > { %v7620_v63 = vmul.f32 %v9428_v9, %v1160_v4  ;;  %v7627_v39 = vmul.f32 %v9429_v52, %v1162_v44  ;;  %v7636_v32 = vsel %vm1151_vm2, %v1165_v49, 0.0  ;;  %v1009_v30 = vrot.slane %v7478_v16, 7  ;;  %6144 = vrot.lane.b32.xlu1 %v6143_v15, %s9352_s1  ;;  %v6734_v15 = vld [vmem:[%s9418_s6 + $0x18] sm:$0xff]  }
 0x138   : > { %v6183_v4 = vpack.i.bf16 %v7615_v46, %v7605_v0  ;;  %v9430_v48 = vunpack.i.l.bf16 %v7347_v33  ;;  %v9431_v7 = vunpack.i.h.bf16 %v7347_v33  ;;  %v1242_v0 = vsel %vm999_vm3, %v1011_v51, %v1241_v20  ;;  %v6733_v46 = vld [vmem:[%s9418_s6 + $0x10] sm:$0xff]   ;;  %s9452_s6 = sld [smem:[#allocation23_spill]] }
 0x139   : > { %v6188_v58 = vpack.i.bf16 %v7627_v39, %v7620_v63  ;;  %v6047_v49 = vunpack.i.h.bf16 %v6045_v53  ;;  %v1442_v3 = vsel %vm999_vm3, %v1241_v20, 0.0  ;;  %v1506_v52 = vmul.f32 %v6031_v31, %v1242_v0  ;;  %5729 = vmatprep.subr.bf16.mxu0 %v6733_v46 }
 0x13a   : > { %v1439_v2 = vmul.f32 %v9430_v48, %v1166_v14  ;;  %v1440_v9 = vmul.f32 %v9431_v7, %v7636_v32  ;;  %v7654_v48 = vsel %vm999_vm3, %v1007_v5, %v1009_v30  ;;  %v9432_v63 = vunpack.i.h.bf16 %v7379_v18  ;;  %5730 = vmatpush3.bf16.msra.mxu0 %v6733_v46  ;;  %6129 = vrot.lane.b32.xlu0 %v6128_v41, %s9354_s11 }
 0x13b   : > { %v9433_v7 = vunpack.i.l.bf16 %v7300_v55  ;;  %v9434_v20 = vunpack.i.h.bf16 %v7300_v55  ;;  %v1164_v31 = vsel %vm1151_vm2, %v1161_v57, %v1163_v45  ;;  %v9435_v5 = vunpack.i.h.bf16 %v7298_v54  ;;  %6149 = vrot.lane.b32.xlu1 %v6148_v24, %s9350_s12  ;;  %5731 = vmatprep.subr.bf16.mxu0 %v6734_v15  ;;  %s9368_s12 = smov 112  }
 0x13c   : > { %v6173_v33 = vpack.i.bf16 %v1440_v9, %v1439_v2  ;;  %v1507_v39 = vmul.f32 %v9432_v63, %v1442_v3  ;;  %v9436_v61 = vunpack.i.l.bf16 %v7341_v28  ;;  %v7672_v18 = vsel %vm999_vm3, %v1009_v30, %v1011_v51 }
 0x13d   : > { %v1305_v6 = vmul.f32 %v9433_v7, %v7590_v13  ;;  %v1306_v43 = vmul.f32 %v9434_v20, %v7654_v48  ;;  %v1240_v11 = vmul.f32 %v9435_v5, %v1166_v14  ;;  %v9437_v63 = vunpack.i.l.bf16 %v7298_v54 }
 0x13e   : > { %v1437_v2 = vmul.f32 %v9436_v61, %v1162_v44  ;;  %v6178_v9 = vpack.i.bf16 %v1507_v39, %v1506_v52  ;;  %v9438_v55 = vunpack.i.h.bf16 %v7341_v28  ;;  %v6046_v57 = vunpack.i.l.bf16 %v6045_v53  ;;  %5732 = vmatpush3.bf16.msra.mxu0 %v6734_v15  ;;  %6154 = vrot.lane.b32.xlu0 %v6153_v1, %s9352_s1  ;;  %s9453_s1 = sld [smem:[#allocation25_spill]] }
 0x13f   : > { %v6198_v3 = vpack.i.bf16 %v1306_v43, %v1305_v6  ;;  %v1239_v7 = vmul.f32 %v9437_v63, %v1164_v31  ;;  %v9439_v44 = vunpack.i.l.bf16 %v7302_v56  ;;  %v9440_v51 = vunpack.i.h.bf16 %v7302_v56  ;;  %5824 = vmatprep.subr.msk.bf16.mxu0 %vm2019_vm4, %v6735_v62 }
 0x140   : > { %v1438_v20 = vmul.f32 %v9438_v55, %v1164_v31  ;;  %v9441_v54 = vunpack.i.l.bf16 %v7372_v17  ;;  %v9442_v53 = vunpack.i.h.bf16 %v7372_v17  ;;  %v1635_v46 = vmul.f32 %v6047_v49, %v1166_v14 }
 0x141   : > { %v1307_v45 = vmul.f32 %v9439_v44, %v7672_v18  ;;  %v1308_v30 = vmul.f32 %v9440_v51, %v1242_v0  ;;  %v6193_v28 = vpack.i.bf16 %v1240_v11, %v1239_v7  ;;  %v1634_v0 = vmul.f32 %v6046_v57, %v1164_v31 }
 0x142   : > { %v1504_v43 = vmul.f32 %v9441_v54, %v7654_v48  ;;  %v6213_v6 = vpack.i.bf16 %v1438_v20, %v1437_v2  ;;  %v1505_v52 = vmul.f32 %v9442_v53, %v7672_v18  ;;  %v9443_v17 = vpack.i.bf16 %v7583_v22, %v7577_v35  ;;  %v6040_v35 = vpop.permute.xlu1 %6039 }
 0x143   : > { %v6203_v56 = vpack.i.bf16 %v1308_v30, %v1307_v45  ;;  %v6223_v38 = vpack.i.bf16 %v1635_v46, %v1634_v0  ;;  %v2589_v34 = vpack.c.bf16 %v7389_v26, %v7381_v19  ;;  %v2590_v60 = vpack.c.bf16 %v7386_v27, %v7374_v25  ;;  %v6747_v19 = vld [vmem:[%s9460_s15] sm:$0xff]   ;;  %v6748_v25 = vld [vmem:[%s9460_s15 + $0x8] sm:$0xff]  }
 0x144   : > { %v6218_v39 = vpack.i.bf16 %v1505_v52, %v1504_v43  ;;  %6164 = vrot.lane.b32.xlu1 %v9443_v17, %s6911_s9  ;;  %v2591_v41 = vpack.c.bf16 %v7478_v16, %v7430_v29  ;;  %v2021_v40 = vsel %vm2019_vm4, %v6735_v62, 0  ;;  %v2592_v8 = vpack.c.bf16 %v7456_v10, %v7446_v42 }
 0x145   : > { %5734 = vmatpush3.bf16.msra.mxu0 %v2021_v40  ;;  %v9444_v24 = vpack.i.bf16 %v7565_v12, %v7562_v21  ;;  %v9445_v1 = vpack.i.bf16 %v7600_v50, %v7595_v47  ;;  %v6042_v22 = vunpack.i.h.bf16 %v6040_v35  ;;  %v6041_v11 = vunpack.i.l.bf16 %v6040_v35 }
 0x146   : > { %v6050_v12 = vpop.permute.xlu1 %6049 }
 0x147   : > { %6159 = vrot.lane.b32.xlu0 %v9444_v24, %s9356_s7  ;;  %v1571_v21 = vmul.f32 %v6041_v11, %v7456_v10  ;;  %v1572_v47 = vmul.f32 0.0, %v6042_v22  ;;  %v6052_v50 = vunpack.i.h.bf16 %v6050_v12  ;;  %s9451_s7 = smov 64  }
 0x148   : > { %6169 = vrot.lane.b32.xlu1 %v9445_v1, %s9357_s0 }
 0x149   : > { %v6208_v49 = vpack.i.bf16 %v1572_v47, %v1571_v21  ;;  %v1637_v61 = vmul.f32 0.0, %v6052_v50  ;;  %v6055_v21 = vpop.permute.xlu0 %6054 }
 0x14b   : > { %6184 = vrot.lane.b32.xlu0 %v6183_v4, %s9354_s11  ;;  %v6051_v4 = vunpack.i.l.bf16 %v6050_v12  ;;  %s9448_s11 = sld [smem:[#allocation28_spill]]  ;;  %v6060_v12 = vpop.permute.xlu1 %6059 }
 0x14c   : > { %6174 = vrot.lane.b32.xlu1 %v6173_v33, %s6911_s9 }
 0x14d   : > { %v1636_v33 = vmul.f32 %v6051_v4, %v7636_v32  ;;  %v7770_v47 = vpop.permute.xlu0 %6064 }
 0x14f   : > { %6189 = vrot.lane.b32.xlu0 %v6188_v58, %s9446_s29  ;;  %v6228_v7 = vpack.i.bf16 %v1637_v61, %v1636_v33  ;;  %v7772_v50 = vpop.permute.xlu1 %6069 }
 0x150   : > { %6179 = vrot.lane.b32.xlu1 %v6178_v9, %s9357_s0  ;;  %s9458_s0 = sld [smem:[#allocation27_spill]] }
 0x151   : > { %v5620_v14 = vld [vmem:[%s9448_s11 + $0x8] sm:$0xff]   ;;  %v5621_v58 = vld [vmem:[%s9448_s11 + $0x10] sm:$0xff]   ;;  %v5623_v63 = vld [vmem:[%s9448_s11 + $0x20] sm:$0xff]  }
 0x152   : > { %v5375_v31 = vunpack.c.l.bf16 %v5620_v14  ;;  %v5376_v5 = vunpack.c.h.bf16 %v5620_v14  ;;  %v5379_v2 = vunpack.c.l.bf16 %v5621_v58  ;;  %v5380_v9 = vunpack.c.h.bf16 %v5621_v58  ;;  %v5624_v45 = vld [vmem:[%s9448_s11 + $0x28] sm:$0xff]   ;;  %v5625_v51 = vld [vmem:[%s9448_s11 + $0x30] sm:$0xff]   ;;  %v5626_v52 = vld [vmem:[%s9448_s11 + $0x38] sm:$0xff]  }
 0x153   : > { %6199 = vrot.lane.b32.xlu0 %v6198_v3, %s9447_s8  ;;  %v5622_v3 = vld [vmem:[%s9448_s11 + $0x18] sm:$0xff]   ;;  %v5387_v57 = vunpack.c.l.bf16 %v5623_v63  ;;  %v5388_v44 = vunpack.c.h.bf16 %v5623_v63  ;;  %v5391_v54 = vunpack.c.l.bf16 %v5624_v45  ;;  %v5392_v43 = vunpack.c.h.bf16 %v5624_v45  ;;  %v5627_v40 = vld [vmem:[%s9448_s11 + $0x40] sm:$0xff]  }
 0x154   : > { %6194 = vrot.lane.b32.xlu1 %v6193_v28, %s9446_s29  ;;  %v6233_v32 = vpack.i.bf16 %v5376_v5, %v5375_v31  ;;  %v5383_v55 = vunpack.c.l.bf16 %v5622_v3  ;;  %v5384_v20 = vunpack.c.h.bf16 %v5622_v3  ;;  %v6238_v15 = vpack.i.bf16 %v5380_v9, %v5379_v2 }
 0x155   : > { %v6248_v28 = vpack.i.bf16 %v5388_v44, %v5387_v57  ;;  %v5396_v53 = vunpack.c.h.bf16 %v5625_v51  ;;  %v6253_v0 = vpack.i.bf16 %v5392_v43, %v5391_v54  ;;  %v5399_v46 = vunpack.c.l.bf16 %v5626_v52 }
 0x156   : > { %v6243_v30 = vpack.i.bf16 %v5384_v20, %v5383_v55  ;;  %v5403_v1 = vunpack.c.l.bf16 %v5627_v40  ;;  %v5404_v35 = vunpack.c.h.bf16 %v5627_v40  ;;  %v6056_v2 = vunpack.i.l.bf16 %v6055_v21 }
 0x157   : > { %6214 = vrot.lane.b32.xlu0 %v6213_v6, %s6911_s9  ;;  %s9450_s9 = smov 56   ;;  %v5395_v6 = vunpack.c.l.bf16 %v5625_v51  ;;  %v6057_v9 = vunpack.i.h.bf16 %v6055_v21 }
 0x158   : > { %6204 = vrot.lane.b32.xlu1 %v6203_v56, %s9447_s8  ;;  %v5370_v56 = vld [vmem:[%s9448_s11] sm:$0xff]   ;;  %v6273_v11 = vpack.i.bf16 %v5404_v35, %v5403_v1  ;;  %s8384_s8 = sand.u32 1, %s6895_s5  }
 0x159   : > { %v6258_v62 = vpack.i.bf16 %v5396_v53, %v5395_v6  ;;  %v5372_v17 = vunpack.c.h.bf16 %v5370_v56  ;;  %v1078_v57 = vmul.f32 %v6057_v9, %v7473_v23 }
 0x15b   : > { %6219 = vrot.lane.b32.xlu0 %v6218_v39, %s9449_s4  ;;  %v5400_v39 = vunpack.c.h.bf16 %v5626_v52 }
 0x15c   : > { %6209 = vrot.lane.b32.xlu1 %v6208_v49, %s9450_s9  ;;  %s9364_s9 = smov 80  }
 0x15d   : > { %v6263_v24 = vpack.i.bf16 %v5400_v39, %v5399_v46  ;;  %v6062_v39 = vunpack.i.h.bf16 %v6060_v12 }
 0x15f   : > { %6224 = vrot.lane.b32.xlu0 %v6223_v38, %s9451_s7  ;;  %v5371_v38 = vunpack.c.l.bf16 %v5370_v56 }
 0x160   : > { %6229 = vrot.lane.b32.xlu1 %v6228_v7, %s9451_s7 }
 0x161   : > { %v6268_v22 = vpack.i.bf16 %v5372_v17, %v5371_v38 }
 0x163   : > { %6234 = vperm.xlu0 %5891, %v6233_v32  }
 0x164   : > { %6239 = vperm.xlu1 %5902, %v6238_v15   ;;  %v1077_v15 = vmul.f32 0.0, %v6056_v2 }
 0x167   : > { %6244 = vperm.xlu0 %5891, %v6243_v30  }
 0x168   : > { %6249 = vperm.xlu1 %5902, %v6248_v28  }
 0x16b   : > { %6254 = vperm.xlu0 %5891, %v6253_v0  }
 0x16c   : > { %6259 = vperm.xlu1 %5902, %v6258_v62   ;;  %v6061_v62 = vunpack.i.l.bf16 %v6060_v12 }
 0x16f   : > { %6264 = vperm.xlu0 %5891, %v6263_v24  }
 0x170   : > { %6269 = vperm.xlu1 %5902, %v6268_v22   ;;  %v1080_v22 = vmul.f32 %v6062_v39, %v7450_v59 }
 0x173   : > { %6274 = vperm.xlu0 %5891, %v6273_v11  }
 0x190   : > { %v6075_v4 = vpop.permute.xlu0 %6074 }
 0x191   : > { %v7774_v14 = vpop.permute.xlu1 %6079  ;;  %v6077_v3 = vunpack.i.h.bf16 %v6075_v4  ;;  %v6076_v63 = vunpack.i.l.bf16 %v6075_v4  ;;  %v1079_v4 = vmul.f32 %v6061_v62, %v7470_v37 }
 0x193   : > { %v1895_v51 = vsel %vm1894_vm5, %v1077_v15, %v6076_v63  ;;  %v1896_v30 = vsel %vm1894_vm5, %v1078_v57, %v6077_v3 }
 0x194   : > { %v6090_v58 = vpop.permute.xlu0 %6089 }
 0x195   : > { %v7776_v49 = vpop.permute.xlu1 %6084  ;;  %v6092_v0 = vunpack.i.h.bf16 %v6090_v58  ;;  %v6091_v46 = vunpack.i.l.bf16 %v6090_v58 }
 0x196   : > { %v6087_v59 = vunpack.i.h.bf16 %v7776_v49  ;;  %v6086_v3 = vunpack.i.l.bf16 %v7776_v49 }
 0x198   : > { %v7778_v33 = vpop.permute.xlu0 %6094 }
 0x199   : > { %v7780_v31 = vpop.permute.xlu1 %6104  ;;  %v6096_v2 = vunpack.i.l.bf16 %v7778_v33 }
 0x19a   : > { %v6107_v37 = vunpack.i.h.bf16 %v7780_v31 }
 0x19c   : > { %v6100_v5 = vpop.permute.xlu0 %6099 }
 0x19d   : > { %v7782_v61 = vpop.permute.xlu1 %6114  ;;  %v6102_v32 = vunpack.i.h.bf16 %v6100_v5  ;;  %v6101_v55 = vunpack.i.l.bf16 %v6100_v5  ;;  %v6097_v5 = vunpack.i.h.bf16 %v7778_v33 }
 0x19e   : > { %v6117_v33 = vunpack.i.h.bf16 %v7782_v61 }
 0x19f   : > { %v1904_v43 = vsel %vm1903_vm6, %v1895_v51, %v6101_v55  ;;  %v1905_v28 = vsel %vm1903_vm6, %v1896_v30, %v6102_v32  ;;  %v6106_v55 = vunpack.i.l.bf16 %v7780_v31 }
 0x1a0   : > { %v6110_v7 = vpop.permute.xlu0 %6109 }
 0x1a1   : > { %v7784_v20 = vpop.permute.xlu1 %6134  ;;  %v6112_v44 = vunpack.i.h.bf16 %v6110_v7  ;;  %v6111_v45 = vunpack.i.l.bf16 %v6110_v7 }
 0x1a3   : > { %v1914_v53 = vsel %vm1912_vm7, %v1905_v28, %v6112_v44  ;;  %v1913_v52 = vsel %vm1912_vm7, %v1904_v43, %v6111_v45  ;;  %v6116_v44 = vunpack.i.l.bf16 %v7782_v61  ;;  %v1898_v43 = vsel %vm1894_vm5, %v1080_v22, %v6087_v59 }
 0x1a4   : > { %v6120_v54 = vpop.permute.xlu0 %6119  ;;  %v1922_v17 = vsel %vm1921_vm9, %v1913_v52, %v6091_v46  ;;  %v1923_v40 = vsel %vm1921_vm9, %v1914_v53, %v6092_v0  ;;  %v1907_v53 = vsel %vm1903_vm6, %v1898_v43, %v6107_v37  ;;  %v6082_v0 = vunpack.i.h.bf16 %v7774_v14 }
 0x1a5   : > { %v7791_v6 = vpop.permute.xlu1 %6139  ;;  %v6122_v23 = vunpack.i.h.bf16 %v6120_v54  ;;  %v6121_v56 = vunpack.i.l.bf16 %v6120_v54  ;;  %v1897_v54 = vsel %vm1894_vm5, %v1079_v4, %v6086_v3  ;;  %v1916_v52 = vsel %vm1912_vm7, %v1907_v53, %v6117_v33 }
 0x1a6   : > { %v1906_v28 = vsel %vm1903_vm6, %v1897_v54, %v6106_v55  ;;  %v6081_v46 = vunpack.i.l.bf16 %v7774_v14  ;;  %v6136_v22 = vunpack.i.l.bf16 %v7784_v20  ;;  %v6067_v55 = vunpack.i.h.bf16 %v7770_v47 }
 0x1a7   : > { %v1931_v11 = vsel %vm1930_vm8, %v1922_v17, %v6121_v56  ;;  %v1932_v21 = vsel %vm1930_vm8, %v1923_v40, %v6122_v23  ;;  %v1915_v61 = vsel %vm1912_vm7, %v1906_v28, %v6116_v44  ;;  %v1925_v17 = vsel %vm1921_vm9, %v1916_v52, %v6082_v0 }
 0x1a8   : > { %v6125_v38 = vpop.permute.xlu0 %6124  ;;  %v6141_v33 = vunpack.i.l.bf16 %v7791_v6  ;;  %v6072_v44 = vunpack.i.h.bf16 %v7772_v50  ;;  %v1082_v43 = vmul.f32 %v6067_v55, %v7590_v13 }
 0x1a9   : > { %v6127_v24 = vunpack.i.h.bf16 %v6125_v38  ;;  %v6126_v1 = vunpack.i.l.bf16 %v6125_v38  ;;  %v7797_v35 = vpop.permute.xlu1 %6144  ;;  %v1924_v38 = vsel %vm1921_vm9, %v1915_v61, %v6081_v46 }
 0x1ab   : > { %v1940_v12 = vsel %vm1939_vm10, %v1931_v11, %v6126_v1  ;;  %v1941_v58 = vsel %vm1939_vm10, %v1932_v21, %v6127_v24  ;;  %v6137_v1 = vunpack.i.h.bf16 %v7784_v20 }
 0x1ac   : > { %v6130_v9 = vpop.permute.xlu0 %6129  ;;  %v1949_v15 = vsel %vm1948_vm11, %v1940_v12, %v6096_v2  ;;  %v1950_v57 = vsel %vm1948_vm11, %v1941_v58, %v6097_v5 }
 0x1ad   : > { %v6132_v63 = vunpack.i.h.bf16 %v6130_v9  ;;  %v6131_v7 = vunpack.i.l.bf16 %v6130_v9  ;;  %v7809_v32 = vpop.permute.xlu1 %6149 }
 0x1af   : > { %v1958_v45 = vsel %vm1957_vm12, %v1949_v15, %v6131_v7  ;;  %v1959_v49 = vsel %vm1957_vm12, %v1950_v57, %v6132_v63  ;;  %v6066_v15 = vunpack.i.l.bf16 %v7770_v47  ;;  %v6142_v57 = vunpack.i.h.bf16 %v7791_v6 }
 0x1b0   : > { %v7819_v51 = vpop.permute.xlu0 %6154  ;;  %v1975_v30 = vpack.c.bf16 %v1959_v49, %v1958_v45  ;;  %v6071_v45 = vunpack.i.l.bf16 %v7772_v50  ;;  %v6152_v49 = vunpack.i.h.bf16 %v7809_v32  ;;  %v1084_v6 = vmul.f32 %v6072_v44, %v7672_v18 }
 0x1b1   : > { %v1081_v54 = vmul.f32 %v6066_v15, %v7461_v36  ;;  %v1900_v50 = vsel %vm1894_vm5, %v1082_v43, %v6142_v57  ;;  %v6146_v36 = vunpack.i.l.bf16 %v7797_v35  ;;  %v6156_v18 = vunpack.i.l.bf16 %v7819_v51 }
 0x1b2   : > { %5735 = vmatprep.mubr.msk.bf16.mxu0 %vm2006_vm13, %v1975_v30  ;;  %v6151_v30 = vunpack.i.l.bf16 %v7809_v32  ;;  %v1083_v53 = vmul.f32 %v6071_v45, %v7654_v48  ;;  %v6147_v32 = vunpack.i.h.bf16 %v7797_v35  ;;  %v1902_v13 = vsel %vm1894_vm5, %v1084_v6, %v6152_v49 }
 0x1b3   : > { %v6157_v48 = vunpack.i.h.bf16 %v7819_v51 }
 0x1b4   : > { %v1901_v0 = vsel %vm1894_vm5, %v1083_v53, %v6151_v30 }
 0x1b6   : > { %v6165_v31 = vpop.permute.xlu1 %6164 }
 0x1b7   : > { %v6167_v23 = vunpack.i.h.bf16 %v6165_v31  ;;  %v6166_v56 = vunpack.i.l.bf16 %v6165_v31 }
 0x1b9   : > { %v7830_v39 = vpop.permute.xlu0 %6159  ;;  %v1933_v11 = vsel %vm1930_vm8, %v1924_v38, %v6166_v56  ;;  %v1934_v21 = vsel %vm1930_vm8, %v1925_v17, %v6167_v23  ;;  %v1899_v56 = vsel %vm1894_vm5, %v1081_v54, %v6141_v33 }
 0x1ba   : > { %v6170_v62 = vpop.permute.xlu1 %6169 }
 0x1bb   : > { %v6172_v40 = vunpack.i.h.bf16 %v6170_v62  ;;  %v6171_v24 = vunpack.i.l.bf16 %v6170_v62 }
 0x1bd   : > { %v1942_v4 = vsel %vm1939_vm10, %v1933_v11, %v6171_v24  ;;  %v1943_v14 = vsel %vm1939_vm10, %v1934_v21, %v6172_v40  ;;  %v6185_v12 = vpop.permute.xlu0 %6184 }
 0x1be   : > { %v1952_v58 = vsel %vm1948_vm11, %v1943_v14, %v6137_v1  ;;  %v6187_v5 = vunpack.i.h.bf16 %v6185_v12  ;;  %v6186_v2 = vunpack.i.l.bf16 %v6185_v12  ;;  %v1951_v9 = vsel %vm1948_vm11, %v1942_v4, %v6136_v22  ;;  %v7842_v59 = vpop.permute.xlu1 %6174 }
 0x1bf   : > { %v6177_v24 = vunpack.i.h.bf16 %v7842_v59  ;;  %v6176_v1 = vunpack.i.l.bf16 %v7842_v59 }
 0x1c0   : > { %v1961_v3 = vsel %vm1957_vm12, %v1952_v58, %v6187_v5  ;;  %v1960_v20 = vsel %vm1957_vm12, %v1951_v9, %v6186_v2 }
 0x1c1   : > { %v1976_v63 = vpack.c.bf16 %v1961_v3, %v1960_v20  ;;  %v6190_v7 = vpop.permute.xlu0 %6189 }
 0x1c2   : > { %v7846_v37 = vpop.permute.xlu1 %6179  ;;  %v6192_v31 = vunpack.i.h.bf16 %v6190_v7  ;;  %v6191_v47 = vunpack.i.l.bf16 %v6190_v7 }
 0x1c3   : > { %5736 = vmatmul.mubr.msk.bf16.vlgmr.msra.gmra.mrb[8].mxu0 %vm2006_vm13, %v1976_v63  ;;  %v6182_v51 = vunpack.i.h.bf16 %v7846_v37  ;;  %v6181_v58 = vunpack.i.l.bf16 %v7846_v37 }
 0x1c4   : > { %v1909_v38 = vsel %vm1903_vm6, %v1900_v50, %v6192_v31  ;;  %v1908_v17 = vsel %vm1903_vm6, %v1899_v56, %v6191_v47  ;;  %v6162_v47 = vunpack.i.h.bf16 %v7830_v39 }
 0x1c5   : > { %v6200_v28 = vpop.permute.xlu0 %6199 }
 0x1c6   : > { %v6202_v61 = vunpack.i.h.bf16 %v6200_v28  ;;  %v6201_v52 = vunpack.i.l.bf16 %v6200_v28  ;;  %v6195_v23 = vpop.permute.xlu1 %6194  ;;  %v6161_v28 = vunpack.i.l.bf16 %v7830_v39 }
 0x1c7   : > { %v6197_v46 = vunpack.i.h.bf16 %v6195_v23  ;;  %v6196_v62 = vunpack.i.l.bf16 %v6195_v23 }
 0x1c8   : > { %v1917_v35 = vsel %vm1912_vm7, %v1908_v17, %v6201_v52  ;;  %v1918_v22 = vsel %vm1912_vm7, %v1909_v38, %v6202_v61 }
 0x1c9   : > { %v6215_v40 = vpop.permute.xlu0 %6214  ;;  %v1910_v5 = vsel %vm1903_vm6, %v1901_v0, %v6196_v62  ;;  %v1911_v2 = vsel %vm1903_vm6, %v1902_v13, %v6197_v46  ;;  %v1926_v9 = vsel %vm1921_vm9, %v1917_v35, %v6156_v18  ;;  %v1927_v59 = vsel %vm1921_vm9, %v1918_v22, %v6157_v48 }
 0x1ca   : > { %v6205_v11 = vpop.permute.xlu1 %6204  ;;  %v6217_v21 = vunpack.i.h.bf16 %v6215_v40  ;;  %v6216_v4 = vunpack.i.l.bf16 %v6215_v40  ;;  %v6914_v40 = vmov 0.0  }
 0x1cb   : > { %v6207_v14 = vunpack.i.h.bf16 %v6205_v11  ;;  %v6206_v12 = vunpack.i.l.bf16 %v6205_v11  ;;  %5743 = vmatprep.subr.bf16.mxu0 %v6914_v40 }
 0x1cc   : > { %v1935_v33 = vsel %vm1930_vm8, %v1926_v9, %v6216_v4  ;;  %v1936_v44 = vsel %vm1930_vm8, %v1927_v59, %v6217_v21  ;;  %v6737_v9 = vld [vmem:[%s9453_s1] sm:$0xff]   ;;  %v6738_v59 = vld [vmem:[%s9453_s1 + $0x8] sm:$0xff]  }
 0x1cd   : > { %v1919_v3 = vsel %vm1912_vm7, %v1910_v5, %v6206_v12  ;;  %v1920_v20 = vsel %vm1912_vm7, %v1911_v2, %v6207_v14  ;;  %v6220_v63 = vpop.permute.xlu0 %6219  ;;  %v6736_v2 = vld [vmem:[%s9452_s6] sm:$0xff]   ;;  %2495 = vmatpush1.bf16.msra.mxu1 %v6737_v9  ;;  %s9456_s6 = smov 32   ;;  %vm2408_vm7 = vcmask 654336  }
 0x1ce   : > { %v1928_v7 = vsel %vm1921_vm9, %v1919_v3, %v6146_v36  ;;  %v1929_v55 = vsel %vm1921_vm9, %v1920_v20, %v6147_v32  ;;  %v6222_v15 = vunpack.i.h.bf16 %v6220_v63  ;;  %v6221_v57 = vunpack.i.l.bf16 %v6220_v63  ;;  %v6210_v37 = vpop.permute.xlu1 %6209  ;;  %v6739_v20 = vld [vmem:[%s9453_s1 + $0x10] sm:$0xff]   ;;  %v6740_v63 = vld [vmem:[%s9453_s1 + $0x18] sm:$0xff]  }
 0x1cf   : > { %v1937_v45 = vsel %vm1930_vm8, %v1928_v7, %v6176_v1  ;;  %v1938_v49 = vsel %vm1930_vm8, %v1929_v55, %v6177_v24  ;;  %v6212_v43 = vunpack.i.h.bf16 %v6210_v37  ;;  %v6211_v31 = vunpack.i.l.bf16 %v6210_v37 }
 0x1d0   : > { %v1944_v30 = vsel %vm1939_vm10, %v1935_v33, %v6221_v57  ;;  %v1945_v54 = vsel %vm1939_vm10, %v1936_v44, %v6222_v15  ;;  %v1946_v53 = vsel %vm1939_vm10, %v1937_v45, %v6181_v58  ;;  %v1947_v6 = vsel %vm1939_vm10, %v1938_v49, %v6182_v51  ;;  %v5035_v44 = vld [vmem:[%s9455_s18] ss:$0 sm:$0xff]  ;;  %s4951_s18 = sshll.u32 %s8384_s8, 2 }
 0x1d1   : > { %v6225_v61 = vpop.permute.xlu0 %6224  ;;  %v1953_v56 = vsel %vm1948_vm11, %v1944_v30, %v6161_v28  ;;  %v1954_v32 = vsel %vm1948_vm11, %v1945_v54, %v6162_v47  ;;  %v1955_v0 = vsel %vm1948_vm11, %v1946_v53, %v6211_v31  ;;  %v1956_v46 = vsel %vm1948_vm11, %v1947_v6, %v6212_v43  ;;  %v6741_v45 = vld [vmem:[%s9453_s1 + $0x20] sm:$0xff]  }
 0x1d2   : > { %v6227_v52 = vunpack.i.h.bf16 %v6225_v61  ;;  %v6226_v23 = vunpack.i.l.bf16 %v6225_v61  ;;  %v6230_v50 = vpop.permute.xlu1 %6229  ;;  %v9454_v3 = vmov 0   ;;  %vm2411_vm8 = vcmask 785408  }
 0x1d3   : > { %v6232_v36 = vunpack.i.h.bf16 %v6230_v50  ;;  %v6231_v13 = vunpack.i.l.bf16 %v6230_v50  ;;  %2496 = vmatprep.subr.bf16.mxu1 %v9454_v3  ;;  %vm2414_vm11 = vcmask 916480  }
 0x1d4   : > { %v1962_v39 = vsel %vm1957_vm12, %v1953_v56, %v6226_v23  ;;  %v1963_v62 = vsel %vm1957_vm12, %v1954_v32, %v6227_v52  ;;  %2497 = vmatpush1.bf16.msra.mxu1 %v6738_v59  ;;  %v6743_v59 = vld [vmem:[%s9453_s1 + $0x30] sm:$0xff]  }
 0x1d5   : > { %v1964_v48 = vsel %vm1957_vm12, %v1955_v0, %v6231_v13  ;;  %v1965_v18 = vsel %vm1957_vm12, %v1956_v46, %v6232_v36  ;;  %v1977_v38 = vpack.c.bf16 %v1963_v62, %v1962_v39  ;;  %2498 = vmatprep.subr.bf16.mxu1 %v9454_v3  ;;  %v7966_v46 = vld [vmem:[%s9326_s23 + $0x2] sm:$0x3] }
 0x1d6   : > { %v1978_v17 = vpack.c.bf16 %v1965_v18, %v1964_v48 }
 0x1d7   : > { %5739 = vmatprep.mubr.msk.bf16.mxu0 %vm2006_vm13, %v1977_v38 }
 0x1d8   : > { %5740 = vmatmul.mubr.msk.bf16.gmra.mrb[12].mxu0 %vm2006_vm13, %v1978_v17  ;;  %2499 = vmatpush1.bf16.msra.mxu1 %v6739_v20 }
 0x1d9   : > { %5751 = vmatprep.mubr.msk.bf16.mxu0 %vm6915_vm14, %v6914_v40  ;;  %2500 = vmatprep.subr.bf16.mxu1 %v9454_v3 }
 0x1dc   : > { %2501 = vmatpush1.bf16.msra.mxu1 %v6740_v63 }
 0x1dd   : > { %2502 = vmatprep.subr.bf16.mxu1 %v9454_v3 }
 0x1e0   : > { %2503 = vmatpush1.bf16.msra.mxu1 %v6741_v45 }
 0x1e1   : > { %2504 = vmatprep.subr.bf16.mxu1 %v9454_v3 }
 0x1e2   : > { %v7934_v7 = vpop.permute.xlu0 %6234 }
 0x1e3   : > { %v7938_v15 = vpop.permute.xlu1 %6239  ;;  %v6237_v49 = vunpack.i.h.bf16 %v7934_v7  ;;  %v6236_v54 = vunpack.i.l.bf16 %v7934_v7 }
 0x1e4   : > { %v6242_v43 = vunpack.i.h.bf16 %v7938_v15  ;;  %v6241_v31 = vunpack.i.l.bf16 %v7938_v15 }
 0x1e6   : > { %v7936_v55 = vpop.permute.xlu0 %6244 }
 0x1e7   : > { %v6250_v37 = vpop.permute.xlu1 %6249  ;;  %v6247_v47 = vunpack.i.h.bf16 %v7936_v55  ;;  %v6246_v53 = vunpack.i.l.bf16 %v7936_v55 }
 0x1e8   : > { %v6252_v6 = vunpack.i.h.bf16 %v6250_v37  ;;  %v6251_v61 = vunpack.i.l.bf16 %v6250_v37 }
 0x1ea   : > { %v7940_v57 = vpop.permute.xlu0 %6254 }
 0x1eb   : > { %v7951_v30 = vpop.permute.xlu1 %6259  ;;  %v6257_v56 = vunpack.i.h.bf16 %v7940_v57  ;;  %v6256_v32 = vunpack.i.l.bf16 %v7940_v57 }
 0x1ec   : > { %v6262_v36 = vunpack.i.h.bf16 %v7951_v30  ;;  %v6261_v13 = vunpack.i.l.bf16 %v7951_v30 }
 0x1ee   : > { %v7942_v33 = vpop.permute.xlu0 %6264 }
 0x1ef   : > { %v6267_v39 = vunpack.i.h.bf16 %v7942_v33  ;;  %v6266_v62 = vunpack.i.l.bf16 %v7942_v33 }
 0x1f2   : > { %v6275_v52 = vpop.permute.xlu0 %6274 }
 0x1f3   : > { %v6277_v17 = vunpack.i.h.bf16 %v6275_v52 }
 0x296   : > { %v5737_v24 = vpop.f32.mrb[8].mxu0 }
 0x297   : > { %v2057_v1 = vpop.f32.mrb[9].mxu0 }
 0x298   : > { %v5738_v35 = vpop.f32.mrb[10].mxu0 }
 0x299   : > { %v2091_v22 = vpack.c.bf16 %v5738_v35, %v5737_v24  ;;  %v2060_v11 = vpop.f32.mrb[11].mxu0  ;;  %v6276_v24 = vunpack.i.l.bf16 %v6275_v52 }
 0x29a   : > { %v2090_v21 = vpack.c.bf16 %v2060_v11, %v2057_v1  ;;  %v6742_v1 = vld [vmem:[%s9453_s1 + $0x28] sm:$0xff]  }
 0x29b   : > { %2505 = vmatpush1.bf16.msra.mxu1 %v6742_v1 }
 0x29c   : > { %5744 = vmatpush3.bf16.msra.mxu0 %v2090_v21  ;;  %v2831_v21 = vunpack.c.l.bf16 %v7966_v46  ;;  %2506 = vmatprep.subr.bf16.mxu1 %v9454_v3 }
 0x29d   : > { %5745 = vmatprep.subr.bf16.mxu0 %v6914_v40 }
 0x29f   : > { %2507 = vmatpush1.bf16.msra.mxu1 %v6743_v59 }
 0x2a0   : > { %5746 = vmatpush3.bf16.msra.mxu0 %v2091_v22  ;;  %2508 = vmatprep.subr.bf16.mxu1 %v9454_v3 }
 0x2a1   : > { %5747 = vmatprep.subr.bf16.mxu0 %v6914_v40 }
 0x2ab   : > { %v5741_v4 = vpop.f32.mrb[12].mxu0 }
 0x2ac   : > { %v2073_v14 = vpop.f32.mrb[13].mxu0 }
 0x2ad   : > { %v5742_v12 = vpop.f32.mrb[14].mxu0 }
 0x2ae   : > { %v2093_v51 = vpack.c.bf16 %v5742_v12, %v5741_v4  ;;  %v2076_v58 = vpop.f32.mrb[15].mxu0 }
 0x2af   : > { %v2092_v5 = vpack.c.bf16 %v2076_v58, %v2073_v14 }
 0x2b1   : > { %5748 = vmatpush3.bf16.msra.mxu0 %v2092_v5 }
 0x2b2   : > { %5749 = vmatprep.subr.bf16.mxu0 %v6914_v40 }
 0x2b5   : > { %5750 = vmatpush3.bf16.msra.mxu0 %v2093_v51 }
 0x2b6   : > { %5755 = vmatprep.subr.bf16.mxu0 %v6914_v40 }
 0x2b8   : > { %5752 = vmatmul.mubr.msk.bf16.vlgmr.msra.gmra.mrb[16].mxu0 %vm1957_vm12, %v6736_v2 }
 0x2b9   : > { %5757 = vmatprep.mubr.msk.bf16.mxu0 %vm6915_vm14, %v6914_v40 }
 0x38b   : > { %v2143_v28 = vpop.f32.mrb[16].mxu0 }
 0x38c   : > { %v2144_v23 = vadd.f32 %v5035_v44, %v2143_v28  ;;  %v5753_v50 = vpop.f32.mrb[17].mxu0 }
 0x38d   : > { %v2146_v0 = vpop.f32.mrb[18].mxu0 }
 0x38e   : > { %v7970_v48 = vmax.f32 %v2144_v23, 0.0  ;;  %v2147_v18 = vadd.f32 %v5035_v44, %v2146_v0  ;;  %v5754_v38 = vpop.f32.mrb[19].mxu0 }
 0x390   : > { %v7975_v35 = vmax.f32 %v2147_v18, 0.0  ;;  %v2201_v22 = vrot.slane %v7970_v48, 5  ;;  %v2177_v11 = vrot.slane %v7970_v48, 4  ;;  %v2262_v4 = vmul.f32 %v6251_v61, %v7970_v48 }
 0x391   : > { %v2224_v14 = vrot.slane %v7970_v48, 7  ;;  %v2155_v12 = vrot.slane %v7970_v48, 3  ;;  %v2264_v51 = vrot.slane %v7970_v48, 1 }
 0x392   : > { %v2263_v58 = vmul.f32 %v6252_v6, %v7975_v35  ;;  %v2202_v5 = vrot.slane %v7975_v35, 5  ;;  %v2178_v2 = vrot.slane %v7975_v35, 4  ;;  %v2182_v9 = vsel %vm2019_vm4, 0.0, %v2177_v11 }
 0x393   : > { %v2198_v20 = vmul.f32 %v6236_v54, %v2182_v9  ;;  %v2206_v63 = vsel %vm2200_vm15, 0.0, %v2201_v22  ;;  %v2225_v7 = vrot.slane %v7975_v35, 7  ;;  %v2229_v55 = vsel %vm999_vm3, 0.0, %v2224_v14 }
 0x394   : > { %v6278_v15 = vpack.i.bf16 %v2263_v58, %v2262_v4  ;;  %v2203_v37 = vsel %vm2200_vm15, %v2201_v22, %v2202_v5  ;;  %v2326_v44 = vsel %vm2200_vm15, %v2202_v5, 0.0  ;;  %v2179_v45 = vsel %vm2019_vm4, %v2177_v11, %v2178_v2 }
 0x395   : > { %v2223_v30 = vmul.f32 %v6242_v43, %v2203_v37  ;;  %v2342_v28 = vmul.f32 %v6276_v24, %v2203_v37  ;;  %v2343_v6 = vmul.f32 %v6277_v17, %v2326_v44  ;;  %v2199_v61 = vmul.f32 %v6237_v49, %v2179_v45  ;;  %v5079_v49 = vld [vmem:[%s9326_s23 + $0x4] sm:$0x3]  ;;  %v6744_v43 = vld [vmem:[%s9453_s1 + $0x38] sm:$0xff]  }
 0x396   : > { %6279 = vrot.lane.b32.xlu0 %v6278_v15, %s9451_s7  ;;  %v2222_v54 = vmul.f32 %v6241_v31, %v2206_v63  ;;  %v2226_v52 = vsel %vm999_vm3, %v2224_v14, %v2225_v7  ;;  %v2245_v23 = vmul.f32 %v6246_v53, %v2229_v55  ;;  %v2156_v50 = vrot.slane %v7975_v35, 3  ;;  %2509 = vmatpush1.bf16.msra.mxu1 %v6744_v43  ;;  %v5081_v63 = vld [vmem:[%s9326_s23 + $0x8] sm:$0x3]  ;;  %v2811_v15 = vld [vmem:[%s9326_s23] sm:$0x3] }
 0x397   : > { %v2436_v0 = vpack.c.bf16 %v2343_v6, %v2342_v28  ;;  %v6283_v18 = vpack.i.bf16 %v2199_v61, %v2198_v20  ;;  %v2246_v38 = vmul.f32 %v6247_v47, %v2226_v52  ;;  %v2265_v1 = vrot.slane %v7975_v35, 1  ;;  %2510 = vmatprep.subr.bf16.mxu1 %v9454_v3  ;;  %v5080_v20 = vld [vmem:[%s9326_s23 + $0x6] sm:$0x3]  ;;  %v5085_v28 = vld [vmem:[%s9326_s23 + $0x10] sm:$0x3]  ;;  %v6270_v61 = vpop.permute.xlu1 %6269 }
 0x398   : > { %v6288_v31 = vpack.i.bf16 %v2223_v30, %v2222_v54  ;;  %v2157_v53 = vsel %vm2154_vm1, %v2155_v12, %v2156_v50  ;;  %v2288_v17 = vsel %vm2154_vm1, %v2156_v50, 0.0  ;;  %v2307_v24 = vsel %vm2019_vm4, %v2178_v2, 0.0 }
 0x399   : > { %5063 = vmatprep.mubr.msk.bf16.mxu1 %vm1903_vm6, %v2436_v0  ;;  %6284 = vrot.lane.b32.xlu1 %v6283_v18, %s9446_s29  ;;  %v6293_v47 = vpack.i.bf16 %v2246_v38, %v2245_v23  ;;  %v2304_v22 = vmul.f32 %v6261_v13, %v2157_v53  ;;  %v2305_v11 = vmul.f32 %v6262_v36, %v2288_v17  ;;  %v2269_v4 = vsel %vm1151_vm2, %v2265_v1, 0.0  ;;  %v5082_v13 = vld [vmem:[%s9326_s23 + $0xa] sm:$0x3] }
 0x39a   : > { %6289 = vrot.lane.b32.xlu0 %v6288_v31, %s9456_s6  ;;  %v2266_v14 = vsel %vm1151_vm2, %v2264_v51, %v2265_v1  ;;  %v2286_v58 = vmul.f32 %v6257_v56, %v2269_v4  ;;  %v2850_v5 = vunpack.c.l.bf16 %v5079_v49  ;;  %v2323_v2 = vmul.f32 %v6266_v62, %v2179_v45  ;;  %v5083_v51 = vld [vmem:[%s9326_s23 + $0xc] sm:$0x3]  ;;  %v6745_v56 = vld [vmem:[%s9453_s1 + $0x40] sm:$0xff]   ;;  %v5084_v45 = vld [vmem:[%s9326_s23 + $0xe] sm:$0x3] }
 0x39b   : > { %v6303_v9 = vpack.i.bf16 %v2305_v11, %v2304_v22  ;;  %v2285_v59 = vmul.f32 %v6256_v32, %v2266_v14  ;;  %v2324_v36 = vmul.f32 %v6267_v39, %v2307_v24  ;;  %v2901_v39 = vunpack.c.l.bf16 %v5082_v13  ;;  %2511 = vmatpush1.bf16.msra.mxu1 %v6745_v56 }
 0x39c   : > { %v6313_v32 = vpack.i.bf16 %v2850_v5, %v2831_v21  ;;  %v2917_v62 = vunpack.c.l.bf16 %v5083_v51  ;;  %v2682_v7 = vpack.c.bf16 %v7975_v35, %v7970_v48  ;;  %5777 = vmatprep.subr.bf16.mxu1 %v6914_v40  ;;  %v2866_v46 = vunpack.c.l.bf16 %v5080_v20  ;;  %v6751_v48 = vld [vmem:[%s9324_s21 + $0x10] sm:$0xff]   ;;  %v6752_v35 = vld [vmem:[%s9324_s21 + $0x18] sm:$0xff]  }
 0x39d   : > { %6294 = vrot.lane.b32.xlu1 %v6293_v47, %s9449_s4  ;;  %v6298_v57 = vpack.i.bf16 %v2286_v58, %v2285_v59  ;;  %v6308_v33 = vpack.i.bf16 %v2324_v36, %v2323_v2  ;;  %v2882_v21 = vunpack.c.l.bf16 %v5081_v63  ;;  %v2812_v44 = vunpack.c.l.bf16 %v2811_v15 }
 0x39e   : > { %6304 = vrot.lane.b32.xlu0 %v6303_v9, %s9366_s30  ;;  %v6323_v55 = vpack.i.bf16 %v2917_v62, %v2901_v39  ;;  %v2936_v30 = vunpack.c.l.bf16 %v5084_v45  ;;  %v2955_v6 = vunpack.c.l.bf16 %v5085_v28  ;;  %v2160_v52 = vsel %vm2154_vm1, 0.0, %v2155_v12  ;;  %s8396_s30 = scalar_lea.vmem [#allocation6], %s4951_s18 }
 0x39f   : > { %v6318_v37 = vpack.i.bf16 %v2882_v21, %v2866_v46  ;;  %v6272_v23 = vunpack.i.h.bf16 %v6270_v61  ;;  %v6271_v50 = vunpack.i.l.bf16 %v6270_v61  ;;  %v2588_v61 = vld [vmem:[%s9457_s26] sm:$0xf]  ;;  %s9463_s26 = smov 96  }
 0x3a1   : > { %6299 = vrot.lane.b32.xlu1 %v6298_v57, %s9364_s9  ;;  %v2176_v18 = vmul.f32 %v6272_v23, %v2157_v53  ;;  %v2175_v38 = vmul.f32 %v6271_v50, %v2160_v52  ;;  %v2613_v52 = vsel %vm2019_vm4, %v2588_v61, 0  ;;  %v6746_v23 = vld [vmem:[%s9459_s13] sm:$0xff]   ;;  %s6920_s9 = smov [#allocation4]  }
 0x3a2   : > { %6314 = vperm.xlu0 %5891, %v6313_v32  }
 0x3a5   : > { %6309 = vrot.lane.b32.xlu1 %v6308_v33, %s9368_s12  ;;  %s9461_s12 = sld [smem:[#allocation26_spill]] }
 0x3a6   : > { %6324 = vperm.xlu0 %5891, %v6323_v55  }
 0x3a9   : > { %6319 = vperm.xlu1 %5902, %v6318_v37  }
 0x3aa   : > { %2815 = vperm.xlu0 %5891, %v2812_v44  }
 0x3ab   : > { %v5064_v27 = vld [vmem:[%s9461_s12] ss:$0 sm:$0xff]  ;;  %s9464_s12 = smov 80  }
 0x3ad   : > { %2939 = vperm.xlu1 %5902, %v2936_v30  }
 0x3b1   : > { %2958 = vperm.xlu1 %5902, %v2955_v6  }
 0x408   : > { %v6280_v54 = vpop.permute.xlu0 %6279 }
 0x409   : > { %v6282_v5 = vunpack.i.h.bf16 %v6280_v54  ;;  %v6281_v2 = vunpack.i.l.bf16 %v6280_v54  ;;  %v2535_v54 = vld [vmem:[%s9458_s0] sm:$0x3]  ;;  %s9465_s0 = smov 112  }
 0x40b   : > { %v6285_v0 = vpop.permute.xlu1 %6284 }
 0x40c   : > { %v6287_v1 = vunpack.i.h.bf16 %v6285_v0  ;;  %v6286_v49 = vunpack.i.l.bf16 %v6285_v0  ;;  %v6290_v43 = vpop.permute.xlu0 %6289  ;;  %v6919_v0 = vmov 839922192  }
 0x40d   : > { %v6292_v31 = vunpack.i.h.bf16 %v6290_v43  ;;  %v6291_v17 = vunpack.i.l.bf16 %v6290_v43 }
 0x40e   : > { %v2400_v24 = vsel %vm1903_vm6, %v2175_v38, %v6286_v49  ;;  %v2401_v47 = vsel %vm1903_vm6, %v2176_v18, %v6287_v1  ;;  %v2819_v18 = vunpack.c.l.s4 %v6919_v0  ;;  %v2821_v38 = vlaneseq  ;;  %v6754_v1 = vld [vmem:[%s9324_s21 + $0x28] sm:$0xff]  }
 0x40f   : > { %v6295_v22 = vpop.permute.xlu1 %6294  ;;  %v2402_v14 = vsel %vm1921_vm9, %v2400_v24, %v6291_v17  ;;  %v2403_v12 = vsel %vm1921_vm9, %v2401_v47, %v6292_v31  ;;  %v6755_v24 = vld [vmem:[%s9324_s21 + $0x30] sm:$0xff]  }
 0x410   : > { %v6297_v11 = vunpack.i.h.bf16 %v6295_v22  ;;  %v6296_v4 = vunpack.i.l.bf16 %v6295_v22  ;;  %v6305_v59 = vpop.permute.xlu0 %6304  ;;  %v2820_v43 = vunpack.c.0.s8 %v2819_v18  ;;  %v2822_v31 = vshrl.u32 %v2821_v38, 7  ;;  %v5631_v18 = vld [vmem:[%s9448_s11 + $0x20] sm:$0xff]  }
 0x411   : > { %v6307_v32 = vunpack.i.h.bf16 %v6305_v59  ;;  %v6306_v39 = vunpack.i.l.bf16 %v6305_v59 }
 0x412   : > { %v2404_v58 = vsel %vm1939_vm10, %v2402_v14, %v6296_v4  ;;  %v2405_v53 = vsel %vm1939_vm10, %v2403_v12, %v6297_v11  ;;  %v8157_v22 = vsub.s32 %v2820_v43, %v2822_v31  ;;  %v5074_v12 = vld [vmem:[%s9462_s16] ss:$0 sm:$0xff]  ;;  %s9468_s16 = sld [smem:[#allocation30_spill]] }
 0x413   : > { %v6300_v9 = vpop.permute.xlu1 %6299  ;;  %v2406_v51 = vsel %vm1957_vm12, %v2404_v58, %v6281_v2  ;;  %v2407_v56 = vsel %vm1957_vm12, %v2405_v53, %v6282_v5  ;;  %v6756_v58 = vld [vmem:[%s9324_s21 + $0x38] sm:$0xff]  }
 0x414   : > { %v6302_v36 = vunpack.i.h.bf16 %v6300_v9  ;;  %v6301_v13 = vunpack.i.l.bf16 %v6300_v9 }
 0x416   : > { %v2409_v57 = vsel %vm2408_vm7, %v2406_v51, %v6301_v13  ;;  %v2410_v33 = vsel %vm2408_vm7, %v2407_v56, %v6302_v36 }
 0x417   : > { %v6310_v62 = vpop.permute.xlu1 %6309  ;;  %v2412_v46 = vsel %vm2411_vm8, %v2409_v57, %v6306_v39  ;;  %v2413_v21 = vsel %vm2411_vm8, %v2410_v33, %v6307_v32 }
 0x418   : > { %v6312_v20 = vunpack.i.h.bf16 %v6310_v62  ;;  %v6311_v63 = vunpack.i.l.bf16 %v6310_v62  ;;  %v6757_v62 = vld [vmem:[%s9324_s21 + $0x40] sm:$0xff]  }
 0x41a   : > { %v2415_v55 = vsel %vm2414_vm11, %v2412_v46, %v6311_v63  ;;  %v2416_v15 = vsel %vm2414_vm11, %v2413_v21, %v6312_v20 }
 0x41b   : > { %v2435_v37 = vpack.c.bf16 %v2416_v15, %v2415_v55 }
 0x41d   : > { %2527 = vmatmul.mubr.bf16.vlgmr.msra.gmra.mrb[0].mxu1 %v2435_v37 }
 0x41e   : > { %5781 = vmatprep.mubr.msk.bf16.mxu1 %vm6915_vm14, %v6914_v40  ;;  %5778 = vmatpush3.bf16.msra.mxu1 %v6747_v19 }
 0x41f   : > { %5779 = vmatprep.subr.bf16.mxu1 %v6914_v40 }
 0x421   : > { %v6315_v49 = vpop.permute.xlu0 %6314 }
 0x422   : > { %5780 = vmatpush3.bf16.msra.mxu1 %v6748_v25  ;;  %v6317_v11 = vunpack.i.h.bf16 %v6315_v49  ;;  %v6316_v4 = vunpack.i.l.bf16 %v6315_v49 }
 0x423   : > { %3524 = vmatprep.subr.bf16.mxu1 %v9454_v3 }
 0x424   : > { %v2862_v36 = vrot.slane %v6317_v11, %v8157_v22  ;;  %v2843_v13 = vrot.slane %v6316_v4, %v8157_v22  ;;  %v5630_v11 = vld [vmem:[%s9448_s11 + $0x18] sm:$0xff]  }
 0x425   : > { %v6325_v14 = vpop.permute.xlu0 %6324 }
 0x426   : > { %v6327_v15 = vunpack.i.h.bf16 %v6325_v14 }
 0x428   : > { %v6320_v50 = vpop.permute.xlu1 %6319 }
 0x429   : > { %v6322_v47 = vunpack.i.h.bf16 %v6320_v50  ;;  %v6321_v20 = vunpack.i.l.bf16 %v6320_v50  ;;  %v2816_v63 = vpop.permute.xlu0 %2815  ;;  %v5628_v50 = vld [vmem:[%s9448_s11 + $0x8] sm:$0xff]  }
 0x42a   : > { %v5411_v49 = vunpack.c.l.bf16 %v5628_v50  ;;  %v5412_v43 = vunpack.c.h.bf16 %v5628_v50  ;;  %v5655_v50 = vld [vmem:[%s9405_s10 + $0xa0] sm:$0xff]  }
 0x42b   : > { %v2894_v5 = vrot.slane %v6322_v47, %v8157_v22  ;;  %v2878_v19 = vrot.slane %v6321_v20, %v8157_v22  ;;  %v5424_v47 = vunpack.c.h.bf16 %v5631_v18 }
 0x42c   : > { %v8151_v17 = vpop.permute.xlu1 %2939 }
 0x430   : > { %v2959_v2 = vpop.permute.xlu1 %2958 }
 0x431   : > { %v2967_v46 = vrot.slane %v2959_v2, %v8157_v22  ;;  %v5632_v2 = vld [vmem:[%s9448_s11 + $0x28] sm:$0xff]  }
 0x4f0   : > { %v2528_v44 = vpop.f32.mrb[0].mxu1 }
 0x4f1   : > { %v2530_v45 = vpop.f32.mrb[1].mxu1 }
 0x4f2   : > { %v2531_v30 = vpop.f32.mrb[2].mxu1 }
 0x4f3   : > { %v2536_v28 = vpack.c.bf16 %v2531_v30, %v2528_v44  ;;  %v2533_v6 = vpop.f32.mrb[3].mxu1 }
 0x4f5   : > { %5756 = vmatpush3.bf16.msra.mxu0 %v2536_v28 }
 0x4f6   : > { %5825 = vmatprep.subr.msk.bf16.mxu0 %vm2019_vm4, %v2588_v61  ;;  %v5406_v61 = vld [vmem:[%s9448_s11] sm:$0xff]  }
 0x4f8   : > { %5758 = vmatmul.mubr.msk.bf16.vlgmr.msra.gmra.mrb[20].mxu0 %vm1903_vm6, %v2535_v54  ;;  %v2824_v54 = vrot.slane %v2816_v63, %v8157_v22 }
 0x4f9   : > { %5763 = vmatprep.mubr.msk.bf16.mxu0 %vm1894_vm5, %v2589_v34  ;;  %5762 = vmatpush3.bf16.msra.mxu0 %v2613_v52 }
 0x4fa   : > { %5771 = vmatprep.subr.bf16.mxu0 %v6914_v40 }
 0x500   : > { %5764 = vmatmul.mubr.msk.bf16.vlgmr.msra.gmra.mrb[24].mxu0 %vm1894_vm5, %v2590_v60 }
 0x501   : > { %5767 = vmatprep.mubr.msk.bf16.mxu0 %vm1894_vm5, %v2591_v41  ;;  %5772 = vmatpush3.bf16.msra.mxu0 %v6746_v23  ;;  %v6749_v41 = vld [vmem:[%s9324_s21] sm:$0xff]   ;;  %v6326_v23 = vunpack.i.l.bf16 %v6325_v14  ;;  %v5633_v14 = vld [vmem:[%s9448_s11 + $0x30] sm:$0xff]  }
 0x502   : > { %3088 = vmatprep.subr.bf16.mxu0 %v9454_v3 }
 0x508   : > { %5768 = vmatmul.mubr.msk.bf16.gmra.mrb[28].mxu0 %vm1894_vm5, %v2592_v8  ;;  %v6750_v8 = vld [vmem:[%s9324_s21 + $0x8] sm:$0xff]   ;;  %vm3138_vm5 = vcmask 31744  }
 0x509   : > { %5773 = vmatprep.mubr.msk.bf16.mxu0 %vm6915_vm14, %v6914_v40 }
 0x510   : > { %5774 = vmatmul.mubr.msk.bf16.vlgmr.msra.gmra.mrb[32].mxu0 %vm1903_vm6, %v2682_v7  ;;  %v6753_v7 = vld [vmem:[%s9324_s21 + $0x20] sm:$0xff]  }
 0x511   : > { %3089 = vmatpush1.bf16.msra.mxu0 %v6749_v41 }
 0x512   : > { %3090 = vmatprep.subr.bf16.mxu0 %v9454_v3 }
 0x515   : > { %3091 = vmatpush1.bf16.msra.mxu0 %v6750_v8  ;;  %v2913_v8 = vrot.slane %v6326_v23, %v8157_v22  ;;  %v5643_v23 = vld [vmem:[%s9405_s10 + $0x40] sm:$0xff]  }
 0x516   : > { %3092 = vmatprep.subr.bf16.mxu0 %v9454_v3 }
 0x519   : > { %3093 = vmatpush1.bf16.msra.mxu0 %v6751_v48 }
 0x51a   : > { %3094 = vmatprep.subr.bf16.mxu0 %v9454_v3 }
 0x51d   : > { %3095 = vmatpush1.bf16.msra.mxu0 %v6752_v35 }
 0x51e   : > { %3096 = vmatprep.subr.bf16.mxu0 %v9454_v3 }
 0x521   : > { %3097 = vmatpush1.bf16.msra.mxu0 %v6753_v7 }
 0x522   : > { %3098 = vmatprep.subr.bf16.mxu0 %v9454_v3 }
 0x525   : > { %3099 = vmatpush1.bf16.msra.mxu0 %v6754_v1  ;;  %v2948_v1 = vrot.slane %v8151_v17, %v8157_v22  ;;  %v6333_v17 = vpack.i.bf16 %v5412_v43, %v5411_v49  ;;  %v5524_v43 = vunpack.c.h.bf16 %v5655_v50 }
 0x526   : > { %3100 = vmatprep.subr.bf16.mxu0 %v9454_v3 }
 0x529   : > { %3101 = vmatpush1.bf16.msra.mxu0 %v6755_v24  ;;  %v5423_v24 = vunpack.c.l.bf16 %v5631_v18 }
 0x52a   : > { %3102 = vmatprep.subr.bf16.mxu0 %v9454_v3 }
 0x52d   : > { %3103 = vmatpush1.bf16.msra.mxu0 %v6756_v58  ;;  %v6348_v58 = vpack.i.bf16 %v5424_v47, %v5423_v24  ;;  %v5663_v24 = vld [vmem:[%s9405_s10 + $0xe0] sm:$0xff]   ;;  %v5640_v47 = vld [vmem:[%s9405_s10 + $0x28] sm:$0xff]  }
 0x52e   : > { %3104 = vmatprep.subr.bf16.mxu0 %v9454_v3 }
 0x531   : > { %3105 = vmatpush1.bf16.msra.mxu0 %v6757_v62 }
 0x532   : > { %5785 = vmatprep.subr.bf16.mxu0 %v6914_v40 }
 0x5cb   : > { %v2581_v29 = vpop.f32.mrb[20].mxu0 }
 0x5cc   : > { %v2582_v26 = vadd.f32 %v5064_v27, %v2581_v29  ;;  %v5759_v42 = vpop.f32.mrb[21].mxu0  ;;  %v2929_v29 = vrot.slane %v6327_v15, %v8157_v22  ;;  %v5419_v22 = vunpack.c.l.bf16 %v5630_v11  ;;  %v5636_v15 = vld [vmem:[%s9405_s10 + $0x8] sm:$0xff]  }
 0x5cd   : > { %v2584_v10 = vpop.f32.mrb[22].mxu0  ;;  %v5408_v42 = vunpack.c.h.bf16 %v5406_v61 }
 0x5ce   : > { %v2587_v16 = vmax.f32 %v2582_v26, 0.0  ;;  %v5760_v34 = vpop.f32.mrb[23].mxu0  ;;  %v5407_v26 = vunpack.c.l.bf16 %v5406_v61 }
 0x5cf   : > { %v5629_v34 = vld [vmem:[%s9448_s11 + $0x10] sm:$0xff]  }
 0x5d0   : > { %v2744_v60 = vpack.c.bf16 %v2587_v16, %v2587_v16  ;;  %v6328_v48 = vpack.i.bf16 %v5408_v42, %v5407_v26  ;;  %v5415_v35 = vunpack.c.l.bf16 %v5629_v34  ;;  %v5416_v7 = vunpack.c.h.bf16 %v5629_v34  ;;  %v5651_v34 = vld [vmem:[%s9405_s10 + $0x80] sm:$0xff]  }
 0x5d1   : > { %v5475_v42 = vunpack.c.l.bf16 %v5643_v23 }
 0x5d2   : > { %5782 = vmatmul.mubr.msk.bf16.vlgmr.msra.gmra.mrb[4].mxu1 %vm1921_vm9, %v2744_v60  ;;  %v6338_v31 = vpack.i.bf16 %v5416_v7, %v5415_v35  ;;  %v5507_v7 = vunpack.c.l.bf16 %v5651_v34 }
 0x6a5   : > { %v2801_v53 = vpop.f32.mrb[4].mxu1 }
 0x6a6   : > { %v8167_v9 = vadd.f32 %v5074_v12, %v2801_v53  ;;  %v5783_v59 = vpop.f32.mrb[5].mxu1  ;;  %v5420_v12 = vunpack.c.h.bf16 %v5630_v11  ;;  %v5431_v53 = vunpack.c.l.bf16 %v5633_v14 }
 0x6a7   : > { %v2804_v51 = vpop.f32.mrb[6].mxu1  ;;  %v5635_v59 = vld [vmem:[%s9448_s11 + $0x40] sm:$0xff]  }
 0x6a8   : > { %v5784_v56 = vpop.f32.mrb[7].mxu1  ;;  %v2895_v57 = vmul.f32 %v2894_v5, %v8167_v9  ;;  %v2826_v33 = vrot.slane %v8167_v9, 6  ;;  %v2845_v32 = vrot.slane %v8167_v9, 7  ;;  %v2950_v39 = vrot.slane %v8167_v9, 3 }
 0x6a9   : > { %v2896_v21 = vrot.slane %v8167_v9, 1  ;;  %v2808_v55 = vrot.slane %v8167_v9, 5  ;;  %v2931_v41 = vrot.slane %v8167_v9, 2  ;;  %v5432_v5 = vunpack.c.h.bf16 %v5633_v14 }
 0x6aa   : > { %2982 = vrot.lane.b32.xlu1 %v2895_v57, %s9451_s7  ;;  %v2828_v37 = vsel %vm915_vm0, 0.0, %v2826_v33  ;;  %v2847_v44 = vsel %vm999_vm3, 0.0, %v2845_v32  ;;  %v2952_v45 = vsel %vm999_vm3, %v2950_v39, 0.0  ;;  %v5428_v51 = vunpack.c.h.bf16 %v5632_v2  ;;  %v5634_v32 = vld [vmem:[%s9448_s11 + $0x38] sm:$0xff]   ;;  %v5442_v39 = vld [vmem:[%s9405_s10] sm:$0xff]  }
 0x6ab   : > { %v2844_v30 = vmul.f32 %v2843_v13, %v2828_v37  ;;  %v2863_v28 = vmul.f32 %v2862_v36, %v2847_v44  ;;  %v2968_v6 = vmul.f32 %v2967_v46, %v2952_v45  ;;  %v2810_v52 = vsel %vm2200_vm15, 0.0, %v2808_v55  ;;  %v5637_v37 = vld [vmem:[%s9405_s10 + $0x10] sm:$0xff]  }
 0x6ac   : > { %v2898_v27 = vsel %vm2200_vm15, %v2896_v21, 0.0  ;;  %v8196_v10 = vmul.f32 %v2824_v54, %v2810_v52  ;;  %v2879_v16 = vmul.f32 %v2878_v19, %v2847_v44  ;;  %v2933_v38 = vsel %vm915_vm0, %v2931_v41, 0.0  ;;  %v8245_v54 = vld [vmem:[%s9405_s10 + $0x18] sm:$0xff]   ;;  %v5639_v52 = vld [vmem:[%s9405_s10 + $0x20] sm:$0xff]  }
 0x6ad   : > { %2970 = vrot.lane.b32.xlu0 %v2844_v30, %s9446_s29  ;;  %v3023_v25 = vpack.c.bf16 %v2968_v6, %v2968_v6  ;;  %v2930_v60 = vmul.f32 %v2929_v29, %v2898_v27  ;;  %v2914_v0 = vmul.f32 %v2913_v8, %v2898_v27  ;;  %v2949_v4 = vmul.f32 %v2948_v1, %v2933_v38 }
 0x6ae   : > { %2974 = vrot.lane.b32.xlu1 %v2863_v28, %s9456_s6  ;;  %v6343_v36 = vpack.i.bf16 %v5420_v12, %v5419_v22  ;;  %v5427_v13 = vunpack.c.l.bf16 %v5632_v2  ;;  %v6358_v56 = vpack.i.bf16 %v5432_v5, %v5431_v53  ;;  %v5439_v57 = vunpack.c.l.bf16 %v5635_v59  ;;  %v5648_v53 = vld [vmem:[%s9405_s10 + $0x68] sm:$0xff]  }
 0x6af   : > { %5096 = vmatprep.mubr.msk.bf16.mxu0 %vm1903_vm6, %v3023_v25  ;;  %v5440_v33 = vunpack.c.h.bf16 %v5635_v59  ;;  %v5435_v20 = vunpack.c.l.bf16 %v5634_v32  ;;  %v5436_v63 = vunpack.c.h.bf16 %v5634_v32  ;;  %v5443_v21 = vunpack.c.l.bf16 %v5442_v39 }
 0x6b0   : > { %v6353_v62 = vpack.i.bf16 %v5428_v51, %v5427_v13  ;;  %v5444_v55 = vunpack.c.h.bf16 %v5442_v39  ;;  %v5447_v45 = vunpack.c.l.bf16 %v5636_v15  ;;  %v5448_v30 = vunpack.c.h.bf16 %v5636_v15 }
 0x6b1   : > { %2978 = vrot.lane.b32.xlu0 %v2879_v16, %s9449_s4  ;;  %v6368_v46 = vpack.i.bf16 %v5440_v33, %v5439_v57  ;;  %v6363_v44 = vpack.i.bf16 %v5436_v63, %v5435_v20  ;;  %v5451_v6 = vunpack.c.l.bf16 %v5637_v37  ;;  %v5452_v61 = vunpack.c.h.bf16 %v5637_v37  ;;  %v5647_v16 = vld [vmem:[%s9405_s10 + $0x60] sm:$0xff]   ;;  %v5656_v57 = vld [vmem:[%s9405_s10 + $0xa8] sm:$0xff]  }
 0x6b2   : > { %2990 = vrot.lane.b32.xlu1 %v2930_v60, %s9463_s26  ;;  %v6373_v28 = vpack.i.bf16 %v5444_v55, %v5443_v21  ;;  %v6378_v19 = vpack.i.bf16 %v5448_v30, %v5447_v45  ;;  %v5455_v25 = vunpack.c.l.bf16 %v8245_v54  ;;  %v5459_v27 = vunpack.c.l.bf16 %v5639_v52  ;;  %v5664_v21 = vld [vmem:[%s9405_s10 + $0xe8] sm:$0xff]  }
 0x6b3   : > { %v6383_v29 = vpack.i.bf16 %v5452_v61, %v5451_v6  ;;  %v5460_v26 = vunpack.c.h.bf16 %v5639_v52  ;;  %v5476_v41 = vunpack.c.h.bf16 %v5643_v23  ;;  %v5491_v8 = vunpack.c.l.bf16 %v5647_v16  ;;  %v5645_v6 = vld [vmem:[%s9405_s10 + $0x50] sm:$0xff]  }
 0x6b4   : > { %v6388_v60 = vpack.i.bf16 %v5459_v27, %v5455_v25  ;;  %v5492_v35 = vunpack.c.h.bf16 %v5647_v16  ;;  %v5508_v38 = vunpack.c.h.bf16 %v5651_v34  ;;  %v5523_v1 = vunpack.c.l.bf16 %v5655_v50 }
 0x6b5   : > { %2986 = vrot.lane.b32.xlu0 %v2914_v0, %s9464_s12  ;;  %v5659_v0 = vld [vmem:[%s9405_s10 + $0xc0] sm:$0xff]   ;;  %v6398_v18 = vpack.i.bf16 %v5491_v8, %v5476_v41  ;;  %v5555_v14 = vunpack.c.l.bf16 %v5663_v24  ;;  %v5463_v22 = vunpack.c.l.bf16 %v5640_v47  ;;  %v5556_v12 = vunpack.c.h.bf16 %v5663_v24 }
 0x6b6   : > { %6329 = vperm.xlu1 %5902, %v6328_v48   ;;  %v6393_v48 = vpack.i.bf16 %v5475_v42, %v5460_v26  ;;  %v6403_v49 = vpack.i.bf16 %v5507_v7, %v5492_v35  ;;  %v6408_v11 = vpack.i.bf16 %v5523_v1, %v5508_v38  ;;  %v5464_v2 = vunpack.c.h.bf16 %v5640_v47  ;;  %v5653_v26 = vld [vmem:[%s9405_s10 + $0x90] sm:$0xff]  }
 0x6b7   : > { %v5495_v51 = vunpack.c.l.bf16 %v5648_v53  ;;  %v5496_v32 = vunpack.c.h.bf16 %v5648_v53  ;;  %v5527_v63 = vunpack.c.l.bf16 %v5656_v57  ;;  %v5528_v15 = vunpack.c.h.bf16 %v5656_v57  ;;  %v5661_v35 = vld [vmem:[%s9405_s10 + $0xd0] sm:$0xff]  }
 0x6b8   : > { %v5559_v30 = vunpack.c.l.bf16 %v5664_v21  ;;  %v5560_v23 = vunpack.c.h.bf16 %v5664_v21  ;;  %v5483_v27 = vunpack.c.l.bf16 %v5645_v6  ;;  %v5484_v16 = vunpack.c.h.bf16 %v5645_v6 }
 0x6b9   : > { %2994 = vrot.lane.b32.xlu0 %v2949_v4, %s9465_s0  ;;  %v5540_v4 = vunpack.c.h.bf16 %v5659_v0  ;;  %v5515_v8 = vunpack.c.l.bf16 %v5653_v26  ;;  %v5516_v50 = vunpack.c.h.bf16 %v5653_v26  ;;  %v5547_v1 = vunpack.c.l.bf16 %v5661_v35 }
 0x6ba   : > { %6339 = vperm.xlu1 %5902, %v6338_v31   ;;  %v5539_v31 = vunpack.c.l.bf16 %v5659_v0  ;;  %v5548_v24 = vunpack.c.h.bf16 %v5661_v35 }
 0x6bb   : > { %v6418_v5 = vpack.i.bf16 %v5555_v14, %v5540_v4 }
 0x6bd   : > { %6334 = vperm.xlu0 %5891, %v6333_v17   ;;  %v6413_v17 = vpack.i.bf16 %v5539_v31, %v5524_v43  ;;  %v5642_v43 = vld [vmem:[%s9405_s10 + $0x38] sm:$0xff]  }
 0x6be   : > { %6349 = vperm.xlu1 %5902, %v6348_v58   ;;  %v5644_v58 = vld [vmem:[%s9405_s10 + $0x48] sm:$0xff]   ;;  %v5471_v4 = vunpack.c.l.bf16 %v5642_v43 }
 0x6bf   : > { %v5479_v59 = vunpack.c.l.bf16 %v5644_v58  ;;  %v5480_v13 = vunpack.c.h.bf16 %v5644_v58  ;;  %v5472_v58 = vunpack.c.h.bf16 %v5642_v43  ;;  %v6765_v43 = vld [vmem:[%s9322_s19 + $0x10] sm:$0xff]  }
 0x6c1   : > { %6344 = vperm.xlu0 %5891, %v6343_v36   ;;  %v6423_v36 = vpack.i.bf16 %v5463_v22, %v5556_v12  ;;  %v6428_v33 = vpack.i.bf16 %v5479_v59, %v5464_v2  ;;  %v5650_v22 = vld [vmem:[%s9405_s10 + $0x78] sm:$0xff]  }
 0x6c2   : > { %6359 = vperm.xlu1 %5902, %v6358_v56   ;;  %v5652_v56 = vld [vmem:[%s9405_s10 + $0x88] sm:$0xff]   ;;  %v5503_v59 = vunpack.c.l.bf16 %v5650_v22 }
 0x6c3   : > { %v5511_v39 = vunpack.c.l.bf16 %v5652_v56  ;;  %v5512_v20 = vunpack.c.h.bf16 %v5652_v56  ;;  %v5504_v56 = vunpack.c.h.bf16 %v5650_v22 }
 0x6c5   : > { %6354 = vperm.xlu0 %5891, %v6353_v62   ;;  %v6433_v62 = vpack.i.bf16 %v5495_v51, %v5480_v13  ;;  %v6438_v55 = vpack.i.bf16 %v5511_v39, %v5496_v32  ;;  %v5658_v13 = vld [vmem:[%s9405_s10 + $0xb8] sm:$0xff]  }
 0x6c6   : > { %6369 = vperm.xlu1 %5902, %v6368_v46   ;;  %v5660_v46 = vld [vmem:[%s9405_s10 + $0xc8] sm:$0xff]   ;;  %v5535_v39 = vunpack.c.l.bf16 %v5658_v13 }
 0x6c7   : > { %v5543_v37 = vunpack.c.l.bf16 %v5660_v46  ;;  %v5544_v45 = vunpack.c.h.bf16 %v5660_v46  ;;  %v5536_v46 = vunpack.c.h.bf16 %v5658_v13 }
 0x6c9   : > { %6364 = vperm.xlu0 %5891, %v6363_v44   ;;  %v6443_v44 = vpack.i.bf16 %v5527_v63, %v5512_v20  ;;  %v6448_v61 = vpack.i.bf16 %v5543_v37, %v5528_v15  ;;  %v5666_v20 = vld [vmem:[%s9405_s10 + $0xf8] sm:$0xff]  }
 0x6ca   : > { %6374 = vperm.xlu1 %5902, %v6373_v28   ;;  %v5641_v28 = vld [vmem:[%s9405_s10 + $0x30] sm:$0xff]   ;;  %v5567_v37 = vunpack.c.l.bf16 %v5666_v20 }
 0x6cb   : > { %v5467_v52 = vunpack.c.l.bf16 %v5641_v28  ;;  %v5468_v25 = vunpack.c.h.bf16 %v5641_v28  ;;  %v5568_v28 = vunpack.c.h.bf16 %v5666_v20 }
 0x6cd   : > { %6379 = vperm.xlu0 %5891, %v6378_v19   ;;  %v6453_v19 = vpack.i.bf16 %v5559_v30, %v5544_v45  ;;  %v6458_v42 = vpack.i.bf16 %v5467_v52, %v5560_v23  ;;  %v8338_v45 = vld [vmem:[%s9405_s10 + $0x108] sm:$0xff]  }
 0x6ce   : > { %6384 = vperm.xlu1 %5902, %v6383_v29   ;;  %v5649_v29 = vld [vmem:[%s9405_s10 + $0x70] sm:$0xff]   ;;  %v5575_v23 = vunpack.c.l.bf16 %v8338_v45 }
 0x6cf   : > { %v5499_v34 = vunpack.c.l.bf16 %v5649_v29  ;;  %v5500_v41 = vunpack.c.h.bf16 %v5649_v29 }
 0x6d1   : > { %6389 = vperm.xlu0 %5891, %v6388_v60   ;;  %v6463_v60 = vpack.i.bf16 %v5483_v27, %v5468_v25  ;;  %v6468_v7 = vpack.i.bf16 %v5499_v34, %v5484_v16 }
 0x6d2   : > { %6394 = vperm.xlu1 %5902, %v6393_v48   ;;  %v5657_v48 = vld [vmem:[%s9405_s10 + $0xb0] sm:$0xff]  }
 0x6d3   : > { %v5531_v0 = vunpack.c.l.bf16 %v5657_v48  ;;  %v5532_v38 = vunpack.c.h.bf16 %v5657_v48 }
 0x6d5   : > { %6399 = vperm.xlu0 %5891, %v6398_v18   ;;  %v6473_v18 = vpack.i.bf16 %v5515_v8, %v5500_v41  ;;  %v6478_v31 = vpack.i.bf16 %v5531_v0, %v5516_v50  ;;  %v3132_v0 = vpack.c.bf16 %v8167_v9, %v8167_v9  ;;  %v6759_v9 = vld [vmem:[%s9327_s24] sm:$0xff]  }
 0x6d6   : > { %6404 = vperm.xlu1 %5902, %v6403_v49   ;;  %v5665_v49 = vld [vmem:[%s9405_s10 + $0xf0] sm:$0xff]  }
 0x6d7   : > { %v5563_v47 = vunpack.c.l.bf16 %v5665_v49  ;;  %v5564_v14 = vunpack.c.h.bf16 %v5665_v49  ;;  %v6763_v49 = vld [vmem:[%s9322_s19] sm:$0xff]  }
 0x6d8   : > { %3525 = vmatpush1.bf16.msra.mxu1 %v6763_v49 }
 0x6d9   : > { %6409 = vperm.xlu0 %5891, %v6408_v11   ;;  %v6483_v11 = vpack.i.bf16 %v5547_v1, %v5532_v38  ;;  %v6488_v12 = vpack.i.bf16 %v5563_v47, %v5548_v24  ;;  %v3143_v38 = vsel %vm915_vm0, %v3132_v0, 0  ;;  %v6758_v1 = vld [vmem:[%s9328_s25] sm:$0xff]   ;;  %3526 = vmatprep.subr.bf16.mxu1 %v9454_v3  ;;  %vm3128_vm0 = vcmask 125952  }
 0x6da   : > { %6414 = vperm.xlu1 %5902, %v6413_v17   ;;  %v5646_v17 = vld [vmem:[%s9405_s10 + $0x58] sm:$0xff]  }
 0x6db   : > { %v5487_v53 = vunpack.c.l.bf16 %v5646_v17  ;;  %v5488_v2 = vunpack.c.h.bf16 %v5646_v17  ;;  %v5086_v17 = vld [vmem:[%s9325_s22] ss:$0 sm:$0xff] }
 0x6dd   : > { %6419 = vperm.xlu0 %5891, %v6418_v5   ;;  %v6493_v5 = vpack.i.bf16 %v5471_v4, %v5564_v14  ;;  %v6498_v51 = vpack.i.bf16 %v5487_v53, %v5472_v58 }
 0x6de   : > { %6424 = vperm.xlu1 %5902, %v6423_v36   ;;  %v5654_v36 = vld [vmem:[%s9405_s10 + $0x98] sm:$0xff]  }
 0x6df   : > { %v5519_v57 = vunpack.c.l.bf16 %v5654_v36  ;;  %v5520_v32 = vunpack.c.h.bf16 %v5654_v36  ;;  %v6767_v36 = vld [vmem:[%s9322_s19 + $0x20] sm:$0xff]  }
 0x6e1   : > { %6429 = vperm.xlu0 %5891, %v6428_v33   ;;  %v6503_v33 = vpack.i.bf16 %v5503_v59, %v5488_v2  ;;  %v6508_v63 = vpack.i.bf16 %v5519_v57, %v5504_v56 }
 0x6e2   : > { %6434 = vperm.xlu1 %5902, %v6433_v62   ;;  %v5662_v62 = vld [vmem:[%s9405_s10 + $0xd8] sm:$0xff]  }
 0x6e3   : > { %v5551_v21 = vunpack.c.l.bf16 %v5662_v62  ;;  %v5552_v15 = vunpack.c.h.bf16 %v5662_v62 }
 0x6e5   : > { %6439 = vperm.xlu0 %5891, %v6438_v55   ;;  %v6513_v55 = vpack.i.bf16 %v5535_v39, %v5520_v32  ;;  %v6518_v30 = vpack.i.bf16 %v5551_v21, %v5536_v46  ;;  %v5071_v32 = vld [vmem:[%s9317_s14] ss:$0 sm:$0xff] }
 0x6e6   : > { %6444 = vperm.xlu1 %5902, %v6443_v44   ;;  %v5667_v44 = vld [vmem:[%s9405_s10 + $0x100] sm:$0xff]  }
 0x6e7   : > { %v5571_v6 = vunpack.c.l.bf16 %v5667_v44  ;;  %v5572_v52 = vunpack.c.h.bf16 %v5667_v44 }
 0x6e9   : > { %6449 = vperm.xlu0 %5891, %v6448_v61   ;;  %v6523_v61 = vpack.i.bf16 %v5567_v37, %v5552_v15  ;;  %v6533_v25 = vpack.i.bf16 %v5575_v23, %v5572_v52 }
 0x6ea   : > { %6454 = vperm.xlu1 %5902, %v6453_v19   ;;  %v6528_v19 = vpack.i.bf16 %v5571_v6, %v5568_v28 }
 0x6ed   : > { %6459 = vperm.xlu0 %5891, %v6458_v42  }
 0x6ee   : > { %6464 = vperm.xlu1 %5902, %v6463_v60  }
 0x6f1   : > { %6469 = vperm.xlu0 %5891, %v6468_v7  }
 0x6f2   : > { %6474 = vperm.xlu1 %5902, %v6473_v18  }
 0x6f5   : > { %6479 = vperm.xlu0 %5891, %v6478_v31   ;;  %v6766_v31 = vld [vmem:[%s9322_s19 + $0x18] sm:$0xff]  }
 0x6f6   : > { %6484 = vperm.xlu1 %5902, %v6483_v11  }
 0x6f9   : > { %6489 = vperm.xlu0 %5891, %v6488_v12  }
 0x6fa   : > { %6494 = vperm.xlu1 %5902, %v6493_v5  }
 0x6fd   : > { %6499 = vperm.xlu0 %5891, %v6498_v51  }
 0x6fe   : > { %6504 = vperm.xlu1 %5902, %v6503_v33  }
 0x701   : > { %6509 = vperm.xlu0 %5891, %v6508_v63  }
 0x702   : > { %6514 = vperm.xlu1 %5902, %v6513_v55  }
 0x705   : > { %6519 = vperm.xlu0 %5891, %v6518_v30   ;;  %v8421_v30 = vld [vmem:[%s9405_s10 + $0x110] sm:$0xff]  }
 0x706   : > { %6524 = vperm.xlu1 %5902, %v6523_v61  }
 0x709   : > { %6529 = vperm.xlu0 %5891, %v6528_v19  }
 0x70a   : > { %6534 = vperm.xlu1 %5902, %v6533_v25  }
 0x71c   : > { %v2983_v27 = vpop.permute.xlu1 %2982 }
 0x71f   : > { %v2971_v29 = vpop.permute.xlu0 %2970 }
 0x720   : > { %v2997_v26 = vsel %vm1903_vm6, %v8196_v10, %v2971_v29  ;;  %v2975_v42 = vpop.permute.xlu1 %2974 }
 0x721   : > { %v2998_v16 = vsel %vm1921_vm9, %v2997_v26, %v2975_v42  ;;  %v5576_v26 = vunpack.c.h.bf16 %v8338_v45  ;;  %v6768_v42 = vld [vmem:[%s9322_s19 + $0x28] sm:$0xff]  }
 0x723   : > { %v2979_v34 = vpop.permute.xlu0 %2978 }
 0x724   : > { %v2999_v60 = vsel %vm1939_vm10, %v2998_v16, %v2979_v34  ;;  %v2991_v35 = vpop.permute.xlu1 %2990 }
 0x725   : > { %v3000_v8 = vsel %vm1957_vm12, %v2999_v60, %v2983_v27 }
 0x727   : > { %v2987_v41 = vpop.permute.xlu0 %2986 }
 0x728   : > { %v3001_v48 = vsel %vm2408_vm7, %v3000_v8, %v2987_v41  ;;  %v5579_v8 = vunpack.c.l.bf16 %v8421_v30 }
 0x729   : > { %v3002_v50 = vsel %vm2411_vm8, %v3001_v48, %v2991_v35 }
 0x72b   : > { %v2995_v7 = vpop.permute.xlu0 %2994 }
 0x72c   : > { %v3003_v10 = vsel %vm2414_vm11, %v3002_v50, %v2995_v7 }
 0x72d   : > { %v3022_v18 = vpack.c.bf16 %v3003_v10, %v3003_v10 }
 0x72f   : > { %3121 = vmatmul.mubr.bf16.vlgmr.msra.gmra.mrb[36].mxu0 %v3022_v18 }
 0x730   : > { %5786 = vmatpush3.bf16.msra.mxu0 %v3143_v38  ;;  %5787 = vmatprep.mubr.msk.bf16.mxu0 %vm6915_vm14, %v6914_v40  ;;  %v6764_v40 = vld [vmem:[%s9322_s19 + $0x8] sm:$0xff]  }
 0x731   : > { %3527 = vmatpush1.bf16.msra.mxu1 %v6764_v40 }
 0x732   : > { %3528 = vmatprep.subr.bf16.mxu1 %v9454_v3 }
 0x735   : > { %3529 = vmatpush1.bf16.msra.mxu1 %v6765_v43  ;;  %v8377_v24 = vpop.permute.xlu1 %6329  ;;  %v6769_v43 = vld [vmem:[%s9322_s19 + $0x30] sm:$0xff]  }
 0x736   : > { %3530 = vmatprep.subr.bf16.mxu1 %v9454_v3  ;;  %v6332_v13 = vunpack.i.h.bf16 %v8377_v24  ;;  %v6331_v51 = vunpack.i.l.bf16 %v8377_v24  ;;  %v5670_v24 = vld [vmem:[%s9405_s10 + $0x118] sm:$0xff]  }
 0x737   : > { %5788 = vmatmul.mubr.msk.bf16.vlgmr.msra.gmra.mrb[32].mxu0 %vm3138_vm5, %v6758_v1 }
 0x738   : > { %5793 = vmatprep.mubr.msk.bf16.mxu0 %vm1903_vm6, %v6759_v9 }
 0x739   : > { %3531 = vmatpush1.bf16.msra.mxu1 %v6766_v31  ;;  %v8379_v47 = vpop.permute.xlu1 %6339 }
 0x73a   : > { %3532 = vmatprep.subr.bf16.mxu1 %v9454_v3  ;;  %v6342_v56 = vunpack.i.h.bf16 %v8379_v47  ;;  %v6341_v57 = vunpack.i.l.bf16 %v8379_v47  ;;  %v6760_v47 = vld [vmem:[%s9327_s24 + $0x8] sm:$0xff]  }
 0x73c   : > { %v8381_v11 = vpop.permute.xlu0 %6334 }
 0x73d   : > { %v6350_v4 = vpop.permute.xlu1 %6349  ;;  %3533 = vmatpush1.bf16.msra.mxu1 %v6767_v36  ;;  %v6337_v39 = vunpack.i.h.bf16 %v8381_v11  ;;  %v6336_v62 = vunpack.i.l.bf16 %v8381_v11 }
 0x73e   : > { %v6352_v20 = vunpack.i.h.bf16 %v6350_v4  ;;  %v6351_v63 = vunpack.i.l.bf16 %v6350_v4  ;;  %3534 = vmatprep.subr.bf16.mxu1 %v9454_v3 }
 0x740   : > { %v8386_v14 = vpop.permute.xlu0 %6344 }
 0x741   : > { %v8392_v22 = vpop.permute.xlu1 %6359  ;;  %v6347_v21 = vunpack.i.h.bf16 %v8386_v14  ;;  %v6346_v55 = vunpack.i.l.bf16 %v8386_v14  ;;  %3535 = vmatpush1.bf16.msra.mxu1 %v6768_v42 }
 0x742   : > { %v6362_v15 = vunpack.i.h.bf16 %v8392_v22  ;;  %v6361_v37 = vunpack.i.l.bf16 %v8392_v22  ;;  %3536 = vmatprep.subr.bf16.mxu1 %v9454_v3  ;;  %v6771_v22 = vld [vmem:[%s9322_s19 + $0x40] sm:$0xff]  }
 0x744   : > { %v8394_v58 = vpop.permute.xlu0 %6354 }
 0x745   : > { %v6370_v33 = vpop.permute.xlu1 %6369  ;;  %v6357_v28 = vunpack.i.h.bf16 %v8394_v58  ;;  %v6356_v6 = vunpack.i.l.bf16 %v8394_v58  ;;  %3537 = vmatpush1.bf16.msra.mxu1 %v6769_v43 }
 0x746   : > { %v6372_v61 = vunpack.i.h.bf16 %v6370_v33  ;;  %v6371_v19 = vunpack.i.l.bf16 %v6370_v33  ;;  %3538 = vmatprep.subr.bf16.mxu1 %v9454_v3 }
 0x748   : > { %v8411_v46 = vpop.permute.xlu0 %6364 }
 0x749   : > { %v6367_v25 = vunpack.i.h.bf16 %v8411_v46  ;;  %v6366_v27 = vunpack.i.l.bf16 %v8411_v46 }
 0x802   : > { %v3122_v12 = vpop.f32.mrb[36].mxu0 }
 0x803   : > { %v3123_v53 = vadd.f32 %v5086_v17, %v3122_v12  ;;  %v3124_v5 = vpop.f32.mrb[37].mxu0 }
 0x804   : > { %v3125_v2 = vpop.f32.mrb[38].mxu0 }
 0x805   : > { %3129 = vst.msk [vmem:[%s8396_s30] sm:$0xf] %vm3128_vm0, %v3123_v53  ;;  %v3126_v59 = vpop.f32.mrb[39].mxu0 }
 0x80a   : > { %v3179_v44 = vpop.f32.mrb[32].mxu0 }
 0x80b   : > { %v8425_v52 = vadd.f32 %v5071_v32, %v3179_v44  ;;  %v5789_v23 = vpop.f32.mrb[33].mxu0 }
 0x80c   : > { %v3182_v29 = vpop.f32.mrb[34].mxu0 }
 0x80d   : > { %v5810_v16 = vadd.f32 %v5071_v32, %v3182_v29  ;;  %v5790_v34 = vpop.f32.mrb[35].mxu0  ;;  %v3234_v60 = vrot.slane %v8425_v52, 5  ;;  %v3212_v41 = vrot.slane %v8425_v52, 4  ;;  %v3292_v48 = vmul.f32 %v6351_v63, %v8425_v52  ;;  %v6761_v32 = vld [vmem:[%s9327_s24 + $0x10] sm:$0xff]  }
 0x80e   : > { %v3256_v35 = vrot.slane %v8425_v52, 7  ;;  %v3190_v7 = vrot.slane %v8425_v52, 3  ;;  %v3294_v50 = vrot.slane %v8425_v52, 1 }
 0x80f   : > { %v3575_v0 = vpack.c.bf16 %v5810_v16, %v8425_v52  ;;  %v3293_v10 = vmul.f32 %v6352_v20, %v5810_v16  ;;  %v3235_v18 = vrot.slane %v5810_v16, 5  ;;  %v3213_v38 = vrot.slane %v5810_v16, 4 }
 0x810   : > { %v3217_v1 = vsel %vm2019_vm4, 0.0, %v3212_v41  ;;  %v3239_v9 = vsel %vm2200_vm15, 0.0, %v3234_v60  ;;  %v3257_v49 = vrot.slane %v5810_v16, 7  ;;  %v3261_v40 = vsel %vm999_vm3, 0.0, %v3256_v35 }
 0x811   : > { %5791 = vmatprep.subr.bf16.mxu0 %v3575_v0  ;;  %v6538_v31 = vpack.i.bf16 %v3293_v10, %v3292_v48  ;;  %v3236_v11 = vsel %vm2200_vm15, %v3234_v60, %v3235_v18  ;;  %v3353_v4 = vsel %vm2200_vm15, %v3235_v18, 0.0  ;;  %v3214_v14 = vsel %vm2019_vm4, %v3212_v41, %v3213_v38 }
 0x812   : > { %5792 = vmatpush3.bf16.msra.mxu0 %v3575_v0  ;;  %v3368_v17 = vmul.f32 %v6371_v19, %v3236_v11  ;;  %v3369_v12 = vmul.f32 %v6372_v61, %v3353_v4  ;;  %v3232_v53 = vmul.f32 %v6336_v62, %v3217_v1  ;;  %v3233_v5 = vmul.f32 %v6337_v39, %v3214_v14  ;;  %v6770_v39 = vld [vmem:[%s9322_s19 + $0x38] sm:$0xff]  }
 0x813   : > { %6539 = vrot.lane.b32.xlu1 %v6538_v31, %s9451_s7  ;;  %v3254_v2 = vmul.f32 %v6341_v57, %v3239_v9  ;;  %v3255_v59 = vmul.f32 %v6342_v56, %v3236_v11  ;;  %v3258_v36 = vsel %vm999_vm3, %v3256_v35, %v3257_v49  ;;  %v3276_v33 = vmul.f32 %v6346_v55, %v3261_v40 }
 0x814   : > { %v3459_v20 = vpack.c.bf16 %v3369_v12, %v3368_v17  ;;  %v6543_v63 = vpack.i.bf16 %v3233_v5, %v3232_v53  ;;  %v3277_v46 = vmul.f32 %v6347_v21, %v3258_v36  ;;  %v3191_v44 = vrot.slane %v5810_v16, 3  ;;  %3539 = vmatpush1.bf16.msra.mxu1 %v6770_v39 }
 0x815   : > { %5794 = vmatmul.mubr.msk.bf16.vlgmr.msra.gmra.mrb[24].mxu0 %vm1903_vm6, %v6760_v47  ;;  %v6548_v57 = vpack.i.bf16 %v3255_v59, %v3254_v2  ;;  %v3295_v56 = vrot.slane %v5810_v16, 1  ;;  %v3335_v62 = vsel %vm2019_vm4, %v3213_v38, 0.0  ;;  %v3350_v55 = vmul.f32 %v6366_v27, %v3214_v14  ;;  %3540 = vmatprep.subr.bf16.mxu1 %v9454_v3 }
 0x816   : > { %5125 = vmatprep.mubr.msk.bf16.mxu1 %vm1903_vm6, %v3459_v20  ;;  %6544 = vrot.lane.b32.xlu0 %v6543_v63, %s9446_s29  ;;  %v6553_v21 = vpack.i.bf16 %v3277_v46, %v3276_v33  ;;  %v3192_v61 = vsel %vm2154_vm1, %v3190_v7, %v3191_v44  ;;  %v3317_v52 = vsel %vm2154_vm1, %v3191_v44, 0.0  ;;  %v3351_v23 = vmul.f32 %v6367_v25, %v3335_v62 }
 0x817   : > { %6549 = vrot.lane.b32.xlu1 %v6548_v57, %s9456_s6  ;;  %v3332_v19 = vmul.f32 %v6361_v37, %v3192_v61  ;;  %v3333_v27 = vmul.f32 %v6362_v15, %v3317_v52  ;;  %5797 = vmatprep.mubr.msk.bf16.mxu0 %vm1903_vm6, %v6761_v32  ;;  %v3296_v29 = vsel %vm1151_vm2, %v3294_v50, %v3295_v56  ;;  %v3299_v42 = vsel %vm1151_vm2, %v3295_v56, 0.0  ;;  %v6762_v37 = vld [vmem:[%s9327_s24 + $0x18] sm:$0xff]  }
 0x818   : > { %v3314_v16 = vmul.f32 %v6356_v6, %v3296_v29  ;;  %v3315_v25 = vmul.f32 %v6357_v28, %v3299_v42  ;;  %v6583_v34 = vpack.i.bf16 %v3351_v23, %v3350_v55  ;;  %v3195_v60 = vsel %vm2154_vm1, 0.0, %v3190_v7  ;;  %3541 = vmatpush1.bf16.msra.mxu1 %v6771_v22 }
 0x819   : > { %v6563_v15 = vpack.i.bf16 %v3333_v27, %v3332_v19  ;;  %v8490_v41 = vmul.f32 %v6331_v51, %v3195_v60  ;;  %v8494_v58 = vmul.f32 %v6332_v13, %v3192_v61  ;;  %v6568_v6 = vpack.i.bf16 %v5579_v8, %v5576_v26  ;;  %4696 = vmatprep.subr.bf16.mxu1 %v9454_v3  ;;  %v8511_v26 = vpop.permute.xlu1 %6374  ;;  %v8516_v8 = vpop.permute.xlu0 %6379 }
 0x81a   : > { %6554 = vrot.lane.b32.xlu0 %v6553_v21, %s9449_s4  ;;  %v6558_v28 = vpack.i.bf16 %v3315_v25, %v3314_v16  ;;  %v5456_v48 = vunpack.c.h.bf16 %v8245_v54  ;;  %v5580_v51 = vunpack.c.h.bf16 %v8421_v30  ;;  %v5583_v13 = vunpack.c.l.bf16 %v5670_v24 }
 0x81b   : > { %6564 = vrot.lane.b32.xlu1 %v6563_v15, %s9463_s26  ;;  %v5584_v35 = vunpack.c.h.bf16 %v5670_v24 }
 0x81c   : > { %v6573_v45 = vpack.i.bf16 %v5456_v48, %v5580_v51 }
 0x81d   : > { %5798 = vmatmul.mubr.msk.bf16.gmra.mrb[28].mxu0 %vm1903_vm6, %v6762_v37  ;;  %v6578_v54 = vpack.i.bf16 %v5584_v35, %v5583_v13  ;;  %v8514_v30 = vpop.permute.xlu1 %6384  ;;  %v8520_v50 = vpop.permute.xlu0 %6389 }
 0x81e   : > { %6559 = vrot.lane.b32.xlu0 %v6558_v28, %s9464_s12  ;;  %9466 = vst [vmem:[#allocation15_spill] sm:$0xff] %v8520_v50 }
 0x81f   : > { %6569 = vperm.xlu1 %5902, %v6568_v6  }
 0x821   : > { %v8518_v7 = vpop.permute.xlu1 %6394  ;;  %v8524_v10 = vpop.permute.xlu0 %6399 }
 0x822   : > { %6584 = vrot.lane.b32.xlu0 %v6583_v34, %s9465_s0 }
 0x823   : > { %6574 = vperm.xlu1 %5902, %v6573_v45  }
 0x825   : > { %v8522_v0 = vpop.permute.xlu1 %6404  ;;  %v8528_v38 = vpop.permute.xlu0 %6409 }
 0x827   : > { %6579 = vperm.xlu1 %5902, %v6578_v54  }
 0x829   : > { %v8526_v18 = vpop.permute.xlu1 %6414  ;;  %v8532_v9 = vpop.permute.xlu0 %6419 }
 0x82d   : > { %v8530_v1 = vpop.permute.xlu1 %6424  ;;  %v8536_v40 = vpop.permute.xlu0 %6429 }
 0x831   : > { %v8534_v49 = vpop.permute.xlu1 %6434  ;;  %v8540_v31 = vpop.permute.xlu0 %6439 }
 0x835   : > { %v8538_v43 = vpop.permute.xlu1 %6444  ;;  %v8544_v11 = vpop.permute.xlu0 %6449 }
 0x839   : > { %v8542_v47 = vpop.permute.xlu1 %6454  ;;  %v8548_v14 = vpop.permute.xlu0 %6459 }
 0x83d   : > { %v8546_v4 = vpop.permute.xlu1 %6464  ;;  %v8552_v12 = vpop.permute.xlu0 %6469 }
 0x841   : > { %v8550_v17 = vpop.permute.xlu1 %6474  ;;  %v8556_v5 = vpop.permute.xlu0 %6479 }
 0x845   : > { %v8554_v53 = vpop.permute.xlu1 %6484  ;;  %v8560_v59 = vpop.permute.xlu0 %6489 }
 0x849   : > { %v8558_v2 = vpop.permute.xlu1 %6494  ;;  %v8564_v33 = vpop.permute.xlu0 %6499 }
 0x84d   : > { %v8562_v36 = vpop.permute.xlu1 %6504  ;;  %v8568_v20 = vpop.permute.xlu0 %6509 }
 0x851   : > { %v8566_v32 = vpop.permute.xlu1 %6514  ;;  %v8572_v46 = vpop.permute.xlu0 %6519 }
 0x855   : > { %v8570_v63 = vpop.permute.xlu1 %6524  ;;  %v8576_v39 = vpop.permute.xlu0 %6529 }
 0x856   : > { %9467 = vst [vmem:[#allocation16_spill] sm:$0xff] %v8576_v39 }
 0x859   : > { %v8574_v44 = vpop.permute.xlu1 %6534 }
 0x885   : > { %v6540_v57 = vpop.permute.xlu1 %6539 }
 0x886   : > { %v6542_v22 = vunpack.i.h.bf16 %v6540_v57  ;;  %v6541_v15 = vunpack.i.l.bf16 %v6540_v57 }
 0x888   : > { %v6545_v56 = vpop.permute.xlu0 %6544 }
 0x889   : > { %v6547_v62 = vunpack.i.h.bf16 %v6545_v56  ;;  %v6546_v55 = vunpack.i.l.bf16 %v6545_v56  ;;  %v6550_v21 = vpop.permute.xlu1 %6549 }
 0x88a   : > { %v6552_v61 = vunpack.i.h.bf16 %v6550_v21  ;;  %v6551_v52 = vunpack.i.l.bf16 %v6550_v21 }
 0x88b   : > { %v3426_v23 = vsel %vm1903_vm6, %v8490_v41, %v6546_v55  ;;  %v3427_v19 = vsel %vm1903_vm6, %v8494_v58, %v6547_v62 }
 0x88c   : > { %v6555_v27 = vpop.permute.xlu0 %6554  ;;  %v3428_v16 = vsel %vm1921_vm9, %v3426_v23, %v6551_v52  ;;  %v3429_v25 = vsel %vm1921_vm9, %v3427_v19, %v6552_v61  ;;  %v6772_v52 = vld [vmem:[%s9320_s17] sm:$0xff]   ;;  %v6773_v23 = vld [vmem:[%s9320_s17 + $0x8] sm:$0xff]   ;;  %v6774_v19 = vld [vmem:[%s9320_s17 + $0x10] sm:$0xff]  }
 0x88d   : > { %v6557_v29 = vunpack.i.h.bf16 %v6555_v27  ;;  %v6556_v42 = vunpack.i.l.bf16 %v6555_v27  ;;  %v6565_v28 = vpop.permute.xlu1 %6564  ;;  %v6392_v27 = vunpack.i.h.bf16 %v8520_v50 }
 0x88e   : > { %v6567_v45 = vunpack.i.h.bf16 %v6565_v28  ;;  %v6566_v13 = vunpack.i.l.bf16 %v6565_v28 }
 0x88f   : > { %v3430_v34 = vsel %vm1939_vm10, %v3428_v16, %v6556_v42  ;;  %v3431_v60 = vsel %vm1939_vm10, %v3429_v25, %v6557_v29  ;;  %v8666_v16 = vld [vmem:[%s9468_s16] ss:$0 sm:$0xff] }
 0x890   : > { %v6560_v37 = vpop.permute.xlu0 %6559  ;;  %v3432_v48 = vsel %vm1957_vm12, %v3430_v34, %v6541_v15  ;;  %v3433_v58 = vsel %vm1957_vm12, %v3431_v60, %v6542_v22  ;;  %v6396_v15 = vunpack.i.l.bf16 %v8518_v7  ;;  %v6776_v42 = vld [vmem:[%s9320_s17 + $0x20] sm:$0xff]   ;;  %v6536_v34 = vunpack.i.l.bf16 %v8574_v44 }
 0x891   : > { %v6562_v6 = vunpack.i.h.bf16 %v6560_v37  ;;  %v6561_v41 = vunpack.i.l.bf16 %v6560_v37  ;;  %v8615_v37 = vmul.f32 0.0, %v6392_v27 }
 0x893   : > { %v3434_v51 = vsel %vm2408_vm7, %v3432_v48, %v6561_v41  ;;  %v3435_v24 = vsel %vm2408_vm7, %v3433_v58, %v6562_v6  ;;  %v6407_v41 = vunpack.i.h.bf16 %v8522_v0 }
 0x894   : > { %v6585_v35 = vpop.permute.xlu0 %6584  ;;  %v3436_v62 = vsel %vm2411_vm8, %v3434_v51, %v6566_v13  ;;  %v3437_v57 = vsel %vm2411_vm8, %v3435_v24, %v6567_v45  ;;  %v6411_v51 = vunpack.i.l.bf16 %v8528_v38 }
 0x895   : > { %v6587_v54 = vunpack.i.h.bf16 %v6585_v35  ;;  %v6586_v56 = vunpack.i.l.bf16 %v6585_v35  ;;  %v6777_v35 = vld [vmem:[%s9320_s17 + $0x28] sm:$0xff]  }
 0x897   : > { %v3438_v55 = vsel %vm2414_vm11, %v3436_v62, %v6586_v56  ;;  %v3439_v21 = vsel %vm2414_vm11, %v3437_v57, %v6587_v54  ;;  %v6427_v54 = vunpack.i.h.bf16 %v8530_v1  ;;  %v6426_v56 = vunpack.i.l.bf16 %v8530_v1 }
 0x898   : > { %v3458_v61 = vpack.c.bf16 %v3439_v21, %v3438_v55  ;;  %v6431_v57 = vunpack.i.l.bf16 %v8536_v40  ;;  %v6775_v55 = vld [vmem:[%s9320_s17 + $0x18] sm:$0xff]  }
 0x89a   : > { %3557 = vmatmul.mubr.bf16.vlgmr.msra.gmra.mrb[8].mxu1 %v3458_v61  ;;  %v6442_v61 = vunpack.i.h.bf16 %v8540_v31 }
 0x89b   : > { %4697 = vmatpush1.bf16.msra.mxu1 %v6772_v52 }
 0x89c   : > { %4698 = vmatprep.subr.bf16.mxu1 %v9454_v3 }
 0x89e   : > { %v8672_v60 = vpop.permute.xlu1 %6569 }
 0x89f   : > { %4699 = vmatpush1.bf16.msra.mxu1 %v6773_v23  ;;  %9469 = vst [vmem:[#allocation17_spill] sm:$0xff] %v8672_v60  ;;  %v6532_v23 = vunpack.i.h.bf16 %v8576_v39 }
 0x8a0   : > { %4700 = vmatprep.subr.bf16.mxu1 %v9454_v3 }
 0x8a3   : > { %4701 = vmatpush1.bf16.msra.mxu1 %v6774_v19  ;;  %v6446_v19 = vunpack.i.l.bf16 %v8538_v43 }
 0x8a4   : > { %4702 = vmatprep.subr.bf16.mxu1 %v9454_v3 }
 0x8a7   : > { %4703 = vmatpush1.bf16.msra.mxu1 %v6775_v55 }
 0x8a8   : > { %4704 = vmatprep.subr.bf16.mxu1 %v9454_v3 }
 0x8ab   : > { %4705 = vmatpush1.bf16.msra.mxu1 %v6776_v42 }
 0x8ac   : > { %4706 = vmatprep.subr.bf16.mxu1 %v9454_v3 }
 0x8af   : > { %4707 = vmatpush1.bf16.msra.mxu1 %v6777_v35 }
 0x8b0   : > { %4708 = vmatprep.subr.bf16.mxu1 %v9454_v3 }
 0x8e8   : > { %v5795_v62 = vpop.f32.mrb[24].mxu0 }
 0x8e9   : > { %v8683_v29 = vadd.f32 %v5795_v62, %v8666_v16  ;;  %v3642_v55 = vpop.f32.mrb[25].mxu0 }
 0x8ea   : > { %v8692_v52 = vadd.f32 %v8666_v16, %v3642_v55  ;;  %v5796_v6 = vpop.f32.mrb[26].mxu0 }
 0x8eb   : > { %v3841_v62 = vrot.slane %v8683_v29, 1  ;;  %v8697_v22 = vadd.f32 %v5796_v6, %v8666_v16  ;;  %v3645_v58 = vpop.f32.mrb[27].mxu0  ;;  %v4051_v45 = vmul.f32 %v6442_v61, %v8683_v29  ;;  %v3832_v48 = vmul.f32 %v6431_v57, %v8683_v29 }
 0x8ec   : > { %v3688_v24 = vrot.slane %v8692_v52, 7  ;;  %v3830_v55 = vmul.f32 %v6396_v15, %v8692_v52  ;;  %v3838_v27 = vrot.slane %v8692_v52, 1  ;;  %v4049_v6 = vmul.f32 %v6407_v41, %v8692_v52 }
 0x8ed   : > { %v9371_v61 = vrot.slane %v8697_v22, 1  ;;  %v5804_v21 = vadd.f32 %v8666_v16, %v3645_v58  ;;  %v4052_v25 = vmul.f32 %v6446_v19, %v8697_v22  ;;  %v4246_v52 = vmul.f32 %v6426_v56, %v8683_v29 }
 0x8ee   : > { %v6588_v15 = vpack.i.bf16 %v3830_v55, %v8615_v37  ;;  %v8723_v41 = vsel %vm999_vm3, 0.0, %v3688_v24  ;;  %v9470_v56 = vunpack.i.h.bf16 %v8524_v10 }
 0x8ef   : > { %v3689_v42 = vrot.slane %v5804_v21, 7  ;;  %v3839_v13 = vrot.slane %v5804_v21, 1  ;;  %v6593_v58 = vpack.i.bf16 %v4052_v25, %v4051_v45  ;;  %v3831_v28 = vmul.f32 %v6427_v54, %v5804_v21 }
 0x8f0   : > { %6589 = vrot.lane.b32.xlu0 %v6588_v15, %s9446_s29  ;;  %v5799_v37 = vpop.f32.mrb[28].mxu0  ;;  %v4050_v57 = vmul.f32 %v6411_v51, %v5804_v21  ;;  %v8736_v19 = vsel %vm1151_vm2, %v3841_v62, %v9371_v61  ;;  %v3985_v55 = vmul.f32 %v9470_v56, %v8723_v41  ;;  %v9471_v25 = vunpack.i.h.bf16 %v8532_v9 }
 0x8f1   : > { %v8744_v45 = vadd.f32 %v5799_v37, %v8666_v16  ;;  %6594 = vrot.lane.b32.xlu1 %v6593_v58, %s9451_s7  ;;  %v3658_v35 = vpop.f32.mrb[29].mxu0  ;;  %v6608_v54 = vpack.i.bf16 %v3832_v48, %v3831_v28  ;;  %v3842_v51 = vsel %vm1151_vm2, %v3839_v13, %v3841_v62  ;;  %v4310_v15 = vmul.f32 %v6536_v34, %v8736_v19 }
 0x8f2   : > { %v4245_v1 = vmul.f32 %v9471_v25, %v5804_v21  ;;  %v8750_v61 = vadd.f32 %v8666_v16, %v3658_v35  ;;  %v5800_v39 = vpop.f32.mrb[30].mxu0  ;;  %v6598_v50 = vpack.i.bf16 %v4050_v57, %v4049_v6  ;;  %v4309_v56 = vmul.f32 %v6532_v23, %v3842_v51  ;;  %v6778_v21 = vld [vmem:[%s9320_s17 + $0x30] sm:$0xff]  }
 0x8f3   : > { %v8753_v60 = vsel %vm999_vm3, %v3688_v24, %v3689_v42  ;;  %v3849_v48 = vrot.slane %v8744_v45, 1  ;;  %v8762_v34 = vadd.f32 %v5800_v39, %v8666_v16  ;;  %v3661_v62 = vpop.f32.mrb[31].mxu0  ;;  %v9472_v23 = vunpack.i.l.bf16 %v8522_v0  ;;  %4709 = vmatpush1.bf16.msra.mxu1 %v6778_v21  ;;  %v6779_v21 = vld [vmem:[%s9320_s17 + $0x38] sm:$0xff]  }
 0x8f4   : > { %v3695_v24 = vrot.slane %v8750_v61, 7  ;;  %v3845_v58 = vrot.slane %v8750_v61, 1  ;;  %v8770_v37 = vadd.f32 %v8666_v16, %v3661_v62  ;;  %6609 = vrot.lane.b32.xlu0 %v6608_v54, %s9446_s29  ;;  %v4616_v57 = vpack.c.bf16 %v4310_v15, %v4309_v56  ;;  %4710 = vmatprep.subr.bf16.mxu1 %v9454_v3 }
 0x8f5   : > { %v3986_v6 = vmul.f32 %v9472_v23, %v8753_v60  ;;  %v9473_v35 = vunpack.i.l.bf16 %v8566_v32  ;;  %v9474_v23 = vunpack.i.h.bf16 %v8570_v63  ;;  %6599 = vrot.lane.b32.xlu1 %v6598_v50, %s9451_s7  ;;  %v6603_v56 = vpack.i.bf16 %v4246_v52, %v4245_v1 }
 0x8f6   : > { %v3697_v16 = vrot.slane %v8770_v37, 7  ;;  %v3847_v54 = vrot.slane %v8770_v37, 1  ;;  %5208 = vmatprep.mubr.msk.bf16.mxu1 %vm1903_vm6, %v4616_v57  ;;  %v3840_v62 = vsel %vm1151_vm2, %v3838_v27, %v3839_v13  ;;  %v3861_v50 = vsel %vm1151_vm2, 0.0, %v3838_v27 }
 0x8f7   : > { %v8778_v0 = vmul.f32 %v9473_v35, %v8762_v34  ;;  %v8783_v28 = vmul.f32 %v9474_v23, %v8762_v34  ;;  %v6618_v15 = vpack.i.bf16 %v3986_v6, %v3985_v55  ;;  %v9475_v35 = vunpack.i.l.bf16 %v8526_v18  ;;  %4711 = vmatpush1.bf16.msra.mxu1 %v6779_v21 }
 0x8f8   : > { %v9476_v39 = vrot.slane %v8683_v29, 7  ;;  %v9477_v52 = vunpack.i.h.bf16 %v8528_v38  ;;  %v9478_v1 = vunpack.i.h.bf16 %v8518_v7  ;;  %v9479_v13 = vunpack.i.l.bf16 %v8524_v10  ;;  %4712 = vmatprep.subr.bf16.mxu1 %v9454_v3 }
 0x8f9   : > { %v4116_v23 = vmul.f32 %v9475_v35, %v3842_v51  ;;  %6619 = vrot.lane.b32.xlu0 %v6618_v15, %s9449_s4  ;;  %v9480_v35 = vunpack.i.h.bf16 %v8526_v18  ;;  %6604 = vrot.lane.b32.xlu1 %v6603_v56, %s9465_s0  ;;  %v9482_v15 = vunpack.i.h.bf16 %v8536_v40  ;;  %v9483_v7 = vunpack.i.l.bf16 %v8534_v49 }
 0x8fa   : > { %v8800_v25 = vsel %vm999_vm3, %v3689_v42, %v9476_v39  ;;  %v4115_v55 = vmul.f32 %v9477_v52, %v3840_v62  ;;  %v3918_v6 = vmul.f32 %v9478_v1, %v3861_v50  ;;  %v3919_v57 = vmul.f32 %v9479_v13, %v3840_v62  ;;  %v6780_v13 = vld [vmem:[%s9320_s17 + $0x40] sm:$0xff]  }
 0x8fb   : > { %v4181_v27 = vmul.f32 %v9480_v35, %v8753_v60  ;;  %v9481_v42 = vunpack.i.l.bf16 %v8532_v9  ;;  %v3920_v38 = vmul.f32 %v9482_v15, %v3842_v51  ;;  %v3921_v50 = vmul.f32 %v9483_v7, %v8736_v19  ;;  %4713 = vmatpush1.bf16.msra.mxu1 %v6780_v13 }
 0x8fc   : > { %v9484_v10 = vrot.slane %v8697_v22, 7  ;;  %v9485_v62 = vrot.slane %v8683_v29, 7  ;;  %v6623_v52 = vpack.i.bf16 %v4116_v23, %v4115_v55  ;;  %v6613_v56 = vpack.i.bf16 %v3919_v57, %v3918_v6 }
 0x8fd   : > { %v4182_v39 = vmul.f32 %v9481_v42, %v8800_v25  ;;  %v9486_v9 = vunpack.i.h.bf16 %v8534_v49  ;;  %v9487_v40 = vunpack.i.l.bf16 %v8540_v31  ;;  %v6633_v29 = vpack.i.bf16 %v3921_v50, %v3920_v38 }
 0x8fe   : > { %v8826_v18 = vsel %vm999_vm3, %v9485_v62, %v9484_v10  ;;  %v9488_v42 = vunpack.i.h.bf16 %v8542_v47  ;;  %v9489_v55 = vunpack.i.l.bf16 %v8548_v14  ;;  %6624 = vrot.lane.b32.xlu0 %v6623_v52, %s9464_s12  ;;  %v9490_v21 = vunpack.i.h.bf16 %v8548_v14  ;;  %6614 = vrot.lane.b32.xlu1 %v6613_v56, %s9456_s6 }
 0x8ff   : > { %v3987_v1 = vmul.f32 %v9486_v9, %v8800_v25  ;;  %v3988_v51 = vmul.f32 %v9487_v40, %v8826_v18  ;;  %v6628_v35 = vpack.i.bf16 %v4182_v39, %v4181_v27  ;;  %v9491_v57 = vunpack.i.l.bf16 %v8546_v4 }
 0x900   : > { %v4247_v23 = vmul.f32 %v9488_v42, %v8697_v22  ;;  %v4248_v49 = vmul.f32 %v9489_v55, %v8750_v61  ;;  %v3833_v6 = vmul.f32 %v9490_v21, %v8697_v22  ;;  %v9492_v39 = vunpack.i.h.bf16 %v8550_v17 }
 0x901   : > { %v6638_v31 = vpack.i.bf16 %v3988_v51, %v3987_v1  ;;  %v3834_v27 = vmul.f32 %v9491_v57, %v8750_v61  ;;  %v9493_v3 = vunpack.i.l.bf16 %v8556_v5  ;;  %v9494_v50 = vunpack.i.h.bf16 %v8558_v2 }
 0x902   : > { %v4053_v15 = vmul.f32 %v9492_v39, %v8750_v61  ;;  %v6643_v38 = vpack.i.bf16 %v4248_v49, %v4247_v23  ;;  %v9495_v10 = vunpack.i.l.bf16 %v8564_v33  ;;  %v9496_v9 = vunpack.i.h.bf16 %v8560_v59  ;;  %6629 = vrot.lane.b32.xlu0 %v6628_v35, %s9463_s26  ;;  %6634 = vrot.lane.b32.xlu1 %v6633_v29, %s9456_s6 }
 0x903   : > { %v4054_v7 = vmul.f32 %v9493_v3, %v8770_v37  ;;  %v8861_v14 = vmul.f32 %v9494_v50, %v8770_v37  ;;  %v6648_v52 = vpack.i.bf16 %v3834_v27, %v3833_v6  ;;  %v9497_v1 = vunpack.i.l.bf16 %v8558_v2 }
 0x904   : > { %v8866_v62 = vmul.f32 %v9495_v10, %v8744_v45  ;;  %v8871_v56 = vmul.f32 %v9496_v9, %v8770_v37  ;;  %v9498_v51 = vrot.slane %v8697_v22, 1  ;;  %v9499_v49 = vunpack.i.h.bf16 %v8538_v43 }
 0x905   : > { %v8876_v40 = vmul.f32 %v9497_v1, %v8744_v45  ;;  %v6653_v23 = vpack.i.bf16 %v4054_v7, %v4053_v15  ;;  %v9500_v2 = vunpack.i.l.bf16 %v8544_v11  ;;  %v3848_v13 = vsel %vm1151_vm2, %v3845_v58, %v3847_v54 }
 0x906   : > { %v3846_v42 = vsel %vm1151_vm2, %v9498_v51, %v3845_v58  ;;  %v6663_v55 = vpack.i.bf16 %v8866_v62, %v8861_v14  ;;  %v8888_v21 = vmul.f32 %v9499_v49, %v8736_v19  ;;  %v9501_v27 = vunpack.i.h.bf16 %v8546_v4  ;;  %6639 = vrot.lane.b32.xlu0 %v6638_v31, %s9449_s4  ;;  %6644 = vrot.lane.b32.xlu1 %v6643_v38, %s9465_s0 }
 0x907   : > { %v8892_v6 = vmul.f32 %v9500_v2, %v3846_v42  ;;  %v6658_v57 = vpack.i.bf16 %v8876_v40, %v8871_v56  ;;  %v9502_v19 = vrot.slane %v8697_v22, 7  ;;  %v9503_v15 = vunpack.i.l.bf16 %v8552_v12 }
 0x908   : > { %v3922_v43 = vmul.f32 %v9501_v27, %v3846_v42  ;;  %v9504_v58 = vunpack.i.h.bf16 %v8544_v11  ;;  %v9505_v4 = vunpack.i.l.bf16 %v8542_v47  ;;  %v9506_v22 = vunpack.i.h.bf16 %v8568_v20 }
 0x909   : > { %v3696_v39 = vsel %vm999_vm3, %v9502_v19, %v3695_v24  ;;  %v6668_v35 = vpack.i.bf16 %v8892_v6, %v8888_v21  ;;  %v3923_v3 = vmul.f32 %v9503_v15, %v3848_v13  ;;  %v3698_v29 = vsel %vm999_vm3, %v3695_v24, %v3697_v16  ;;  %v8960_v19 = vpop.permute.xlu1 %6574 }
 0x90a   : > { %v4183_v7 = vmul.f32 %v9504_v58, %v8826_v18  ;;  %v4184_v50 = vmul.f32 %v9505_v4, %v3696_v39  ;;  %v4055_v14 = vmul.f32 %v9506_v22, %v8744_v45  ;;  %v9507_v10 = vunpack.i.h.bf16 %v8552_v12  ;;  %6649 = vrot.lane.b32.xlu0 %v6648_v52, %s9446_s29  ;;  %6654 = vrot.lane.b32.xlu1 %v6653_v23, %s9451_s7 }
 0x90b   : > { %v3850_v47 = vsel %vm1151_vm2, %v3847_v54, %v3849_v48  ;;  %v6678_v11 = vpack.i.bf16 %v3923_v3, %v3922_v43  ;;  %v9508_v56 = vunpack.i.l.bf16 %v8550_v17  ;;  %v9509_v40 = vrot.slane %v8762_v34, 1 }
 0x90c   : > { %v3989_v62 = vmul.f32 %v9507_v10, %v3696_v39  ;;  %v6673_v9 = vpack.i.bf16 %v4184_v50, %v4183_v7  ;;  %v6683_v12 = vpack.i.bf16 %v8778_v0, %v4055_v14  ;;  %v9510_v24 = vunpack.i.h.bf16 %v8564_v33 }
 0x90d   : > { %v3990_v1 = vmul.f32 %v9508_v56, %v3698_v29  ;;  %v3852_v61 = vsel %vm1151_vm2, %v3849_v48, %v9509_v40  ;;  %v9511_v54 = vunpack.i.l.bf16 %v8562_v36  ;;  %v9512_v21 = vunpack.i.h.bf16 %v8556_v5 }
 0x90e   : > { %v3924_v51 = vmul.f32 %v9510_v24, %v3850_v47  ;;  %v9513_v6 = vunpack.i.l.bf16 %v8554_v53  ;;  %v9514_v48 = vrot.slane %v8762_v34, 7  ;;  %v9515_v31 = vrot.slane %v8744_v45, 7  ;;  %6664 = vrot.lane.b32.xlu0 %v6663_v55, %s9446_s29  ;;  %6659 = vrot.lane.b32.xlu1 %v6658_v57, %s9465_s0  ;;  %v9538_v55 = vld [vmem:[#allocation16_spill] sm:$0xff]  ;;  %s4950_s29 = sshll.u32 %s8384_s8, 4 }
 0x90f   : > { %v3925_v49 = vmul.f32 %v9511_v54, %v3852_v61  ;;  %v4119_v17 = vmul.f32 %v9512_v21, %v3848_v13  ;;  %v6688_v2 = vpack.i.bf16 %v3990_v1, %v3989_v62  ;;  %v9517_v15 = vunpack.i.h.bf16 %v8572_v46 }
 0x910   : > { %v4120_v27 = vmul.f32 %v9513_v6, %v3850_v47  ;;  %v3927_v0 = vsel %vm999_vm3, %v9515_v31, %v9514_v48  ;;  %v9516_v33 = vmov %v9514_v48  ;;  %v9518_v3 = vunpack.i.l.bf16 %v8570_v63 }
 0x911   : > { %v4124_v43 = vsel %vm999_vm3, %v9516_v33, 0.0  ;;  %v6708_v5 = vpack.i.bf16 %v3925_v49, %v3924_v51  ;;  %v4187_v38 = vmul.f32 %v9517_v15, %v3927_v0  ;;  %v9519_v7 = vmov %v9515_v31 }
 0x912   : > { %v4188_v58 = vmul.f32 %v9518_v3, %v4124_v43  ;;  %v8971_v4 = vsel %vm999_vm3, %v3697_v16, %v9519_v7  ;;  %v6693_v50 = vpack.i.bf16 %v4120_v27, %v4119_v17  ;;  %v9520_v22 = vunpack.i.h.bf16 %v8554_v53  ;;  %6669 = vrot.lane.b32.xlu0 %v6668_v35, %s9464_s12  ;;  %6679 = vrot.lane.b32.xlu1 %v6678_v11, %s9456_s6  ;;  %v9056_v35 = vpop.permute.xlu1 %6579 }
 0x913   : > { %v9521_v10 = vunpack.i.l.bf16 %v8560_v59  ;;  %v9522_v56 = vmov %v9509_v40  ;;  %v9523_v37 = vunpack.i.h.bf16 %v8566_v32  ;;  %v9524_v1 = vunpack.i.l.bf16 %v8572_v46 }
 0x914   : > { %v4185_v14 = vmul.f32 %v9520_v22, %v3698_v29  ;;  %v8981_v63 = vsel %vm1151_vm2, %v9522_v56, 0.0  ;;  %v6718_v45 = vpack.i.bf16 %v4188_v58, %v4187_v38  ;;  %v9525_v40 = vunpack.i.h.bf16 %v8562_v36 }
 0x915   : > { %v4186_v62 = vmul.f32 %v9521_v10, %v8971_v4  ;;  %v4121_v16 = vmul.f32 %v9523_v37, %v3852_v61  ;;  %v4122_v53 = vmul.f32 %v9524_v1, %v8981_v63  ;;  %v6576_v24 = vunpack.i.l.bf16 %v8960_v19 }
 0x916   : > { %v3991_v59 = vmul.f32 %v9525_v40, %v8971_v4  ;;  %v9526_v51 = vunpack.i.l.bf16 %v8568_v20  ;;  %v9527_v32 = vunpack.i.h.bf16 %v8511_v26  ;;  %v9528_v46 = vunpack.i.l.bf16 %v8516_v8  ;;  %6674 = vrot.lane.b32.xlu0 %v6673_v9, %s9463_s26  ;;  %6684 = vrot.lane.b32.xlu1 %v6683_v12, %s9451_s7 }
 0x917   : > { %v6698_v34 = vpack.i.bf16 %v4186_v62, %v4185_v14  ;;  %v6703_v49 = vpack.i.bf16 %v4122_v53, %v4121_v16  ;;  %v9529_v36 = vunpack.i.h.bf16 %v8516_v8  ;;  %v9530_v23 = vunpack.i.l.bf16 %v8514_v30  ;;  %v9535_v8 = vld [vmem:[#allocation15_spill] sm:$0xff] }
 0x918   : > { %v3992_v52 = vmul.f32 %v9526_v51, %v3927_v0  ;;  %v3766_v54 = vmul.f32 %v9527_v32, %v8723_v41  ;;  %v9002_v21 = vmul.f32 %v9528_v46, %v8753_v60  ;;  %v9531_v27 = vunpack.i.h.bf16 %v8514_v30  ;;  %v9533_v60 = vld [vmem:[#allocation17_spill] sm:$0xff] }
 0x919   : > { %v9007_v17 = vmul.f32 %v9529_v36, %v8800_v25  ;;  %v9012_v20 = vmul.f32 %v9530_v23, %v8826_v18  ;;  %v9532_v48 = vunpack.i.h.bf16 %v8574_v44  ;;  %v9534_v0 = vunpack.i.l.bf16 %v9533_v60 }
 0x91a   : > { %v6713_v6 = vpack.i.bf16 %v3992_v52, %v3991_v59  ;;  %v9016_v41 = vmul.f32 %v9531_v27, %v3696_v39  ;;  %v9536_v25 = vunpack.i.l.bf16 %v9535_v8  ;;  %v9537_v18 = vunpack.i.h.bf16 %v9533_v60  ;;  %6689 = vrot.lane.b32.xlu0 %v6688_v2, %s9449_s4  ;;  %6709 = vrot.lane.b32.xlu1 %v6708_v5, %s9456_s6  ;;  %s9069_s6 = scalar_lea.vmem [#allocation4], %s4950_s29  ;;  %s6785_s29 = sshll.u32 %s6920_s9, 4  ;;  %s6786_s29 = int_to_ptr.vmem [resolvable:$false] %s6785_s29 }
 0x91b   : > { %v9020_v31 = vmul.f32 %v9532_v48, %v3846_v42  ;;  %v9024_v33 = vmul.f32 %v9534_v0, %v3848_v13  ;;  %v9035_v30 = vmul.f32 %v6576_v24, %v3852_v61  ;;  %v6531_v57 = vunpack.i.l.bf16 %v9538_v55  ;;  %s6787_s7 = scalar_lea.vmem %s6786_s29, 512 }
 0x91c   : > { %v9029_v43 = vmul.f32 %v9536_v25, %v3698_v29  ;;  %v9033_v15 = vmul.f32 %v9537_v18, %v3850_v47  ;;  %v6376_v61 = vunpack.i.l.bf16 %v8511_v26 }
 0x91d   : > { %v4618_v44 = vpack.c.bf16 %v9024_v33, %v9020_v31  ;;  %v4252_v13 = vmul.f32 0.0, %v6531_v57 }
 0x91e   : > { %v4620_v42 = vpack.c.bf16 %v9035_v30, %v9033_v15  ;;  %6694 = vrot.lane.b32.xlu0 %v6693_v50, %s9464_s12  ;;  %6719 = vrot.lane.b32.xlu1 %v6718_v45, %s9463_s26  ;;  %v3765_v3 = vmul.f32 0.0, %v6376_v61  ;;  %v6582_v30 = vunpack.i.h.bf16 %v9056_v35 }
 0x91f   : > { %v6723_v39 = vpack.i.bf16 %v4252_v13, %v8783_v28  ;;  %v5115_v28 = vld [vmem:[%s9323_s20] ss:$0 sm:$0xff] }
 0x922   : > { %6699 = vrot.lane.b32.xlu0 %v6698_v34, %s9463_s26  ;;  %s4809_s26 = sshll.u32 %s9069_s6, 4  ;;  %s9165_s26 = int_to_ptr.vmem [resolvable:$true] %s4809_s26 }
 0x923   : > { %s6781_s1 = scalar_lea.vmem %s9165_s26, 256  ;;  %p6788_p0 = scmp.lt.s32.totalorder %s9165_s26, %s6786_s29 }
 0x924   : > { %p6782_p11 = scmp.ne.s32.totalorder %s9165_s26, %s6781_s1  ;;  %p6789_p1 = scmp.lt.s32.totalorder %s6787_s7, %s6781_s1 }
 0x926   : > { %6704 = vrot.lane.b32.xlu0 %v6703_v49, %s9464_s12  ;;  %s4774_s12 = sand.u32 1, %s7090_s3   ;;  %p6783_p12 = pnand %p6782_p11, %p7109_p5 }
 0x927   : > { %s9174_s18 = scalar_lea.sflag [#allocation5], %s4774_s12  ;;  %p6790_p2 = por %p6789_p1, %p6788_p0 }
 0x928   : > { %p6784_p13 = pneg %p6783_p12 }
 0x92a   : > { %6714 = vrot.lane.b32.xlu0 %v6713_v6, %s9449_s4  ;;  %p6791_p3 = pnand %p6790_p2, %p6784_p13 }
 0x92e   : > { %6724 = vrot.lane.b32.xlu0 %v6723_v39, %s9465_s0  ;;  %s5224_s0 = sshll.u32 %s7090_s3, 8 }
 0x92f   : > { %s9172_s13 = scalar_lea.hbm %s9330_s27, %s5224_s0 }
 0x962   : > { %v6590_v29 = vpop.permute.xlu0 %6589 }
 0x963   : > { %v9058_v47 = vpop.permute.xlu1 %6594  ;;  %v6591_v2 = vunpack.i.l.bf16 %v6590_v29  ;;  %v6592_v38 = vunpack.i.h.bf16 %v6590_v29 }
 0x965   : > { %v4541_v14 = vsel %vm1903_vm6, %v3765_v3, %v6591_v2  ;;  %v4542_v26 = vsel %vm1903_vm6, %v3766_v54, %v6592_v38 }
 0x966   : > { %v9060_v11 = vpop.permute.xlu0 %6609 }
 0x967   : > { %v6600_v9 = vpop.permute.xlu1 %6599  ;;  %v6611_v2 = vunpack.i.l.bf16 %v9060_v11 }
 0x968   : > { %v6602_v1 = vunpack.i.h.bf16 %v6600_v9  ;;  %v6601_v53 = vunpack.i.l.bf16 %v6600_v9 }
 0x96b   : > { %v6620_v12 = vpop.permute.xlu0 %6619  ;;  %v6605_v5 = vpop.permute.xlu1 %6604 }
 0x96c   : > { %v6622_v40 = vunpack.i.h.bf16 %v6620_v12  ;;  %v6621_v59 = vunpack.i.l.bf16 %v6620_v12  ;;  %v6607_v48 = vunpack.i.h.bf16 %v6605_v5  ;;  %v6606_v60 = vunpack.i.l.bf16 %v6605_v5 }
 0x96d   : > { %v3558_v58 = vpop.f32.mrb[8].mxu1  ;;  %v6612_v12 = vunpack.i.h.bf16 %v9060_v11 }
 0x96e   : > { %v3559_v7 = vadd.f32 %v5115_v28, %v3558_v58  ;;  %v3560_v50 = vpop.f32.mrb[9].mxu1 }
 0x96f   : > { %v3561_v10 = vpop.f32.mrb[10].mxu1  ;;  %v4544_v31 = vsel %vm1903_vm6, %v9007_v17, %v6612_v12 }
 0x970   : > { %v6625_v22 = vpop.permute.xlu0 %6624  ;;  %v6615_v62 = vpop.permute.xlu1 %6614  ;;  %3565 = vst.msk [vmem:[%s9069_s6] sm:$0xff] %vm1903_vm6, %v3559_v7  ;;  %v3562_v56 = vadd.f32 %v5115_v28, %v3561_v10  ;;  %v4543_v7 = vsel %vm1903_vm6, %v9002_v21, %v6611_v2  ;;  %v6596_v21 = vunpack.i.l.bf16 %v9058_v47 }
 0x971   : > { %v6617_v45 = vunpack.i.h.bf16 %v6615_v62  ;;  %v6616_v37 = vunpack.i.l.bf16 %v6615_v62  ;;  %v3563_v16 = vpop.f32.mrb[11].mxu1  ;;  %v6627_v24 = vunpack.i.h.bf16 %v6625_v22  ;;  %v6626_v34 = vunpack.i.l.bf16 %v6625_v22 }
 0x972   : > { %3566 = vst.msk [vmem:[%s9069_s6 + $0x8] sm:$0xff] %vm1903_vm6, %v3562_v56 }
 0x973   : > { %v4550_v51 = vsel %vm1921_vm9, %v4542_v26, %v6617_v45  ;;  %v4549_v52 = vsel %vm1921_vm9, %v4541_v14, %v6616_v37  ;;  %v6597_v26 = vunpack.i.h.bf16 %v9058_v47 }
 0x974   : > { %v6630_v32 = vpop.permute.xlu0 %6629  ;;  %v4557_v54 = vsel %vm1939_vm10, %v4549_v52, %v6621_v59  ;;  %v4558_v49 = vsel %vm1939_vm10, %v4550_v51, %v6622_v40  ;;  %v6635_v23 = vpop.permute.xlu1 %6634 }
 0x975   : > { %v6632_v46 = vunpack.i.h.bf16 %v6630_v32  ;;  %v6631_v36 = vunpack.i.l.bf16 %v6630_v32  ;;  %v4565_v6 = vsel %vm1957_vm12, %v4557_v54, %v6601_v53  ;;  %v4566_v27 = vsel %vm1957_vm12, %v4558_v49, %v6602_v1 }
 0x976   : > { %v4573_v0 = vsel %vm2408_vm7, %v4565_v6, %v6626_v34  ;;  %v4574_v8 = vsel %vm2408_vm7, %v4566_v27, %v6627_v24  ;;  %v6637_v28 = vunpack.i.h.bf16 %v6635_v23  ;;  %v6636_v38 = vunpack.i.l.bf16 %v6635_v23 }
 0x977   : > { %v4581_v25 = vsel %vm2411_vm8, %v4573_v0, %v6631_v36  ;;  %v4582_v18 = vsel %vm2411_vm8, %v4574_v8, %v6632_v46  ;;  %v6581_v8 = vunpack.i.l.bf16 %v9056_v35 }
 0x978   : > { %v6640_v55 = vpop.permute.xlu0 %6639  ;;  %v6645_v57 = vpop.permute.xlu1 %6644  ;;  %v4589_v13 = vsel %vm2414_vm11, %v4581_v25, %v6606_v60  ;;  %v4590_v39 = vsel %vm2414_vm11, %v4582_v18, %v6607_v48  ;;  %v4551_v50 = vsel %vm1921_vm9, %v4543_v7, %v6636_v38  ;;  %v4552_v22 = vsel %vm1921_vm9, %v4544_v31, %v6637_v28 }
 0x979   : > { %v4615_v29 = vpack.c.bf16 %v4590_v39, %v4589_v13  ;;  %v6642_v3 = vunpack.i.h.bf16 %v6640_v55  ;;  %v6641_v58 = vunpack.i.l.bf16 %v6640_v55  ;;  %v6647_v1 = vunpack.i.h.bf16 %v6645_v57 }
 0x97a   : > { %v6646_v53 = vunpack.i.l.bf16 %v6645_v57 }
 0x97b   : > { %4729 = vmatmul.mubr.bf16.vlgmr.msra.gmra.mrb[12].mxu1 %v4615_v29  ;;  %v4560_v11 = vsel %vm1939_vm10, %v4552_v22, %v6642_v3  ;;  %v4559_v14 = vsel %vm1939_vm10, %v4551_v50, %v6641_v58  ;;  %v4315_v29 = vmul.f32 %v6581_v8, %v8981_v63  ;;  %v4316_v63 = vmul.f32 0.0, %v6582_v30 }
 0x97c   : > { %v6650_v9 = vpop.permute.xlu0 %6649  ;;  %5209 = vmatprep.mubr.msk.bf16.mxu1 %vm1903_vm6, %v4618_v44  ;;  %v9091_v61 = vpop.permute.xlu1 %6654  ;;  %v4567_v17 = vsel %vm1957_vm12, %v4559_v14, %v6596_v21  ;;  %v4568_v45 = vsel %vm1957_vm12, %v4560_v11, %v6597_v26  ;;  %v6577_v11 = vunpack.i.h.bf16 %v8960_v19 }
 0x97d   : > { %v6652_v52 = vunpack.i.h.bf16 %v6650_v9  ;;  %v6651_v47 = vunpack.i.l.bf16 %v6650_v9  ;;  %v6656_v15 = vunpack.i.l.bf16 %v9091_v61  ;;  %v4622_v21 = vpack.c.bf16 %v4316_v63, %v4315_v29 }
 0x97f   : > { %v4545_v48 = vsel %vm1903_vm6, %v9012_v20, %v6651_v47  ;;  %v4546_v60 = vsel %vm1903_vm6, %v9016_v41, %v6652_v52  ;;  %v6657_v41 = vunpack.i.h.bf16 %v9091_v61 }
 0x980   : > { %v9095_v5 = vpop.permute.xlu0 %6664  ;;  %v9101_v33 = vpop.permute.xlu1 %6659 }
 0x981   : > { %v6662_v38 = vunpack.i.h.bf16 %v9101_v33  ;;  %v6661_v3 = vunpack.i.l.bf16 %v9101_v33  ;;  %v6667_v14 = vunpack.i.h.bf16 %v9095_v5  ;;  %v6666_v33 = vunpack.i.l.bf16 %v9095_v5 }
 0x984   : > { %v6670_v44 = vpop.permute.xlu0 %6669  ;;  %v6680_v24 = vpop.permute.xlu1 %6679 }
 0x985   : > { %v6672_v10 = vunpack.i.h.bf16 %v6670_v44  ;;  %v6671_v62 = vunpack.i.l.bf16 %v6670_v44  ;;  %v6682_v46 = vunpack.i.h.bf16 %v6680_v24  ;;  %v6681_v36 = vunpack.i.l.bf16 %v6680_v24 }
 0x987   : > { %v4576_v40 = vsel %vm2408_vm7, %v4568_v45, %v6672_v10  ;;  %v4575_v59 = vsel %vm2408_vm7, %v4567_v17, %v6671_v62  ;;  %v4554_v25 = vsel %vm1921_vm9, %v4546_v60, %v6682_v46  ;;  %v4553_v18 = vsel %vm1921_vm9, %v4545_v48, %v6681_v36 }
 0x988   : > { %v6675_v56 = vpop.permute.xlu0 %6674  ;;  %v6685_v55 = vpop.permute.xlu1 %6684  ;;  %v4547_v45 = vsel %vm1903_vm6, %v9029_v43, %v6666_v33 }
 0x989   : > { %v6677_v37 = vunpack.i.h.bf16 %v6675_v56  ;;  %v6676_v16 = vunpack.i.l.bf16 %v6675_v56  ;;  %v3772_v56 = vmul.f32 %v6577_v11, %v8971_v4  ;;  %v6686_v5 = vunpack.i.l.bf16 %v6685_v55 }
 0x98b   : > { %v4583_v34 = vsel %vm2411_vm8, %v4575_v59, %v6676_v16  ;;  %v4584_v51 = vsel %vm2411_vm8, %v4576_v40, %v6677_v37  ;;  %v4548_v37 = vsel %vm1903_vm6, %v3772_v56, %v6667_v14 }
 0x98c   : > { %v6690_v32 = vpop.permute.xlu0 %6689  ;;  %v4591_v54 = vsel %vm2414_vm11, %v4583_v34, %v6646_v53  ;;  %v4592_v49 = vsel %vm2414_vm11, %v4584_v51, %v6647_v1  ;;  %v6710_v61 = vpop.permute.xlu1 %6709  ;;  %v6687_v53 = vunpack.i.h.bf16 %v6685_v55 }
 0x98d   : > { %v4617_v23 = vpack.c.bf16 %v4592_v49, %v4591_v54  ;;  %v6692_v6 = vunpack.i.h.bf16 %v6690_v32  ;;  %v6691_v27 = vunpack.i.l.bf16 %v6690_v32  ;;  %v6712_v62 = vunpack.i.h.bf16 %v6710_v61 }
 0x98e   : > { %v6711_v26 = vunpack.i.l.bf16 %v6710_v61 }
 0x98f   : > { %4737 = vmatmul.mubr.bf16.gmra.mrb[16].mxu1 %v4617_v23  ;;  %v4562_v57 = vsel %vm1939_vm10, %v4554_v25, %v6692_v6  ;;  %v4561_v20 = vsel %vm1939_vm10, %v4553_v18, %v6691_v27  ;;  %v4556_v59 = vsel %vm1921_vm9, %v4548_v37, %v6712_v62 }
 0x990   : > { %5210 = vmatprep.mubr.msk.bf16.mxu1 %vm1903_vm6, %v4620_v42  ;;  %v6695_v0 = vpop.permute.xlu0 %6694  ;;  %v4569_v9 = vsel %vm1957_vm12, %v4561_v20, %v6656_v15  ;;  %v4570_v12 = vsel %vm1957_vm12, %v4562_v57, %v6657_v41  ;;  %v6720_v19 = vpop.permute.xlu1 %6719  ;;  %v4555_v40 = vsel %vm1921_vm9, %v4547_v45, %v6711_v26 }
 0x991   : > { %v6697_v13 = vunpack.i.h.bf16 %v6695_v0  ;;  %v6696_v39 = vunpack.i.l.bf16 %v6695_v0  ;;  %v6722_v52 = vunpack.i.h.bf16 %v6720_v19  ;;  %v6721_v43 = vunpack.i.l.bf16 %v6720_v19 }
 0x993   : > { %v4577_v58 = vsel %vm2408_vm7, %v4569_v9, %v6696_v39  ;;  %v4578_v7 = vsel %vm2408_vm7, %v4570_v12, %v6697_v13 }
 0x994   : > { %v6700_v42 = vpop.permute.xlu0 %6699 }
 0x995   : > { %v6702_v2 = vunpack.i.h.bf16 %v6700_v42  ;;  %v6701_v28 = vunpack.i.l.bf16 %v6700_v42 }
 0x997   : > { %v4585_v35 = vsel %vm2411_vm8, %v4577_v58, %v6701_v28  ;;  %v4586_v31 = vsel %vm2411_vm8, %v4578_v7, %v6702_v2 }
 0x998   : > { %v6705_v44 = vpop.permute.xlu0 %6704  ;;  %v4593_v50 = vsel %vm2414_vm11, %v4585_v35, %v6661_v3  ;;  %v4594_v22 = vsel %vm2414_vm11, %v4586_v31, %v6662_v38 }
 0x999   : > { %v4619_v10 = vpack.c.bf16 %v4594_v22, %v4593_v50  ;;  %v6707_v24 = vunpack.i.h.bf16 %v6705_v44  ;;  %v6706_v4 = vunpack.i.l.bf16 %v6705_v44 }
 0x99b   : > { %4745 = vmatmul.mubr.bf16.gmra.mrb[20].mxu1 %v4619_v10 }
 0x99c   : > { %v6715_v17 = vpop.permute.xlu0 %6714  ;;  %5211 = vmatprep.mubr.msk.bf16.mxu1 %vm1903_vm6, %v4622_v21 }
 0x99d   : > { %v6717_v16 = vunpack.i.h.bf16 %v6715_v17  ;;  %v6716_v1 = vunpack.i.l.bf16 %v6715_v17 }
 0x99f   : > { %v4564_v34 = vsel %vm1939_vm10, %v4556_v59, %v6717_v16  ;;  %v4563_v51 = vsel %vm1939_vm10, %v4555_v40, %v6716_v1 }
 0x9a0   : > { %v4572_v47 = vsel %vm1957_vm12, %v4564_v34, %v6687_v53  ;;  %v4571_v32 = vsel %vm1957_vm12, %v4563_v51, %v6686_v5  ;;  %v6725_v54 = vpop.permute.xlu0 %6724 }
 0x9a1   : > { %v6727_v49 = vunpack.i.h.bf16 %v6725_v54  ;;  %v6726_v46 = vunpack.i.l.bf16 %v6725_v54  ;;  %v4579_v36 = vsel %vm2408_vm7, %v4571_v32, %v6706_v4  ;;  %v4580_v23 = vsel %vm2408_vm7, %v4572_v47, %v6707_v24 }
 0x9a2   : > { %v4587_v6 = vsel %vm2411_vm8, %v4579_v36, %v6721_v43  ;;  %v4588_v27 = vsel %vm2411_vm8, %v4580_v23, %v6722_v52 }
 0x9a3   : > { %v4595_v48 = vsel %vm2414_vm11, %v4587_v6, %v6726_v46  ;;  %v4596_v60 = vsel %vm2414_vm11, %v4588_v27, %v6727_v49 }
 0x9a4   : > { %v4621_v0 = vpack.c.bf16 %v4596_v60, %v4595_v48 }
 0x9a6   : > { %4753 = vmatmul.mubr.bf16.gmra.mrb[24].mxu1 %v4621_v0 }
 0x9a7   : > { %6794 = shalt.err (!%p6791_p3)
}
 0x9a8   : > { %s6795_s4 = scalar_lea.hbm %s9172_s13, 256  ;;  %s6799_s0 = scalar_lea.hbm %s9330_s27, 512 }
 0x9a9   : > { %p6796_p4 = scmp.ne.s32.totalorder %s9172_s13, %s6795_s4  ;;  %p6800_p9 = scmp.lt.u32.totalorder %s9172_s13, %s9330_s27 }
 0x9aa   : > { %p6801_p10 = scmp.lt.u32.totalorder %s6799_s0, %s6795_s4  ;;  %p6803_p12 = scmp.lt.u32.totalorder %s6795_s4, %s9172_s13 }
 0x9ab   : > { %p6797_p7 = pnand %p6796_p4, %p7109_p5 }
 0x9ac   : > { %p6802_p11 = por %p6801_p10, %p6800_p9 }
 0x9ad   : > { %p6798_p8 = pneg %p6797_p7 }
 0x9ae   : > { %p6804_p13 = por %p6803_p12, %p6802_p11 }
 0x9b0   : > { %p6805_p0 = pnand %p6804_p13, %p6798_p8 }
 0x9b2   : > { %6808 = shalt.err (!%p6805_p0)
}
 0x9b3   : > { %s6921_s1 = smov 128   ;;  %s9539_s9 = smov 8  }
 0x9b4   : > { %5827 = dma.vmem_to_hbm [thread:$0]  (%p7109_p5), %s9165_s26, 256, %s9172_s13, %s9174_s18, %s6921_s1, %s6921_s1, %s9539_s9  }
 0x9b5   : > { %s5219_s29 = sshll.u32 %s7090_s3, 6  ;;  %s4825_s12 = sshll.u32 %s8396_s30, 4  ;;  %s4826_s12 = int_to_ptr.vmem [resolvable:$true] %s4825_s12 }
 0x9b6   : > { %s9205_s4 = scalar_lea.hbm %s9331_s28, %s5219_s29  ;;  %s6809_s0 = scalar_lea.vmem %s4826_s12, 64 }
 0x9b7   : > { %p6810_p1 = scmp.ne.s32.totalorder %s4826_s12, %s6809_s0  ;;  %s6922_s15 = smov [#allocation6]  }
 0x9b8   : > { %s6813_s16 = sshll.u32 %s6922_s15, 4  ;;  %s6814_s16 = int_to_ptr.vmem [resolvable:$false] %s6813_s16 }
 0x9b9   : > { %p6811_p2 = pnand %p6810_p1, %p7109_p5  ;;  %s6815_s10 = scalar_lea.vmem %s6814_s16, 128 }
 0x9ba   : > { %p6816_p4 = scmp.lt.s32.totalorder %s4826_s12, %s6814_s16  ;;  %p6817_p7 = scmp.lt.s32.totalorder %s6815_s10, %s6809_s0 }
 0x9bb   : > { %p6812_p3 = pneg %p6811_p2 }
 0x9bc   : > { %p6818_p8 = por %p6817_p7, %p6816_p4 }
 0x9be   : > { %p6819_p9 = pnand %p6818_p8, %p6812_p3 }
 0x9c0   : > { %6822 = shalt.err (!%p6819_p9)
}
 0x9c1   : > { %s6823_s30 = scalar_lea.hbm %s9205_s4, 64  ;;  %s6827_s29 = scalar_lea.hbm %s9331_s28, 128 }
 0x9c2   : > { %p6824_p10 = scmp.ne.s32.totalorder %s9205_s4, %s6823_s30  ;;  %p6828_p13 = scmp.lt.u32.totalorder %s9205_s4, %s9331_s28 }
 0x9c3   : > { %p6829_p0 = scmp.lt.u32.totalorder %s6827_s29, %s6823_s30  ;;  %p6831_p2 = scmp.lt.u32.totalorder %s6823_s30, %s9205_s4 }
 0x9c4   : > { %p6825_p11 = pnand %p6824_p10, %p7109_p5 }
 0x9c5   : > { %p6830_p1 = por %p6829_p0, %p6828_p13 }
 0x9c6   : > { %p6826_p12 = pneg %p6825_p11 }
 0x9c7   : > { %p6832_p3 = por %p6831_p2, %p6830_p1 }
 0x9c9   : > { %p6833_p4 = pnand %p6832_p3, %p6826_p12 }
 0x9cb   : > { %6836 = shalt.err (!%p6833_p4)
}
 0x9cc   : > { %5828 = dma.vmem_to_hbm [thread:$0]  (%p7109_p5), %s4826_s12, 64, %s9205_s4, %s9174_s18  }
 0x9cd   : > { %s4949_s10 = sshll.u32 %s8384_s8, 6  ;;  %s9540_s16 = sld [smem:[#allocation34_spill]] }
 0x9ce   : > { %s9230_s26 = scalar_lea.vmem [#allocation2], %s4949_s10  ;;  %s5223_s4 = sshll.u32 %s7090_s3, 10 }
 0x9cf   : > { %s4793_s18 = sshll.u32 %s9230_s26, 4  ;;  %s9541_s13 = sld [smem:[#allocation35_spill]]  ;;  %s9246_s18 = int_to_ptr.vmem [resolvable:$true] %s4793_s18 }
 0x9d0   : > { %s4770_s3 = scalar_lea.sflag [#allocation3], %s8384_s8  ;;  %s6837_s7 = scalar_lea.vmem %s9246_s18, 1024 }
 0x9d1   : > { %p6838_p7 = scmp.ne.s32.totalorder %s9246_s18, %s6837_s7  ;;  %s6923_s6 = smov [#allocation2]  }
 0x9d2   : > { %s6841_s10 = sshll.u32 %s6923_s6, 4  ;;  %s6842_s10 = int_to_ptr.vmem [resolvable:$false] %s6841_s10 }
 0x9d3   : > { %v5198_v8 = vld [vmem:[%s9540_s16] ss:$0 sm:$0xff]  ;;  %p6839_p8 = pnand %p6838_p7, %p7109_p5  ;;  %s6843_s0 = scalar_lea.vmem %s6842_s10, 2048 }
 0x9d4   : > { %p6844_p10 = scmp.lt.s32.totalorder %s9246_s18, %s6842_s10  ;;  %p6845_p11 = scmp.lt.s32.totalorder %s6843_s0, %s6837_s7 }
 0x9d5   : > { %s9253_s29 = scalar_lea.hbm %s9541_s13, %s5223_s4  ;;  %p6840_p9 = pneg %p6839_p8 }
 0x9d6   : > { %p6846_p12 = por %p6845_p11, %p6844_p10 }
 0x9d8   : > { %p6847_p13 = pnand %p6846_p12, %p6840_p9 }
 0xa4e   : > { %v4730_v25 = vpop.f32.mrb[12].mxu1 }
 0xa4f   : > { %v4731_v18 = vadd.f32 %v5198_v8, %v4730_v25  ;;  %v4732_v55 = vpop.f32.mrb[13].mxu1 }
 0xa50   : > { %v4733_v57 = vpop.f32.mrb[14].mxu1 }
 0xa51   : > { %4761 = vst.msk [vmem:[%s9230_s26] sm:$0xff] %vm1903_vm6, %v4731_v18  ;;  %v4734_v20 = vadd.f32 %v5198_v8, %v4733_v57  ;;  %v4735_v13 = vpop.f32.mrb[15].mxu1 }
 0xa53   : > { %4762 = vst.msk [vmem:[%s9230_s26 + $0x8] sm:$0xff] %vm1903_vm6, %v4734_v20 }
 0xa62   : > { %v4738_v39 = vpop.f32.mrb[16].mxu1 }
 0xa63   : > { %v4739_v41 = vadd.f32 %v5198_v8, %v4738_v39  ;;  %v4740_v15 = vpop.f32.mrb[17].mxu1 }
 0xa64   : > { %v4741_v30 = vpop.f32.mrb[18].mxu1 }
 0xa65   : > { %4763 = vst.msk [vmem:[%s9230_s26 + $0x10] sm:$0xff] %vm1903_vm6, %v4739_v41  ;;  %v4742_v42 = vadd.f32 %v5198_v8, %v4741_v30  ;;  %v4743_v29 = vpop.f32.mrb[19].mxu1 }
 0xa67   : > { %4764 = vst.msk [vmem:[%s9230_s26 + $0x18] sm:$0xff] %vm1903_vm6, %v4742_v42 }
 0xa6e   : > { %v4746_v9 = vpop.f32.mrb[20].mxu1 }
 0xa6f   : > { %v4747_v12 = vadd.f32 %v5198_v8, %v4746_v9  ;;  %v4748_v2 = vpop.f32.mrb[21].mxu1 }
 0xa70   : > { %v4749_v28 = vpop.f32.mrb[22].mxu1 }
 0xa71   : > { %4765 = vst.msk [vmem:[%s9230_s26 + $0x20] sm:$0xff] %vm1903_vm6, %v4747_v12  ;;  %v4750_v38 = vadd.f32 %v5198_v8, %v4749_v28  ;;  %v4751_v3 = vpop.f32.mrb[23].mxu1 }
 0xa73   : > { %4766 = vst.msk [vmem:[%s9230_s26 + $0x28] sm:$0xff] %vm1903_vm6, %v4750_v38 }
 0xa79   : > { %v4754_v58 = vpop.f32.mrb[24].mxu1 }
 0xa7a   : > { %v4755_v7 = vadd.f32 %v5198_v8, %v4754_v58  ;;  %v4756_v61 = vpop.f32.mrb[25].mxu1 }
 0xa7b   : > { %v4757_v35 = vpop.f32.mrb[26].mxu1 }
 0xa7c   : > { %4767 = vst.msk [vmem:[%s9230_s26 + $0x30] sm:$0xff] %vm1903_vm6, %v4755_v7  ;;  %v4758_v31 = vadd.f32 %v5198_v8, %v4757_v35  ;;  %v4759_v63 = vpop.f32.mrb[27].mxu1 }
 0xa7e   : > { %4768 = vst.msk [vmem:[%s9230_s26 + $0x38] sm:$0xff] %vm1903_vm6, %v4758_v31 }
 0xa7f   : > { %6850 = shalt.err (!%p6847_p13)
}
 0xa80   : > { %s6851_s15 = scalar_lea.hbm %s9253_s29, 1024  ;;  %s6855_s4 = scalar_lea.hbm %s9541_s13, 2048 }
 0xa81   : > { %p6852_p0 = scmp.ne.s32.totalorder %s9253_s29, %s6851_s15  ;;  %p6856_p3 = scmp.lt.u32.totalorder %s9253_s29, %s9541_s13 }
 0xa82   : > { %p6857_p4 = scmp.lt.u32.totalorder %s6855_s4, %s6851_s15  ;;  %p6859_p8 = scmp.lt.u32.totalorder %s6851_s15, %s9253_s29 }
 0xa83   : > { %p6853_p1 = pnand %p6852_p0, %p7109_p5 }
 0xa84   : > { %p6858_p7 = por %p6857_p4, %p6856_p3 }
 0xa85   : > { %p6854_p2 = pneg %p6853_p1 }
 0xa86   : > { %p6860_p9 = por %p6859_p8, %p6858_p7 }
 0xa88   : > { %p6861_p10 = pnand %p6860_p9, %p6854_p2 }
 0xa8a   : > { %6864 = shalt.err (!%p6861_p10)
}
 0xa8b   : > { %5826 = dma.vmem_to_hbm [thread:$0]  (%p7109_p5), %s9246_s18, 1024, %s9253_s29, %s4770_s3, %s6921_s1, %s6921_s1, %s9539_s9  }
 0xa8c PF: > { %s9542_s7 = sld [smem:[#allocation11_spill]]  ;;  %s9543_s6 = sld [smem:[#allocation9_spill]] }
 0xa92   : > { %p5842_p11 = scmp.ge.s32.totalorder %s9542_s7, 2  ;;  %s4837_s0 = sand.u32 1, %s9543_s6  }
 0xa93   : > { %s4838_s15 = scalar_lea.sflag [#allocation3], %s4837_s0 }
 0xa94   : > { %p5833_p12 = pnand %p5842_p11, %p7113_p6 }
 0xa96   : > { %6882 = dma.done.wait (!%p5833_p12), %s4838_s15, 1024  }
 0xa97   : > { %6884 = vsyncadd (!%p5833_p12), %s4838_s15, 4294966272  ;;  %s9545_s2 = sadd.s32 4294967294, %s9542_s7  }
 0xa98   : > { %s4846_s16 = sand.u32 1, %s9545_s2  }
 0xa99   : > { %s4847_s26 = scalar_lea.sflag [#allocation5], %s4846_s16 }
 0xa9a   : > { %6886 = dma.done.wait (!%p5833_p12), %s4847_s26, 320  }
 0xa9b   : > { %6888 = vsyncadd (!%p5833_p12), %s4847_s26, 4294966976  ;;  %s9546_s30 = sld [smem:[#allocation12_spill]]  ;;  %s9547_s1 = sld [smem:[#allocation10_spill]] }
 0xa9c   : > { %s9548_s9 = sld [smem:[#allocation13_spill]]  ;;  %s9549_s8 = smov %s6895_s5 }
 0xaa1   : > { %p42_p5 = scmp.ge.s32.totalorder %s9546_s30, 4   ;;  %s9550_s5 = smov %s9547_s1 }
 0xaa3   :  { %44 = sbr.rel (!%p42_p5) target bundleno = 24 (0x18), region = 215 }
 0xaaa   :  { %4861 = vsyncpa [#allocation3], 1 }
 0xaab   :  { %4863 = vsyncpa [#allocation3 + $0x1], 1 }
 0xaac   :  { %4864 = vsyncpa [#allocation5], 1 }
 0xaad   :  { %4866 = vsyncpa [#allocation5 + $0x1], 1 }

</bundles_post_ra>
